<compile_context>
chip_gen: v7x
topology: tpu7x:2x2x1
jax: 0.10.0
libtpu: 0.0.40
codegen_flags: <defaults>
</compile_context>

<pallas_src>
import math
import numpy as np
import jax
import jax.numpy as jnp
from jax.experimental import pallas as pl
from jax.experimental.pallas import tpu as pltpu

_CUBIC_KERNEL = np.array(
    [-0.01171875, -0.03515625, 0.11328125, 0.43359375,
      0.43359375,  0.11328125, -0.03515625, -0.01171875], dtype=np.float32)

SLOT = 128          # lane-aligned slot width for packed weight matrices


# ----------------------------- in-kernel math helpers -----------------------------

def _erf(x):
    # TODO(synk): torch.nn.GELU() uses exact erf; lax.erf may lack a Mosaic lowering, so use a
    # float32-accuracy polynomial (Abramowitz & Stegun 7.1.26, max abs err ~1.5e-7).
    a1, a2, a3, a4, a5 = 0.254829592, -0.284496736, 1.421413741, -1.453152027, 1.061405429
    p = 0.3275911
    ax = jnp.abs(x)
    t = 1.0 / (1.0 + p * ax)
    poly = ((((a5 * t + a4) * t + a3) * t + a2) * t + a1) * t
    y = 1.0 - poly * jnp.exp(-ax * ax)
    return jnp.where(x >= 0.0, y, -y)


def _gelu(x):
    return 0.5 * x * (1.0 + _erf(x * (1.0 / math.sqrt(2.0))))


def _group_norm1(x, gamma, beta, eps=1e-5):
    # nn.GroupNorm(num_groups=1): normalize over all of (C, L) for this sample (biased var).
    # Single-pass stats: sum and sum-of-squares together (one reduction sweep), kept in f32.
    n = float(x.shape[0] * x.shape[1])
    s1 = jnp.sum(x)
    s2 = jnp.sum(x * x)
    mean = s1 / n
    var = jnp.maximum(s2 / n - mean * mean, 0.0)
    return (x - mean) * jax.lax.rsqrt(var + eps) * gamma + beta


def _conv5_fused(x, w_flat, b, pad_ref, col_ref):
    """'same' conv1d (kernel 5, padding 2) as ONE matmul.

    x: (Cin, L);  w_flat: (Cout, 5*Cin) with column k*Cin+ci == w[co, ci, k];  b: (Cout, 1).
    pad_ref: persistent (CMAX, L+4) scratch whose 2-column halos are zeroed once.
    col_ref: persistent (5*CMAX, L) im2col scratch.
    """
    c, L = x.shape
    pad_ref[0:c, 2:2 + L] = x                       # interior only; halos stay zero
    for k in range(5):                              # static unroll: 5 shifted views -> im2col rows
        col_ref[k * c:(k + 1) * c, :] = pad_ref[0:c, k:k + L]
    return jnp.dot(w_flat, col_ref[0:5 * c, :], preferred_element_type=jnp.float32) + b


# ----------------------------------- kernel ---------------------------------------

def _make_kernel(channel_specs, skip_slots, conv_slots, B, in_ch, out_ch, Lh, cmax):
    def kernel(x_ref, s2_ref, w_ref, v_ref, o_ref, pad_ref, col_ref):
        # zero the padded-input scratch once (halo columns stay zero for every conv below)
        pad_ref[...] = jnp.zeros_like(pad_ref)

        # Downsample1d("cubic") for the WHOLE batch as one MXU matmul:
        # x is pre-reshaped to (B*Cin, L) on the host; S2 folds reflect-pad(3) + 8-tap
        # stride-2 depthwise conv into an (L, Lh) matrix.
        h_all = jnp.dot(x_ref[...], s2_ref[...], preferred_element_type=jnp.float32)  # (B*Cin, Lh)
        hs = [h_all[b * in_ch:(b + 1) * in_ch, :] for b in range(B)]

        # blocks outer / batch inner so each packed parameter slice is loaded once.
        for r, (ci, cm, co) in enumerate(channel_specs):
            slot1, slot2 = conv_slots[r]
            w1 = w_ref[0:cm, slot1 * SLOT:slot1 * SLOT + 5 * ci]      # (cm, 5*ci)
            w2 = w_ref[0:co, slot2 * SLOT:slot2 * SLOT + 5 * cm]      # (co, 5*cm)
            b1  = v_ref[0:cm, 6 * r + 0:6 * r + 1]
            g1g = v_ref[0:cm, 6 * r + 1:6 * r + 2]
            g1b = v_ref[0:cm, 6 * r + 2:6 * r + 3]
            b2  = v_ref[0:co, 6 * r + 3:6 * r + 4]
            g2g = v_ref[0:co, 6 * r + 4:6 * r + 5]
            g2b = v_ref[0:co, 6 * r + 5:6 * r + 6]
            skip_w = None
            if skip_slots[r] is not None:
                s = skip_slots[r]
                skip_w = w_ref[0:co, s * SLOT:s * SLOT + ci]          # (co, ci)

            for b in range(B):                                        # static unroll over batch
                h = hs[b]                                             # (ci, Lh)
                # identity skip specialized away at trace time when ci == co
                residual = h if skip_w is None else jnp.dot(
                    skip_w, h, preferred_element_type=jnp.float32)
                y = _conv5_fused(h, w1, b1, pad_ref, col_ref)
                y = _gelu(_group_norm1(y, g1g, g1b))
                y = _conv5_fused(y, w2, b2, pad_ref, col_ref)
                y = _gelu(_group_norm1(y, g2g, g2b))
                hs[b] = y + residual

        for b in range(B):
            o_ref[b] = hs[b].astype(o_ref.dtype)                      # (out_ch, Lh): 128-lane store

    return kernel


def down_block_1d(x, s2, w_all, v_all, channel_specs, skip_slots, conv_slots, out_channels):
    B, in_ch, L = x.shape
    Lh = s2.shape[1]
    cmax = w_all.shape[0]

    x2d = x.reshape(B * in_ch, L)          # free row-major reshape in the wrapper

    kernel = _make_kernel(channel_specs, skip_slots, conv_slots,
                          B, in_ch, out_channels, Lh, cmax)

    out = pl.pallas_call(
        kernel,
        out_shape=jax.ShapeDtypeStruct((B, out_channels, Lh), jnp.float32),
        grid_spec=pltpu.PrefetchScalarGridSpec(
            num_scalar_prefetch=0,
            grid=(1,),                                                # single step: no per-step overhead
            in_specs=[
                pl.BlockSpec(x2d.shape,  lambda i: (0, 0)),
                pl.BlockSpec(s2.shape,   lambda i: (0, 0)),
                pl.BlockSpec(w_all.shape, lambda i: (0, 0)),
                pl.BlockSpec(v_all.shape, lambda i: (0, 0)),
            ],
            out_specs=pl.BlockSpec((B, out_channels, Lh), lambda i: (0, 0, 0)),
            scratch_shapes=[
                pltpu.VMEM((cmax, Lh + 4), jnp.float32),              # padded-input staging
                pltpu.VMEM((5 * cmax, Lh), jnp.float32),              # im2col staging
            ],
        ),
        compiler_params=pltpu.CompilerParams(dimension_semantics=("arbitrary",)),
    )(x2d, s2, w_all, v_all)
    return out


# ------------------------------ host-side glue -------------------------------------

def build_downsample_matrix(L):
    """Fold reflect-pad(3) + 8-tap depthwise conv (stride 2) into an (L, L//2) matrix."""
    # TODO(synk): O(L^2); swap for the direct strided 8-tap form before scaling L to audio sizes.
    pad = 3
    Lp = L + 2 * pad
    ridx = np.empty(Lp, dtype=np.int64)
    for p in range(Lp):
        q = p - pad
        if q < 0:
            q = -q
        elif q >= L:
            q = 2 * (L - 1) - q
        ridx[p] = q
    Lh = L // 2
    S2 = np.zeros((L, Lh), dtype=np.float32)
    for j in range(Lh):
        for k in range(8):
            S2[ridx[2 * j + k], j] += _CUBIC_KERNEL[k]
    return jnp.asarray(S2)


def init_resnet_params(keys, ci, cm, co):
    p = {}
    p["skip_w"] = (0.2 * jax.random.normal(next(keys), (co, ci), jnp.float32)
                   if ci != co else None)
    p["c1w"] = 0.2 * jax.random.normal(next(keys), (cm, ci, 5), jnp.float32)
    p["c1b"] = 0.1 * jax.random.normal(next(keys), (cm,), jnp.float32)
    p["g1g"] = 1.0 + 0.1 * jax.random.normal(next(keys), (cm,), jnp.float32)
    p["g1b"] = 0.1 * jax.random.normal(next(keys), (cm,), jnp.float32)
    p["c2w"] = 0.2 * jax.random.normal(next(keys), (co, cm, 5), jnp.float32)
    p["c2b"] = 0.1 * jax.random.normal(next(keys), (co,), jnp.float32)
    p["g2g"] = 1.0 + 0.1 * jax.random.normal(next(keys), (co,), jnp.float32)
    p["g2b"] = 0.1 * jax.random.normal(next(keys), (co,), jnp.float32)
    return p


def pack_params(resnet_params, channel_specs, cmax):
    """Pack all weight matrices into one (cmax, n_slots*SLOT) slab (lane-aligned 128-wide
    slots) and all per-channel vectors into one (cmax, 128) slab (one lane per vector)."""
    weight_list = []
    skip_slots, conv_slots = [], []
    for p, (ci, cm, co) in zip(resnet_params, channel_specs):
        if p["skip_w"] is not None:
            skip_slots.append(len(weight_list))
            weight_list.append(np.asarray(p["skip_w"]))                       # (co, ci)
        else:
            skip_slots.append(None)
        # flatten conv weights so column k*Cin+ci matches the im2col row order
        c1 = np.asarray(jnp.transpose(p["c1w"], (0, 2, 1))).reshape(cm, 5 * ci)
        c2 = np.asarray(jnp.transpose(p["c2w"], (0, 2, 1))).reshape(co, 5 * cm)
        conv_slots.append((len(weight_list), len(weight_list) + 1))
        weight_list += [c1, c2]

    assert all(w.shape[1] <= SLOT and w.shape[0] <= cmax for w in weight_list)
    W = np.zeros((cmax, len(weight_list) * SLOT), np.float32)
    for s, wmat in enumerate(weight_list):
        r, c = wmat.shape
        W[:r, s * SLOT:s * SLOT + c] = wmat

    V = np.zeros((cmax, 128), np.float32)
    for r, (p, (ci, cm, co)) in enumerate(zip(resnet_params, channel_specs)):
        vecs = [(p["c1b"], cm), (p["g1g"], cm), (p["g1b"], cm),
                (p["c2b"], co), (p["g2g"], co), (p["g2b"], co)]
        for j, (v, n) in enumerate(vecs):
            V[:n, 6 * r + j] = np.asarray(v)

    return jnp.asarray(W), jnp.asarray(V), skip_slots, conv_slots


# ----------------------------- pure-JAX reference ----------------------------------

def _ref_conv1d(x, w, b):
    out = jax.lax.conv_general_dilated(
        x, w, window_strides=(1,), padding=((2, 2),),
        dimension_numbers=("NCH", "OIH", "NCH"))
    return out + b[None, :, None]


def _ref_gn1(x, g, b, eps=1e-5):
    mean = jnp.mean(x, axis=(1, 2), keepdims=True)
    var = jnp.mean((x - mean) ** 2, axis=(1, 2), keepdims=True)
    return (x - mean) / jnp.sqrt(var + eps) * g[None, :, None] + b[None, :, None]


def _ref_gelu(x):
    return 0.5 * x * (1.0 + jax.lax.erf(x / math.sqrt(2.0)))


def _ref_resblock(h, p):
    if p["skip_w"] is not None:
        residual = jnp.einsum("oc,bcl->bol", p["skip_w"], h)
    else:
        residual = h
    y = _ref_conv1d(h, p["c1w"], p["c1b"])
    y = _ref_gelu(_ref_gn1(y, p["g1g"], p["g1b"]))
    y = _ref_conv1d(y, p["c2w"], p["c2b"])
    y = _ref_gelu(_ref_gn1(y, p["g2g"], p["g2b"]))
    return y + residual


def ref_forward(x, resnet_params):
    L = x.shape[-1]
    Lh = L // 2
    xp = jnp.pad(x, ((0, 0), (0, 0), (3, 3)), mode="reflect")
    h = sum(float(_CUBIC_KERNEL[k]) * xp[:, :, k:k + 2 * Lh:2] for k in range(8))
    for p in resnet_params:
        h = _ref_resblock(h, p)
    return h


# ------------------------------------ main ------------------------------------------

if __name__ == "__main__":
    # DownBlock1D(in_channels=8, out_channels=8, mid_channels=16).
    # L=256 keeps everything tiny (x is 16 KiB) while making the downsampled length
    # Lh=128 exactly one lane width -> all activation tiles / output stores are lane-dense.
    B, in_ch, mid_ch, out_ch, L = 2, 8, 16, 8, 256
    CMAX = max(in_ch, mid_ch, out_ch)

    keys = iter(jax.random.split(jax.random.PRNGKey(0), 40))
    x = jax.random.normal(next(keys), (B, in_ch, L), jnp.float32)

    # Three ResConvBlocks: (in,mid,mid), (mid,mid,mid), (mid,mid,out)
    channel_specs = [(in_ch, mid_ch, mid_ch), (mid_ch, mid_ch, mid_ch), (mid_ch, mid_ch, out_ch)]
    resnet_params = [init_resnet_params(keys, ci, cm, co) for (ci, cm, co) in channel_specs]

    s2 = build_downsample_matrix(L)
    W_all, V_all, skip_slots, conv_slots = pack_params(resnet_params, channel_specs, CMAX)

    out = jax.block_until_ready(
        down_block_1d(x, s2, W_all, V_all, channel_specs, skip_slots, conv_slots, out_ch))

    ref = ref_forward(x, resnet_params)
    assert out.shape == (B, out_ch, L // 2), out.shape
    np.testing.assert_allclose(np.asarray(out), np.asarray(ref), rtol=1e-4, atol=1e-4)

    print("KERNEL_OK")
</pallas_src>

<mosaic_0001>
module attributes {stable_mosaic.version = 11 : i64} {
  func.func @kernel(%arg0: i32, %arg1: memref<16x256xf32, #tpu.memory_space<vmem>>, %arg2: memref<256x128xf32, #tpu.memory_space<vmem>>, %arg3: memref<16x1024xf32, #tpu.memory_space<vmem>>, %arg4: memref<16x128xf32, #tpu.memory_space<vmem>>, %arg5: memref<2x8x128xf32, #tpu.memory_space<vmem>>, %arg6: memref<16x132xf32, #tpu.memory_space<vmem>>, %arg7: memref<80x128xf32, #tpu.memory_space<vmem>>) attributes {dimension_semantics = [#tpu.dimension_semantics<arbitrary>], iteration_bounds = array<i64: 1>, scalar_prefetch = 0 : i64, scratch_operands = 2 : i64, tpu.core_type = #tpu.core_type<tc>, window_params = [{pipeline_mode = #tpu.pipeline_mode<synchronous>, transform_indices = @transform_0, window_bounds = array<i64: 16, 256>}, {pipeline_mode = #tpu.pipeline_mode<synchronous>, transform_indices = @transform_1, window_bounds = array<i64: 256, 128>}, {pipeline_mode = #tpu.pipeline_mode<synchronous>, transform_indices = @transform_2, window_bounds = array<i64: 16, 1024>}, {pipeline_mode = #tpu.pipeline_mode<synchronous>, transform_indices = @transform_3, window_bounds = array<i64: 16, 128>}, {pipeline_mode = #tpu.pipeline_mode<synchronous>, transform_indices = @transform_4, window_bounds = array<i64: 2, 8, 128>}]} {
    %cst = arith.constant 0.000000e+00 : f32
    %0 = vector.broadcast %cst : f32 to vector<16x132xf32>
    %c0 = arith.constant 0 : index
    %c0_0 = arith.constant 0 : index
    %1 = vector.load %arg6[%c0, %c0_0] : memref<16x132xf32, #tpu.memory_space<vmem>>, vector<16x132xf32>
    tpu.vector_store %arg6[%c0, %c0_0], %0 {strides = array<i32>} : memref<16x132xf32, #tpu.memory_space<vmem>>, vector<16x132xf32>,
    %c0_1 = arith.constant 0 : index
    %c0_2 = arith.constant 0 : index
    %2 = vector.load %arg1[%c0_1, %c0_2] : memref<16x256xf32, #tpu.memory_space<vmem>>, vector<16x256xf32>
    %c0_3 = arith.constant 0 : index
    %c0_4 = arith.constant 0 : index
    %3 = vector.load %arg2[%c0_3, %c0_4] : memref<256x128xf32, #tpu.memory_space<vmem>>, vector<256x128xf32>
    %cst_5 = arith.constant dense<0.000000e+00> : vector<16x128xf32>
    %4 = tpu.matmul %2, %3, %cst_5 {dimension_numbers = #tpu.dot_dimension_numbers<[1], [0], [0], [1], [0, 0, 1, 1], [], []>} : vector<16x256xf32>, vector<256x128xf32>, vector<16x128xf32> -> vector<16x128xf32>
    %5 = vector.extract_strided_slice %4 {offsets = [0, 0], sizes = [8, 128], strides = [1, 1]} : vector<16x128xf32> to vector<8x128xf32>
    %6 = vector.extract_strided_slice %4 {offsets = [8, 0], sizes = [8, 128], strides = [1, 1]} : vector<16x128xf32> to vector<8x128xf32>
    %c0_6 = arith.constant 0 : index
    %c128 = arith.constant 128 : index
    %7 = vector.load %arg3[%c0_6, %c128] : memref<16x1024xf32, #tpu.memory_space<vmem>>, vector<16x40xf32>
    %c0_7 = arith.constant 0 : index
    %c256 = arith.constant 256 : index
    %8 = vector.load %arg3[%c0_7, %c256] : memref<16x1024xf32, #tpu.memory_space<vmem>>, vector<16x80xf32>
    %c0_8 = arith.constant 0 : index
    %c0_9 = arith.constant 0 : index
    %9 = vector.load %arg4[%c0_8, %c0_9] : memref<16x128xf32, #tpu.memory_space<vmem>>, vector<16x1xf32>
    %c0_10 = arith.constant 0 : index
    %c1 = arith.constant 1 : index
    %10 = vector.load %arg4[%c0_10, %c1] : memref<16x128xf32, #tpu.memory_space<vmem>>, vector<16x1xf32>
    %c0_11 = arith.constant 0 : index
    %c2 = arith.constant 2 : index
    %11 = vector.load %arg4[%c0_11, %c2] : memref<16x128xf32, #tpu.memory_space<vmem>>, vector<16x1xf32>
    %c0_12 = arith.constant 0 : index
    %c3 = arith.constant 3 : index
    %12 = vector.load %arg4[%c0_12, %c3] : memref<16x128xf32, #tpu.memory_space<vmem>>, vector<16x1xf32>
    %c0_13 = arith.constant 0 : index
    %c4 = arith.constant 4 : index
    %13 = vector.load %arg4[%c0_13, %c4] : memref<16x128xf32, #tpu.memory_space<vmem>>, vector<16x1xf32>
    %c0_14 = arith.constant 0 : index
    %c5 = arith.constant 5 : index
    %14 = vector.load %arg4[%c0_14, %c5] : memref<16x128xf32, #tpu.memory_space<vmem>>, vector<16x1xf32>
    %c0_15 = arith.constant 0 : index
    %c0_16 = arith.constant 0 : index
    %15 = vector.load %arg3[%c0_15, %c0_16] : memref<16x1024xf32, #tpu.memory_space<vmem>>, vector<16x8xf32>
    %cst_17 = arith.constant dense<0.000000e+00> : vector<16x128xf32>
    %16 = tpu.matmul %15, %5, %cst_17 {dimension_numbers = #tpu.dot_dimension_numbers<[1], [0], [0], [1], [0, 0, 1, 1], [], []>} : vector<16x8xf32>, vector<8x128xf32>, vector<16x128xf32> -> vector<16x128xf32>
    %c0_18 = arith.constant 0 : index
    %c2_19 = arith.constant 2 : index
    %17 = vector.load %arg6[%c0_18, %c2_19] : memref<16x132xf32, #tpu.memory_space<vmem>>, vector<8x128xf32>
    tpu.vector_store %arg6[%c0_18, %c2_19], %5 {strides = array<i32>} : memref<16x132xf32, #tpu.memory_space<vmem>>, vector<8x128xf32>,
    %c0_20 = arith.constant 0 : index
    %c0_21 = arith.constant 0 : index
    %18 = vector.load %arg6[%c0_20, %c0_21] : memref<16x132xf32, #tpu.memory_space<vmem>>, vector<8x128xf32>
    %c0_22 = arith.constant 0 : index
    %c0_23 = arith.constant 0 : index
    %19 = vector.load %arg7[%c0_22, %c0_23] : memref<80x128xf32, #tpu.memory_space<vmem>>, vector<8x128xf32>
    tpu.vector_store %arg7[%c0_22, %c0_23], %18 {strides = array<i32>} : memref<80x128xf32, #tpu.memory_space<vmem>>, vector<8x128xf32>,
    %c0_24 = arith.constant 0 : index
    %c1_25 = arith.constant 1 : index
    %20 = vector.load %arg6[%c0_24, %c1_25] : memref<16x132xf32, #tpu.memory_space<vmem>>, vector<8x128xf32>
    %c8 = arith.constant 8 : index
    %c0_26 = arith.constant 0 : index
    %21 = vector.load %arg7[%c8, %c0_26] : memref<80x128xf32, #tpu.memory_space<vmem>>, vector<8x128xf32>
    tpu.vector_store %arg7[%c8, %c0_26], %20 {strides = array<i32>} : memref<80x128xf32, #tpu.memory_space<vmem>>, vector<8x128xf32>,
    %c0_27 = arith.constant 0 : index
    %c2_28 = arith.constant 2 : index
    %22 = vector.load %arg6[%c0_27, %c2_28] : memref<16x132xf32, #tpu.memory_space<vmem>>, vector<8x128xf32>
    %c16 = arith.constant 16 : index
    %c0_29 = arith.constant 0 : index
    %23 = vector.load %arg7[%c16, %c0_29] : memref<80x128xf32, #tpu.memory_space<vmem>>, vector<8x128xf32>
    tpu.vector_store %arg7[%c16, %c0_29], %22 {strides = array<i32>} : memref<80x128xf32, #tpu.memory_space<vmem>>, vector<8x128xf32>,
    %c0_30 = arith.constant 0 : index
    %c3_31 = arith.constant 3 : index
    %24 = vector.load %arg6[%c0_30, %c3_31] : memref<16x132xf32, #tpu.memory_space<vmem>>, vector<8x128xf32>
    %c24 = arith.constant 24 : index
    %c0_32 = arith.constant 0 : index
    %25 = vector.load %arg7[%c24, %c0_32] : memref<80x128xf32, #tpu.memory_space<vmem>>, vector<8x128xf32>
    tpu.vector_store %arg7[%c24, %c0_32], %24 {strides = array<i32>} : memref<80x128xf32, #tpu.memory_space<vmem>>, vector<8x128xf32>,
    %c0_33 = arith.constant 0 : index
    %c4_34 = arith.constant 4 : index
    %26 = vector.load %arg6[%c0_33, %c4_34] : memref<16x132xf32, #tpu.memory_space<vmem>>, vector<8x128xf32>
    %c32 = arith.constant 32 : index
    %c0_35 = arith.constant 0 : index
    %27 = vector.load %arg7[%c32, %c0_35] : memref<80x128xf32, #tpu.memory_space<vmem>>, vector<8x128xf32>
    tpu.vector_store %arg7[%c32, %c0_35], %26 {strides = array<i32>} : memref<80x128xf32, #tpu.memory_space<vmem>>, vector<8x128xf32>,
    %c0_36 = arith.constant 0 : index
    %c0_37 = arith.constant 0 : index
    %28 = vector.load %arg7[%c0_36, %c0_37] : memref<80x128xf32, #tpu.memory_space<vmem>>, vector<40x128xf32>
    %cst_38 = arith.constant dense<0.000000e+00> : vector<16x128xf32>
    %29 = tpu.matmul %7, %28, %cst_38 {dimension_numbers = #tpu.dot_dimension_numbers<[1], [0], [0], [1], [0, 0, 1, 1], [], []>} : vector<16x40xf32>, vector<40x128xf32>, vector<16x128xf32> -> vector<16x128xf32>
    %30 = vector.broadcast %9 : vector<16x1xf32> to vector<16x128xf32>
    %31 = arith.addf %29, %30 : vector<16x128xf32>
    %32 = vector.shape_cast %31 : vector<16x128xf32> to vector<1x16x128xf32>
    %cst_39 = arith.constant dense<0.000000e+00> : vector<1xf32>
    %33 = vector.multi_reduction <add>, %32, %cst_39 [1, 2] : vector<1x16x128xf32> to vector<1xf32>
    %34 = vector.shape_cast %33 : vector<1xf32> to vector<1x1x1xf32>
    %35 = vector.extract %34[0, 0, 0] : f32 from vector<1x1x1xf32>
    %36 = arith.mulf %31, %31 : vector<16x128xf32>
    %37 = vector.shape_cast %36 : vector<16x128xf32> to vector<1x16x128xf32>
    %cst_40 = arith.constant dense<0.000000e+00> : vector<1xf32>
    %38 = vector.multi_reduction <add>, %37, %cst_40 [1, 2] : vector<1x16x128xf32> to vector<1xf32>
    %39 = vector.shape_cast %38 : vector<1xf32> to vector<1x1x1xf32>
    %40 = vector.extract %39[0, 0, 0] : f32 from vector<1x1x1xf32>
    %cst_41 = arith.constant 2.048000e+03 : f32
    %41 = arith.divf %35, %cst_41 : f32
    %cst_42 = arith.constant 2.048000e+03 : f32
    %42 = arith.divf %40, %cst_42 : f32
    %43 = arith.mulf %41, %41 : f32
    %44 = arith.subf %42, %43 : f32
    %cst_43 = arith.constant 0.000000e+00 : f32
    %45 = arith.maximumf %44, %cst_43 : f32
    %46 = vector.broadcast %41 : f32 to vector<16x128xf32>
    %47 = arith.subf %31, %46 : vector<16x128xf32>
    %cst_44 = arith.constant 9.99999974E-6 : f32
    %48 = arith.addf %45, %cst_44 : f32
    %49 = math.rsqrt %48 : f32
    %50 = vector.broadcast %49 : f32 to vector<16x128xf32>
    %51 = arith.mulf %47, %50 : vector<16x128xf32>
    %52 = vector.broadcast %10 : vector<16x1xf32> to vector<16x128xf32>
    %53 = arith.mulf %51, %52 : vector<16x128xf32>
    %54 = vector.broadcast %11 : vector<16x1xf32> to vector<16x128xf32>
    %55 = arith.addf %53, %54 : vector<16x128xf32>
    %cst_45 = arith.constant 5.000000e-01 : f32
    %56 = vector.broadcast %cst_45 : f32 to vector<16x128xf32>
    %57 = arith.mulf %56, %55 : vector<16x128xf32>
    %cst_46 = arith.constant 0.707106769 : f32
    %58 = vector.broadcast %cst_46 : f32 to vector<16x128xf32>
    %59 = arith.mulf %55, %58 : vector<16x128xf32>
    %60 = math.absf %59 : vector<16x128xf32>
    %cst_47 = arith.constant 0.327591091 : f32
    %61 = vector.broadcast %cst_47 : f32 to vector<16x128xf32>
    %62 = arith.mulf %61, %60 : vector<16x128xf32>
    %cst_48 = arith.constant 1.000000e+00 : f32
    %63 = vector.broadcast %cst_48 : f32 to vector<16x128xf32>
    %64 = arith.addf %63, %62 : vector<16x128xf32>
    %cst_49 = arith.constant 1.000000e+00 : f32
    %65 = vector.broadcast %cst_49 : f32 to vector<16x128xf32>
    %66 = arith.divf %65, %64 : vector<16x128xf32>
    %cst_50 = arith.constant 1.06140542 : f32
    %67 = vector.broadcast %cst_50 : f32 to vector<16x128xf32>
    %68 = arith.mulf %67, %66 : vector<16x128xf32>
    %cst_51 = arith.constant -1.45315206 : f32
    %69 = vector.broadcast %cst_51 : f32 to vector<16x128xf32>
    %70 = arith.addf %68, %69 : vector<16x128xf32>
    %71 = arith.mulf %70, %66 : vector<16x128xf32>
    %cst_52 = arith.constant 1.42141378 : f32
    %72 = vector.broadcast %cst_52 : f32 to vector<16x128xf32>
    %73 = arith.addf %71, %72 : vector<16x128xf32>
    %74 = arith.mulf %73, %66 : vector<16x128xf32>
    %cst_53 = arith.constant -0.284496725 : f32
    %75 = vector.broadcast %cst_53 : f32 to vector<16x128xf32>
    %76 = arith.addf %74, %75 : vector<16x128xf32>
    %77 = arith.mulf %76, %66 : vector<16x128xf32>
    %cst_54 = arith.constant 0.254829586 : f32
    %78 = vector.broadcast %cst_54 : f32 to vector<16x128xf32>
    %79 = arith.addf %77, %78 : vector<16x128xf32>
    %80 = arith.mulf %79, %66 : vector<16x128xf32>
    %cst_55 = arith.constant 0.000000e+00 : f32
    %81 = vector.broadcast %cst_55 : f32 to vector<16x128xf32>
    %82 = arith.subf %81, %60 : vector<16x128xf32>
    %83 = arith.mulf %82, %60 : vector<16x128xf32>
    %84 = math.exp %83 : vector<16x128xf32>
    %85 = arith.mulf %80, %84 : vector<16x128xf32>
    %cst_56 = arith.constant 1.000000e+00 : f32
    %86 = vector.broadcast %cst_56 : f32 to vector<16x128xf32>
    %87 = arith.subf %86, %85 : vector<16x128xf32>
    %cst_57 = arith.constant 0.000000e+00 : f32
    %88 = vector.broadcast %cst_57 : f32 to vector<16x128xf32>
    %89 = arith.cmpf oge, %59, %88 : vector<16x128xf32>
    %cst_58 = arith.constant 0.000000e+00 : f32
    %90 = vector.broadcast %cst_58 : f32 to vector<16x128xf32>
    %91 = arith.subf %90, %87 : vector<16x128xf32>
    %92 = arith.select %89, %87, %91 : vector<16x128xi1>, vector<16x128xf32>
    %cst_59 = arith.constant 1.000000e+00 : f32
    %93 = vector.broadcast %cst_59 : f32 to vector<16x128xf32>
    %94 = arith.addf %93, %92 : vector<16x128xf32>
    %95 = arith.mulf %57, %94 : vector<16x128xf32>
    %c0_60 = arith.constant 0 : index
    %c2_61 = arith.constant 2 : index
    %96 = vector.load %arg6[%c0_60, %c2_61] : memref<16x132xf32, #tpu.memory_space<vmem>>, vector<16x128xf32>
    tpu.vector_store %arg6[%c0_60, %c2_61], %95 {strides = array<i32>} : memref<16x132xf32, #tpu.memory_space<vmem>>, vector<16x128xf32>,
    %c0_62 = arith.constant 0 : index
    %c0_63 = arith.constant 0 : index
    %97 = vector.load %arg6[%c0_62, %c0_63] : memref<16x132xf32, #tpu.memory_space<vmem>>, vector<16x128xf32>
    %c0_64 = arith.constant 0 : index
    %c0_65 = arith.constant 0 : index
    %98 = vector.load %arg7[%c0_64, %c0_65] : memref<80x128xf32, #tpu.memory_space<vmem>>, vector<16x128xf32>
    tpu.vector_store %arg7[%c0_64, %c0_65], %97 {strides = array<i32>} : memref<80x128xf32, #tpu.memory_space<vmem>>, vector<16x128xf32>,
    %c0_66 = arith.constant 0 : index
    %c1_67 = arith.constant 1 : index
    %99 = vector.load %arg6[%c0_66, %c1_67] : memref<16x132xf32, #tpu.memory_space<vmem>>, vector<16x128xf32>
    %c16_68 = arith.constant 16 : index
    %c0_69 = arith.constant 0 : index
    %100 = vector.load %arg7[%c16_68, %c0_69] : memref<80x128xf32, #tpu.memory_space<vmem>>, vector<16x128xf32>
    tpu.vector_store %arg7[%c16_68, %c0_69], %99 {strides = array<i32>} : memref<80x128xf32, #tpu.memory_space<vmem>>, vector<16x128xf32>,
    %c0_70 = arith.constant 0 : index
    %c2_71 = arith.constant 2 : index
    %101 = vector.load %arg6[%c0_70, %c2_71] : memref<16x132xf32, #tpu.memory_space<vmem>>, vector<16x128xf32>
    %c32_72 = arith.constant 32 : index
    %c0_73 = arith.constant 0 : index
    %102 = vector.load %arg7[%c32_72, %c0_73] : memref<80x128xf32, #tpu.memory_space<vmem>>, vector<16x128xf32>
    tpu.vector_store %arg7[%c32_72, %c0_73], %101 {strides = array<i32>} : memref<80x128xf32, #tpu.memory_space<vmem>>, vector<16x128xf32>,
    %c0_74 = arith.constant 0 : index
    %c3_75 = arith.constant 3 : index
    %103 = vector.load %arg6[%c0_74, %c3_75] : memref<16x132xf32, #tpu.memory_space<vmem>>, vector<16x128xf32>
    %c48 = arith.constant 48 : index
    %c0_76 = arith.constant 0 : index
    %104 = vector.load %arg7[%c48, %c0_76] : memref<80x128xf32, #tpu.memory_space<vmem>>, vector<16x128xf32>
    tpu.vector_store %arg7[%c48, %c0_76], %103 {strides = array<i32>} : memref<80x128xf32, #tpu.memory_space<vmem>>, vector<16x128xf32>,
    %c0_77 = arith.constant 0 : index
    %c4_78 = arith.constant 4 : index
    %105 = vector.load %arg6[%c0_77, %c4_78] : memref<16x132xf32, #tpu.memory_space<vmem>>, vector<16x128xf32>
    %c64 = arith.constant 64 : index
    %c0_79 = arith.constant 0 : index
    %106 = vector.load %arg7[%c64, %c0_79] : memref<80x128xf32, #tpu.memory_space<vmem>>, vector<16x128xf32>
    tpu.vector_store %arg7[%c64, %c0_79], %105 {strides = array<i32>} : memref<80x128xf32, #tpu.memory_space<vmem>>, vector<16x128xf32>,
    %c0_80 = arith.constant 0 : index
    %c0_81 = arith.constant 0 : index
    %107 = vector.load %arg7[%c0_80, %c0_81] : memref<80x128xf32, #tpu.memory_space<vmem>>, vector<80x128xf32>
    %cst_82 = arith.constant dense<0.000000e+00> : vector<16x128xf32>
    %108 = tpu.matmul %8, %107, %cst_82 {dimension_numbers = #tpu.dot_dimension_numbers<[1], [0], [0], [1], [0, 0, 1, 1], [], []>} : vector<16x80xf32>, vector<80x128xf32>, vector<16x128xf32> -> vector<16x128xf32>
    %109 = vector.broadcast %12 : vector<16x1xf32> to vector<16x128xf32>
    %110 = arith.addf %108, %109 : vector<16x128xf32>
    %111 = vector.shape_cast %110 : vector<16x128xf32> to vector<1x16x128xf32>
    %cst_83 = arith.constant dense<0.000000e+00> : vector<1xf32>
    %112 = vector.multi_reduction <add>, %111, %cst_83 [1, 2] : vector<1x16x128xf32> to vector<1xf32>
    %113 = vector.shape_cast %112 : vector<1xf32> to vector<1x1x1xf32>
    %114 = vector.extract %113[0, 0, 0] : f32 from vector<1x1x1xf32>
    %115 = arith.mulf %110, %110 : vector<16x128xf32>
    %116 = vector.shape_cast %115 : vector<16x128xf32> to vector<1x16x128xf32>
    %cst_84 = arith.constant dense<0.000000e+00> : vector<1xf32>
    %117 = vector.multi_reduction <add>, %116, %cst_84 [1, 2] : vector<1x16x128xf32> to vector<1xf32>
    %118 = vector.shape_cast %117 : vector<1xf32> to vector<1x1x1xf32>
    %119 = vector.extract %118[0, 0, 0] : f32 from vector<1x1x1xf32>
    %cst_85 = arith.constant 2.048000e+03 : f32
    %120 = arith.divf %114, %cst_85 : f32
    %cst_86 = arith.constant 2.048000e+03 : f32
    %121 = arith.divf %119, %cst_86 : f32
    %122 = arith.mulf %120, %120 : f32
    %123 = arith.subf %121, %122 : f32
    %cst_87 = arith.constant 0.000000e+00 : f32
    %124 = arith.maximumf %123, %cst_87 : f32
    %125 = vector.broadcast %120 : f32 to vector<16x128xf32>
    %126 = arith.subf %110, %125 : vector<16x128xf32>
    %cst_88 = arith.constant 9.99999974E-6 : f32
    %127 = arith.addf %124, %cst_88 : f32
    %128 = math.rsqrt %127 : f32
    %129 = vector.broadcast %128 : f32 to vector<16x128xf32>
    %130 = arith.mulf %126, %129 : vector<16x128xf32>
    %131 = vector.broadcast %13 : vector<16x1xf32> to vector<16x128xf32>
    %132 = arith.mulf %130, %131 : vector<16x128xf32>
    %133 = vector.broadcast %14 : vector<16x1xf32> to vector<16x128xf32>
    %134 = arith.addf %132, %133 : vector<16x128xf32>
    %cst_89 = arith.constant 5.000000e-01 : f32
    %135 = vector.broadcast %cst_89 : f32 to vector<16x128xf32>
    %136 = arith.mulf %135, %134 : vector<16x128xf32>
    %cst_90 = arith.constant 0.707106769 : f32
    %137 = vector.broadcast %cst_90 : f32 to vector<16x128xf32>
    %138 = arith.mulf %134, %137 : vector<16x128xf32>
    %139 = math.absf %138 : vector<16x128xf32>
    %cst_91 = arith.constant 0.327591091 : f32
    %140 = vector.broadcast %cst_91 : f32 to vector<16x128xf32>
    %141 = arith.mulf %140, %139 : vector<16x128xf32>
    %cst_92 = arith.constant 1.000000e+00 : f32
    %142 = vector.broadcast %cst_92 : f32 to vector<16x128xf32>
    %143 = arith.addf %142, %141 : vector<16x128xf32>
    %cst_93 = arith.constant 1.000000e+00 : f32
    %144 = vector.broadcast %cst_93 : f32 to vector<16x128xf32>
    %145 = arith.divf %144, %143 : vector<16x128xf32>
    %cst_94 = arith.constant 1.06140542 : f32
    %146 = vector.broadcast %cst_94 : f32 to vector<16x128xf32>
    %147 = arith.mulf %146, %145 : vector<16x128xf32>
    %cst_95 = arith.constant -1.45315206 : f32
    %148 = vector.broadcast %cst_95 : f32 to vector<16x128xf32>
    %149 = arith.addf %147, %148 : vector<16x128xf32>
    %150 = arith.mulf %149, %145 : vector<16x128xf32>
    %cst_96 = arith.constant 1.42141378 : f32
    %151 = vector.broadcast %cst_96 : f32 to vector<16x128xf32>
    %152 = arith.addf %150, %151 : vector<16x128xf32>
    %153 = arith.mulf %152, %145 : vector<16x128xf32>
    %cst_97 = arith.constant -0.284496725 : f32
    %154 = vector.broadcast %cst_97 : f32 to vector<16x128xf32>
    %155 = arith.addf %153, %154 : vector<16x128xf32>
    %156 = arith.mulf %155, %145 : vector<16x128xf32>
    %cst_98 = arith.constant 0.254829586 : f32
    %157 = vector.broadcast %cst_98 : f32 to vector<16x128xf32>
    %158 = arith.addf %156, %157 : vector<16x128xf32>
    %159 = arith.mulf %158, %145 : vector<16x128xf32>
    %cst_99 = arith.constant 0.000000e+00 : f32
    %160 = vector.broadcast %cst_99 : f32 to vector<16x128xf32>
    %161 = arith.subf %160, %139 : vector<16x128xf32>
    %162 = arith.mulf %161, %139 : vector<16x128xf32>
    %163 = math.exp %162 : vector<16x128xf32>
    %164 = arith.mulf %159, %163 : vector<16x128xf32>
    %cst_100 = arith.constant 1.000000e+00 : f32
    %165 = vector.broadcast %cst_100 : f32 to vector<16x128xf32>
    %166 = arith.subf %165, %164 : vector<16x128xf32>
    %cst_101 = arith.constant 0.000000e+00 : f32
    %167 = vector.broadcast %cst_101 : f32 to vector<16x128xf32>
    %168 = arith.cmpf oge, %138, %167 : vector<16x128xf32>
    %cst_102 = arith.constant 0.000000e+00 : f32
    %169 = vector.broadcast %cst_102 : f32 to vector<16x128xf32>
    %170 = arith.subf %169, %166 : vector<16x128xf32>
    %171 = arith.select %168, %166, %170 : vector<16x128xi1>, vector<16x128xf32>
    %cst_103 = arith.constant 1.000000e+00 : f32
    %172 = vector.broadcast %cst_103 : f32 to vector<16x128xf32>
    %173 = arith.addf %172, %171 : vector<16x128xf32>
    %174 = arith.mulf %136, %173 : vector<16x128xf32>
    %175 = arith.addf %174, %16 : vector<16x128xf32>
    %cst_104 = arith.constant dense<0.000000e+00> : vector<16x128xf32>
    %176 = tpu.matmul %15, %6, %cst_104 {dimension_numbers = #tpu.dot_dimension_numbers<[1], [0], [0], [1], [0, 0, 1, 1], [], []>} : vector<16x8xf32>, vector<8x128xf32>, vector<16x128xf32> -> vector<16x128xf32>
    %c0_105 = arith.constant 0 : index
    %c2_106 = arith.constant 2 : index
    %177 = vector.load %arg6[%c0_105, %c2_106] : memref<16x132xf32, #tpu.memory_space<vmem>>, vector<8x128xf32>
    tpu.vector_store %arg6[%c0_105, %c2_106], %6 {strides = array<i32>} : memref<16x132xf32, #tpu.memory_space<vmem>>, vector<8x128xf32>,
    %c0_107 = arith.constant 0 : index
    %c0_108 = arith.constant 0 : index
    %178 = vector.load %arg6[%c0_107, %c0_108] : memref<16x132xf32, #tpu.memory_space<vmem>>, vector<8x128xf32>
    %c0_109 = arith.constant 0 : index
    %c0_110 = arith.constant 0 : index
    %179 = vector.load %arg7[%c0_109, %c0_110] : memref<80x128xf32, #tpu.memory_space<vmem>>, vector<8x128xf32>
    tpu.vector_store %arg7[%c0_109, %c0_110], %178 {strides = array<i32>} : memref<80x128xf32, #tpu.memory_space<vmem>>, vector<8x128xf32>,
    %c0_111 = arith.constant 0 : index
    %c1_112 = arith.constant 1 : index
    %180 = vector.load %arg6[%c0_111, %c1_112] : memref<16x132xf32, #tpu.memory_space<vmem>>, vector<8x128xf32>
    %c8_113 = arith.constant 8 : index
    %c0_114 = arith.constant 0 : index
    %181 = vector.load %arg7[%c8_113, %c0_114] : memref<80x128xf32, #tpu.memory_space<vmem>>, vector<8x128xf32>
    tpu.vector_store %arg7[%c8_113, %c0_114], %180 {strides = array<i32>} : memref<80x128xf32, #tpu.memory_space<vmem>>, vector<8x128xf32>,
    %c0_115 = arith.constant 0 : index
    %c2_116 = arith.constant 2 : index
    %182 = vector.load %arg6[%c0_115, %c2_116] : memref<16x132xf32, #tpu.memory_space<vmem>>, vector<8x128xf32>
    %c16_117 = arith.constant 16 : index
    %c0_118 = arith.constant 0 : index
    %183 = vector.load %arg7[%c16_117, %c0_118] : memref<80x128xf32, #tpu.memory_space<vmem>>, vector<8x128xf32>
    tpu.vector_store %arg7[%c16_117, %c0_118], %182 {strides = array<i32>} : memref<80x128xf32, #tpu.memory_space<vmem>>, vector<8x128xf32>,
    %c0_119 = arith.constant 0 : index
    %c3_120 = arith.constant 3 : index
    %184 = vector.load %arg6[%c0_119, %c3_120] : memref<16x132xf32, #tpu.memory_space<vmem>>, vector<8x128xf32>
    %c24_121 = arith.constant 24 : index
    %c0_122 = arith.constant 0 : index
    %185 = vector.load %arg7[%c24_121, %c0_122] : memref<80x128xf32, #tpu.memory_space<vmem>>, vector<8x128xf32>
    tpu.vector_store %arg7[%c24_121, %c0_122], %184 {strides = array<i32>} : memref<80x128xf32, #tpu.memory_space<vmem>>, vector<8x128xf32>,
    %c0_123 = arith.constant 0 : index
    %c4_124 = arith.constant 4 : index
    %186 = vector.load %arg6[%c0_123, %c4_124] : memref<16x132xf32, #tpu.memory_space<vmem>>, vector<8x128xf32>
    %c32_125 = arith.constant 32 : index
    %c0_126 = arith.constant 0 : index
    %187 = vector.load %arg7[%c32_125, %c0_126] : memref<80x128xf32, #tpu.memory_space<vmem>>, vector<8x128xf32>
    tpu.vector_store %arg7[%c32_125, %c0_126], %186 {strides = array<i32>} : memref<80x128xf32, #tpu.memory_space<vmem>>, vector<8x128xf32>,
    %c0_127 = arith.constant 0 : index
    %c0_128 = arith.constant 0 : index
    %188 = vector.load %arg7[%c0_127, %c0_128] : memref<80x128xf32, #tpu.memory_space<vmem>>, vector<40x128xf32>
    %cst_129 = arith.constant dense<0.000000e+00> : vector<16x128xf32>
    %189 = tpu.matmul %7, %188, %cst_129 {dimension_numbers = #tpu.dot_dimension_numbers<[1], [0], [0], [1], [0, 0, 1, 1], [], []>} : vector<16x40xf32>, vector<40x128xf32>, vector<16x128xf32> -> vector<16x128xf32>
    %190 = vector.broadcast %9 : vector<16x1xf32> to vector<16x128xf32>
    %191 = arith.addf %189, %190 : vector<16x128xf32>
    %192 = vector.shape_cast %191 : vector<16x128xf32> to vector<1x16x128xf32>
    %cst_130 = arith.constant dense<0.000000e+00> : vector<1xf32>
    %193 = vector.multi_reduction <add>, %192, %cst_130 [1, 2] : vector<1x16x128xf32> to vector<1xf32>
    %194 = vector.shape_cast %193 : vector<1xf32> to vector<1x1x1xf32>
    %195 = vector.extract %194[0, 0, 0] : f32 from vector<1x1x1xf32>
    %196 = arith.mulf %191, %191 : vector<16x128xf32>
    %197 = vector.shape_cast %196 : vector<16x128xf32> to vector<1x16x128xf32>
    %cst_131 = arith.constant dense<0.000000e+00> : vector<1xf32>
    %198 = vector.multi_reduction <add>, %197, %cst_131 [1, 2] : vector<1x16x128xf32> to vector<1xf32>
    %199 = vector.shape_cast %198 : vector<1xf32> to vector<1x1x1xf32>
    %200 = vector.extract %199[0, 0, 0] : f32 from vector<1x1x1xf32>
    %cst_132 = arith.constant 2.048000e+03 : f32
    %201 = arith.divf %195, %cst_132 : f32
    %cst_133 = arith.constant 2.048000e+03 : f32
    %202 = arith.divf %200, %cst_133 : f32
    %203 = arith.mulf %201, %201 : f32
    %204 = arith.subf %202, %203 : f32
    %cst_134 = arith.constant 0.000000e+00 : f32
    %205 = arith.maximumf %204, %cst_134 : f32
    %206 = vector.broadcast %201 : f32 to vector<16x128xf32>
    %207 = arith.subf %191, %206 : vector<16x128xf32>
    %cst_135 = arith.constant 9.99999974E-6 : f32
    %208 = arith.addf %205, %cst_135 : f32
    %209 = math.rsqrt %208 : f32
    %210 = vector.broadcast %209 : f32 to vector<16x128xf32>
    %211 = arith.mulf %207, %210 : vector<16x128xf32>
    %212 = vector.broadcast %10 : vector<16x1xf32> to vector<16x128xf32>
    %213 = arith.mulf %211, %212 : vector<16x128xf32>
    %214 = vector.broadcast %11 : vector<16x1xf32> to vector<16x128xf32>
    %215 = arith.addf %213, %214 : vector<16x128xf32>
    %cst_136 = arith.constant 5.000000e-01 : f32
    %216 = vector.broadcast %cst_136 : f32 to vector<16x128xf32>
    %217 = arith.mulf %216, %215 : vector<16x128xf32>
    %cst_137 = arith.constant 0.707106769 : f32
    %218 = vector.broadcast %cst_137 : f32 to vector<16x128xf32>
    %219 = arith.mulf %215, %218 : vector<16x128xf32>
    %220 = math.absf %219 : vector<16x128xf32>
    %cst_138 = arith.constant 0.327591091 : f32
    %221 = vector.broadcast %cst_138 : f32 to vector<16x128xf32>
    %222 = arith.mulf %221, %220 : vector<16x128xf32>
    %cst_139 = arith.constant 1.000000e+00 : f32
    %223 = vector.broadcast %cst_139 : f32 to vector<16x128xf32>
    %224 = arith.addf %223, %222 : vector<16x128xf32>
    %cst_140 = arith.constant 1.000000e+00 : f32
    %225 = vector.broadcast %cst_140 : f32 to vector<16x128xf32>
    %226 = arith.divf %225, %224 : vector<16x128xf32>
    %cst_141 = arith.constant 1.06140542 : f32
    %227 = vector.broadcast %cst_141 : f32 to vector<16x128xf32>
    %228 = arith.mulf %227, %226 : vector<16x128xf32>
    %cst_142 = arith.constant -1.45315206 : f32
    %229 = vector.broadcast %cst_142 : f32 to vector<16x128xf32>
    %230 = arith.addf %228, %229 : vector<16x128xf32>
    %231 = arith.mulf %230, %226 : vector<16x128xf32>
    %cst_143 = arith.constant 1.42141378 : f32
    %232 = vector.broadcast %cst_143 : f32 to vector<16x128xf32>
    %233 = arith.addf %231, %232 : vector<16x128xf32>
    %234 = arith.mulf %233, %226 : vector<16x128xf32>
    %cst_144 = arith.constant -0.284496725 : f32
    %235 = vector.broadcast %cst_144 : f32 to vector<16x128xf32>
    %236 = arith.addf %234, %235 : vector<16x128xf32>
    %237 = arith.mulf %236, %226 : vector<16x128xf32>
    %cst_145 = arith.constant 0.254829586 : f32
    %238 = vector.broadcast %cst_145 : f32 to vector<16x128xf32>
    %239 = arith.addf %237, %238 : vector<16x128xf32>
    %240 = arith.mulf %239, %226 : vector<16x128xf32>
    %cst_146 = arith.constant 0.000000e+00 : f32
    %241 = vector.broadcast %cst_146 : f32 to vector<16x128xf32>
    %242 = arith.subf %241, %220 : vector<16x128xf32>
    %243 = arith.mulf %242, %220 : vector<16x128xf32>
    %244 = math.exp %243 : vector<16x128xf32>
    %245 = arith.mulf %240, %244 : vector<16x128xf32>
    %cst_147 = arith.constant 1.000000e+00 : f32
    %246 = vector.broadcast %cst_147 : f32 to vector<16x128xf32>
    %247 = arith.subf %246, %245 : vector<16x128xf32>
    %cst_148 = arith.constant 0.000000e+00 : f32
    %248 = vector.broadcast %cst_148 : f32 to vector<16x128xf32>
    %249 = arith.cmpf oge, %219, %248 : vector<16x128xf32>
    %cst_149 = arith.constant 0.000000e+00 : f32
    %250 = vector.broadcast %cst_149 : f32 to vector<16x128xf32>
    %251 = arith.subf %250, %247 : vector<16x128xf32>
    %252 = arith.select %249, %247, %251 : vector<16x128xi1>, vector<16x128xf32>
    %cst_150 = arith.constant 1.000000e+00 : f32
    %253 = vector.broadcast %cst_150 : f32 to vector<16x128xf32>
    %254 = arith.addf %253, %252 : vector<16x128xf32>
    %255 = arith.mulf %217, %254 : vector<16x128xf32>
    %c0_151 = arith.constant 0 : index
    %c2_152 = arith.constant 2 : index
    %256 = vector.load %arg6[%c0_151, %c2_152] : memref<16x132xf32, #tpu.memory_space<vmem>>, vector<16x128xf32>
    tpu.vector_store %arg6[%c0_151, %c2_152], %255 {strides = array<i32>} : memref<16x132xf32, #tpu.memory_space<vmem>>, vector<16x128xf32>,
    %c0_153 = arith.constant 0 : index
    %c0_154 = arith.constant 0 : index
    %257 = vector.load %arg6[%c0_153, %c0_154] : memref<16x132xf32, #tpu.memory_space<vmem>>, vector<16x128xf32>
    %c0_155 = arith.constant 0 : index
    %c0_156 = arith.constant 0 : index
    %258 = vector.load %arg7[%c0_155, %c0_156] : memref<80x128xf32, #tpu.memory_space<vmem>>, vector<16x128xf32>
    tpu.vector_store %arg7[%c0_155, %c0_156], %257 {strides = array<i32>} : memref<80x128xf32, #tpu.memory_space<vmem>>, vector<16x128xf32>,
    %c0_157 = arith.constant 0 : index
    %c1_158 = arith.constant 1 : index
    %259 = vector.load %arg6[%c0_157, %c1_158] : memref<16x132xf32, #tpu.memory_space<vmem>>, vector<16x128xf32>
    %c16_159 = arith.constant 16 : index
    %c0_160 = arith.constant 0 : index
    %260 = vector.load %arg7[%c16_159, %c0_160] : memref<80x128xf32, #tpu.memory_space<vmem>>, vector<16x128xf32>
    tpu.vector_store %arg7[%c16_159, %c0_160], %259 {strides = array<i32>} : memref<80x128xf32, #tpu.memory_space<vmem>>, vector<16x128xf32>,
    %c0_161 = arith.constant 0 : index
    %c2_162 = arith.constant 2 : index
    %261 = vector.load %arg6[%c0_161, %c2_162] : memref<16x132xf32, #tpu.memory_space<vmem>>, vector<16x128xf32>
    %c32_163 = arith.constant 32 : index
    %c0_164 = arith.constant 0 : index
    %262 = vector.load %arg7[%c32_163, %c0_164] : memref<80x128xf32, #tpu.memory_space<vmem>>, vector<16x128xf32>
    tpu.vector_store %arg7[%c32_163, %c0_164], %261 {strides = array<i32>} : memref<80x128xf32, #tpu.memory_space<vmem>>, vector<16x128xf32>,
    %c0_165 = arith.constant 0 : index
    %c3_166 = arith.constant 3 : index
    %263 = vector.load %arg6[%c0_165, %c3_166] : memref<16x132xf32, #tpu.memory_space<vmem>>, vector<16x128xf32>
    %c48_167 = arith.constant 48 : index
    %c0_168 = arith.constant 0 : index
    %264 = vector.load %arg7[%c48_167, %c0_168] : memref<80x128xf32, #tpu.memory_space<vmem>>, vector<16x128xf32>
    tpu.vector_store %arg7[%c48_167, %c0_168], %263 {strides = array<i32>} : memref<80x128xf32, #tpu.memory_space<vmem>>, vector<16x128xf32>,
    %c0_169 = arith.constant 0 : index
    %c4_170 = arith.constant 4 : index
    %265 = vector.load %arg6[%c0_169, %c4_170] : memref<16x132xf32, #tpu.memory_space<vmem>>, vector<16x128xf32>
    %c64_171 = arith.constant 64 : index
    %c0_172 = arith.constant 0 : index
    %266 = vector.load %arg7[%c64_171, %c0_172] : memref<80x128xf32, #tpu.memory_space<vmem>>, vector<16x128xf32>
    tpu.vector_store %arg7[%c64_171, %c0_172], %265 {strides = array<i32>} : memref<80x128xf32, #tpu.memory_space<vmem>>, vector<16x128xf32>,
    %c0_173 = arith.constant 0 : index
    %c0_174 = arith.constant 0 : index
    %267 = vector.load %arg7[%c0_173, %c0_174] : memref<80x128xf32, #tpu.memory_space<vmem>>, vector<80x128xf32>
    %cst_175 = arith.constant dense<0.000000e+00> : vector<16x128xf32>
    %268 = tpu.matmul %8, %267, %cst_175 {dimension_numbers = #tpu.dot_dimension_numbers<[1], [0], [0], [1], [0, 0, 1, 1], [], []>} : vector<16x80xf32>, vector<80x128xf32>, vector<16x128xf32> -> vector<16x128xf32>
    %269 = vector.broadcast %12 : vector<16x1xf32> to vector<16x128xf32>
    %270 = arith.addf %268, %269 : vector<16x128xf32>
    %271 = vector.shape_cast %270 : vector<16x128xf32> to vector<1x16x128xf32>
    %cst_176 = arith.constant dense<0.000000e+00> : vector<1xf32>
    %272 = vector.multi_reduction <add>, %271, %cst_176 [1, 2] : vector<1x16x128xf32> to vector<1xf32>
    %273 = vector.shape_cast %272 : vector<1xf32> to vector<1x1x1xf32>
    %274 = vector.extract %273[0, 0, 0] : f32 from vector<1x1x1xf32>
    %275 = arith.mulf %270, %270 : vector<16x128xf32>
    %276 = vector.shape_cast %275 : vector<16x128xf32> to vector<1x16x128xf32>
    %cst_177 = arith.constant dense<0.000000e+00> : vector<1xf32>
    %277 = vector.multi_reduction <add>, %276, %cst_177 [1, 2] : vector<1x16x128xf32> to vector<1xf32>
    %278 = vector.shape_cast %277 : vector<1xf32> to vector<1x1x1xf32>
    %279 = vector.extract %278[0, 0, 0] : f32 from vector<1x1x1xf32>
    %cst_178 = arith.constant 2.048000e+03 : f32
    %280 = arith.divf %274, %cst_178 : f32
    %cst_179 = arith.constant 2.048000e+03 : f32
    %281 = arith.divf %279, %cst_179 : f32
    %282 = arith.mulf %280, %280 : f32
    %283 = arith.subf %281, %282 : f32
    %cst_180 = arith.constant 0.000000e+00 : f32
    %284 = arith.maximumf %283, %cst_180 : f32
    %285 = vector.broadcast %280 : f32 to vector<16x128xf32>
    %286 = arith.subf %270, %285 : vector<16x128xf32>
    %cst_181 = arith.constant 9.99999974E-6 : f32
    %287 = arith.addf %284, %cst_181 : f32
    %288 = math.rsqrt %287 : f32
    %289 = vector.broadcast %288 : f32 to vector<16x128xf32>
    %290 = arith.mulf %286, %289 : vector<16x128xf32>
    %291 = vector.broadcast %13 : vector<16x1xf32> to vector<16x128xf32>
    %292 = arith.mulf %290, %291 : vector<16x128xf32>
    %293 = vector.broadcast %14 : vector<16x1xf32> to vector<16x128xf32>
    %294 = arith.addf %292, %293 : vector<16x128xf32>
    %cst_182 = arith.constant 5.000000e-01 : f32
    %295 = vector.broadcast %cst_182 : f32 to vector<16x128xf32>
    %296 = arith.mulf %295, %294 : vector<16x128xf32>
    %cst_183 = arith.constant 0.707106769 : f32
    %297 = vector.broadcast %cst_183 : f32 to vector<16x128xf32>
    %298 = arith.mulf %294, %297 : vector<16x128xf32>
    %299 = math.absf %298 : vector<16x128xf32>
    %cst_184 = arith.constant 0.327591091 : f32
    %300 = vector.broadcast %cst_184 : f32 to vector<16x128xf32>
    %301 = arith.mulf %300, %299 : vector<16x128xf32>
    %cst_185 = arith.constant 1.000000e+00 : f32
    %302 = vector.broadcast %cst_185 : f32 to vector<16x128xf32>
    %303 = arith.addf %302, %301 : vector<16x128xf32>
    %cst_186 = arith.constant 1.000000e+00 : f32
    %304 = vector.broadcast %cst_186 : f32 to vector<16x128xf32>
    %305 = arith.divf %304, %303 : vector<16x128xf32>
    %cst_187 = arith.constant 1.06140542 : f32
    %306 = vector.broadcast %cst_187 : f32 to vector<16x128xf32>
    %307 = arith.mulf %306, %305 : vector<16x128xf32>
    %cst_188 = arith.constant -1.45315206 : f32
    %308 = vector.broadcast %cst_188 : f32 to vector<16x128xf32>
    %309 = arith.addf %307, %308 : vector<16x128xf32>
    %310 = arith.mulf %309, %305 : vector<16x128xf32>
    %cst_189 = arith.constant 1.42141378 : f32
    %311 = vector.broadcast %cst_189 : f32 to vector<16x128xf32>
    %312 = arith.addf %310, %311 : vector<16x128xf32>
    %313 = arith.mulf %312, %305 : vector<16x128xf32>
    %cst_190 = arith.constant -0.284496725 : f32
    %314 = vector.broadcast %cst_190 : f32 to vector<16x128xf32>
    %315 = arith.addf %313, %314 : vector<16x128xf32>
    %316 = arith.mulf %315, %305 : vector<16x128xf32>
    %cst_191 = arith.constant 0.254829586 : f32
    %317 = vector.broadcast %cst_191 : f32 to vector<16x128xf32>
    %318 = arith.addf %316, %317 : vector<16x128xf32>
    %319 = arith.mulf %318, %305 : vector<16x128xf32>
    %cst_192 = arith.constant 0.000000e+00 : f32
    %320 = vector.broadcast %cst_192 : f32 to vector<16x128xf32>
    %321 = arith.subf %320, %299 : vector<16x128xf32>
    %322 = arith.mulf %321, %299 : vector<16x128xf32>
    %323 = math.exp %322 : vector<16x128xf32>
    %324 = arith.mulf %319, %323 : vector<16x128xf32>
    %cst_193 = arith.constant 1.000000e+00 : f32
    %325 = vector.broadcast %cst_193 : f32 to vector<16x128xf32>
    %326 = arith.subf %325, %324 : vector<16x128xf32>
    %cst_194 = arith.constant 0.000000e+00 : f32
    %327 = vector.broadcast %cst_194 : f32 to vector<16x128xf32>
    %328 = arith.cmpf oge, %298, %327 : vector<16x128xf32>
    %cst_195 = arith.constant 0.000000e+00 : f32
    %329 = vector.broadcast %cst_195 : f32 to vector<16x128xf32>
    %330 = arith.subf %329, %326 : vector<16x128xf32>
    %331 = arith.select %328, %326, %330 : vector<16x128xi1>, vector<16x128xf32>
    %cst_196 = arith.constant 1.000000e+00 : f32
    %332 = vector.broadcast %cst_196 : f32 to vector<16x128xf32>
    %333 = arith.addf %332, %331 : vector<16x128xf32>
    %334 = arith.mulf %296, %333 : vector<16x128xf32>
    %335 = arith.addf %334, %176 : vector<16x128xf32>
    %c0_197 = arith.constant 0 : index
    %c384 = arith.constant 384 : index
    %336 = vector.load %arg3[%c0_197, %c384] : memref<16x1024xf32, #tpu.memory_space<vmem>>, vector<16x80xf32>
    %c0_198 = arith.constant 0 : index
    %c512 = arith.constant 512 : index
    %337 = vector.load %arg3[%c0_198, %c512] : memref<16x1024xf32, #tpu.memory_space<vmem>>, vector<16x80xf32>
    %c0_199 = arith.constant 0 : index
    %c6 = arith.constant 6 : index
    %338 = vector.load %arg4[%c0_199, %c6] : memref<16x128xf32, #tpu.memory_space<vmem>>, vector<16x1xf32>
    %c0_200 = arith.constant 0 : index
    %c7 = arith.constant 7 : index
    %339 = vector.load %arg4[%c0_200, %c7] : memref<16x128xf32, #tpu.memory_space<vmem>>, vector<16x1xf32>
    %c0_201 = arith.constant 0 : index
    %c8_202 = arith.constant 8 : index
    %340 = vector.load %arg4[%c0_201, %c8_202] : memref<16x128xf32, #tpu.memory_space<vmem>>, vector<16x1xf32>
    %c0_203 = arith.constant 0 : index
    %c9 = arith.constant 9 : index
    %341 = vector.load %arg4[%c0_203, %c9] : memref<16x128xf32, #tpu.memory_space<vmem>>, vector<16x1xf32>
    %c0_204 = arith.constant 0 : index
    %c10 = arith.constant 10 : index
    %342 = vector.load %arg4[%c0_204, %c10] : memref<16x128xf32, #tpu.memory_space<vmem>>, vector<16x1xf32>
    %c0_205 = arith.constant 0 : index
    %c11 = arith.constant 11 : index
    %343 = vector.load %arg4[%c0_205, %c11] : memref<16x128xf32, #tpu.memory_space<vmem>>, vector<16x1xf32>
    %c0_206 = arith.constant 0 : index
    %c2_207 = arith.constant 2 : index
    %344 = vector.load %arg6[%c0_206, %c2_207] : memref<16x132xf32, #tpu.memory_space<vmem>>, vector<16x128xf32>
    tpu.vector_store %arg6[%c0_206, %c2_207], %175 {strides = array<i32>} : memref<16x132xf32, #tpu.memory_space<vmem>>, vector<16x128xf32>,
    %c0_208 = arith.constant 0 : index
    %c0_209 = arith.constant 0 : index
    %345 = vector.load %arg6[%c0_208, %c0_209] : memref<16x132xf32, #tpu.memory_space<vmem>>, vector<16x128xf32>
    %c0_210 = arith.constant 0 : index
    %c0_211 = arith.constant 0 : index
    %346 = vector.load %arg7[%c0_210, %c0_211] : memref<80x128xf32, #tpu.memory_space<vmem>>, vector<16x128xf32>
    tpu.vector_store %arg7[%c0_210, %c0_211], %345 {strides = array<i32>} : memref<80x128xf32, #tpu.memory_space<vmem>>, vector<16x128xf32>,
    %c0_212 = arith.constant 0 : index
    %c1_213 = arith.constant 1 : index
    %347 = vector.load %arg6[%c0_212, %c1_213] : memref<16x132xf32, #tpu.memory_space<vmem>>, vector<16x128xf32>
    %c16_214 = arith.constant 16 : index
    %c0_215 = arith.constant 0 : index
    %348 = vector.load %arg7[%c16_214, %c0_215] : memref<80x128xf32, #tpu.memory_space<vmem>>, vector<16x128xf32>
    tpu.vector_store %arg7[%c16_214, %c0_215], %347 {strides = array<i32>} : memref<80x128xf32, #tpu.memory_space<vmem>>, vector<16x128xf32>,
    %c0_216 = arith.constant 0 : index
    %c2_217 = arith.constant 2 : index
    %349 = vector.load %arg6[%c0_216, %c2_217] : memref<16x132xf32, #tpu.memory_space<vmem>>, vector<16x128xf32>
    %c32_218 = arith.constant 32 : index
    %c0_219 = arith.constant 0 : index
    %350 = vector.load %arg7[%c32_218, %c0_219] : memref<80x128xf32, #tpu.memory_space<vmem>>, vector<16x128xf32>
    tpu.vector_store %arg7[%c32_218, %c0_219], %349 {strides = array<i32>} : memref<80x128xf32, #tpu.memory_space<vmem>>, vector<16x128xf32>,
    %c0_220 = arith.constant 0 : index
    %c3_221 = arith.constant 3 : index
    %351 = vector.load %arg6[%c0_220, %c3_221] : memref<16x132xf32, #tpu.memory_space<vmem>>, vector<16x128xf32>
    %c48_222 = arith.constant 48 : index
    %c0_223 = arith.constant 0 : index
    %352 = vector.load %arg7[%c48_222, %c0_223] : memref<80x128xf32, #tpu.memory_space<vmem>>, vector<16x128xf32>
    tpu.vector_store %arg7[%c48_222, %c0_223], %351 {strides = array<i32>} : memref<80x128xf32, #tpu.memory_space<vmem>>, vector<16x128xf32>,
    %c0_224 = arith.constant 0 : index
    %c4_225 = arith.constant 4 : index
    %353 = vector.load %arg6[%c0_224, %c4_225] : memref<16x132xf32, #tpu.memory_space<vmem>>, vector<16x128xf32>
    %c64_226 = arith.constant 64 : index
    %c0_227 = arith.constant 0 : index
    %354 = vector.load %arg7[%c64_226, %c0_227] : memref<80x128xf32, #tpu.memory_space<vmem>>, vector<16x128xf32>
    tpu.vector_store %arg7[%c64_226, %c0_227], %353 {strides = array<i32>} : memref<80x128xf32, #tpu.memory_space<vmem>>, vector<16x128xf32>,
    %c0_228 = arith.constant 0 : index
    %c0_229 = arith.constant 0 : index
    %355 = vector.load %arg7[%c0_228, %c0_229] : memref<80x128xf32, #tpu.memory_space<vmem>>, vector<80x128xf32>
    %cst_230 = arith.constant dense<0.000000e+00> : vector<16x128xf32>
    %356 = tpu.matmul %336, %355, %cst_230 {dimension_numbers = #tpu.dot_dimension_numbers<[1], [0], [0], [1], [0, 0, 1, 1], [], []>} : vector<16x80xf32>, vector<80x128xf32>, vector<16x128xf32> -> vector<16x128xf32>
    %357 = vector.broadcast %338 : vector<16x1xf32> to vector<16x128xf32>
    %358 = arith.addf %356, %357 : vector<16x128xf32>
    %359 = vector.shape_cast %358 : vector<16x128xf32> to vector<1x16x128xf32>
    %cst_231 = arith.constant dense<0.000000e+00> : vector<1xf32>
    %360 = vector.multi_reduction <add>, %359, %cst_231 [1, 2] : vector<1x16x128xf32> to vector<1xf32>
    %361 = vector.shape_cast %360 : vector<1xf32> to vector<1x1x1xf32>
    %362 = vector.extract %361[0, 0, 0] : f32 from vector<1x1x1xf32>
    %363 = arith.mulf %358, %358 : vector<16x128xf32>
    %364 = vector.shape_cast %363 : vector<16x128xf32> to vector<1x16x128xf32>
    %cst_232 = arith.constant dense<0.000000e+00> : vector<1xf32>
    %365 = vector.multi_reduction <add>, %364, %cst_232 [1, 2] : vector<1x16x128xf32> to vector<1xf32>
    %366 = vector.shape_cast %365 : vector<1xf32> to vector<1x1x1xf32>
    %367 = vector.extract %366[0, 0, 0] : f32 from vector<1x1x1xf32>
    %cst_233 = arith.constant 2.048000e+03 : f32
    %368 = arith.divf %362, %cst_233 : f32
    %cst_234 = arith.constant 2.048000e+03 : f32
    %369 = arith.divf %367, %cst_234 : f32
    %370 = arith.mulf %368, %368 : f32
    %371 = arith.subf %369, %370 : f32
    %cst_235 = arith.constant 0.000000e+00 : f32
    %372 = arith.maximumf %371, %cst_235 : f32
    %373 = vector.broadcast %368 : f32 to vector<16x128xf32>
    %374 = arith.subf %358, %373 : vector<16x128xf32>
    %cst_236 = arith.constant 9.99999974E-6 : f32
    %375 = arith.addf %372, %cst_236 : f32
    %376 = math.rsqrt %375 : f32
    %377 = vector.broadcast %376 : f32 to vector<16x128xf32>
    %378 = arith.mulf %374, %377 : vector<16x128xf32>
    %379 = vector.broadcast %339 : vector<16x1xf32> to vector<16x128xf32>
    %380 = arith.mulf %378, %379 : vector<16x128xf32>
    %381 = vector.broadcast %340 : vector<16x1xf32> to vector<16x128xf32>
    %382 = arith.addf %380, %381 : vector<16x128xf32>
    %cst_237 = arith.constant 5.000000e-01 : f32
    %383 = vector.broadcast %cst_237 : f32 to vector<16x128xf32>
    %384 = arith.mulf %383, %382 : vector<16x128xf32>
    %cst_238 = arith.constant 0.707106769 : f32
    %385 = vector.broadcast %cst_238 : f32 to vector<16x128xf32>
    %386 = arith.mulf %382, %385 : vector<16x128xf32>
    %387 = math.absf %386 : vector<16x128xf32>
    %cst_239 = arith.constant 0.327591091 : f32
    %388 = vector.broadcast %cst_239 : f32 to vector<16x128xf32>
    %389 = arith.mulf %388, %387 : vector<16x128xf32>
    %cst_240 = arith.constant 1.000000e+00 : f32
    %390 = vector.broadcast %cst_240 : f32 to vector<16x128xf32>
    %391 = arith.addf %390, %389 : vector<16x128xf32>
    %cst_241 = arith.constant 1.000000e+00 : f32
    %392 = vector.broadcast %cst_241 : f32 to vector<16x128xf32>
    %393 = arith.divf %392, %391 : vector<16x128xf32>
    %cst_242 = arith.constant 1.06140542 : f32
    %394 = vector.broadcast %cst_242 : f32 to vector<16x128xf32>
    %395 = arith.mulf %394, %393 : vector<16x128xf32>
    %cst_243 = arith.constant -1.45315206 : f32
    %396 = vector.broadcast %cst_243 : f32 to vector<16x128xf32>
    %397 = arith.addf %395, %396 : vector<16x128xf32>
    %398 = arith.mulf %397, %393 : vector<16x128xf32>
    %cst_244 = arith.constant 1.42141378 : f32
    %399 = vector.broadcast %cst_244 : f32 to vector<16x128xf32>
    %400 = arith.addf %398, %399 : vector<16x128xf32>
    %401 = arith.mulf %400, %393 : vector<16x128xf32>
    %cst_245 = arith.constant -0.284496725 : f32
    %402 = vector.broadcast %cst_245 : f32 to vector<16x128xf32>
    %403 = arith.addf %401, %402 : vector<16x128xf32>
    %404 = arith.mulf %403, %393 : vector<16x128xf32>
    %cst_246 = arith.constant 0.254829586 : f32
    %405 = vector.broadcast %cst_246 : f32 to vector<16x128xf32>
    %406 = arith.addf %404, %405 : vector<16x128xf32>
    %407 = arith.mulf %406, %393 : vector<16x128xf32>
    %cst_247 = arith.constant 0.000000e+00 : f32
    %408 = vector.broadcast %cst_247 : f32 to vector<16x128xf32>
    %409 = arith.subf %408, %387 : vector<16x128xf32>
    %410 = arith.mulf %409, %387 : vector<16x128xf32>
    %411 = math.exp %410 : vector<16x128xf32>
    %412 = arith.mulf %407, %411 : vector<16x128xf32>
    %cst_248 = arith.constant 1.000000e+00 : f32
    %413 = vector.broadcast %cst_248 : f32 to vector<16x128xf32>
    %414 = arith.subf %413, %412 : vector<16x128xf32>
    %cst_249 = arith.constant 0.000000e+00 : f32
    %415 = vector.broadcast %cst_249 : f32 to vector<16x128xf32>
    %416 = arith.cmpf oge, %386, %415 : vector<16x128xf32>
    %cst_250 = arith.constant 0.000000e+00 : f32
    %417 = vector.broadcast %cst_250 : f32 to vector<16x128xf32>
    %418 = arith.subf %417, %414 : vector<16x128xf32>
    %419 = arith.select %416, %414, %418 : vector<16x128xi1>, vector<16x128xf32>
    %cst_251 = arith.constant 1.000000e+00 : f32
    %420 = vector.broadcast %cst_251 : f32 to vector<16x128xf32>
    %421 = arith.addf %420, %419 : vector<16x128xf32>
    %422 = arith.mulf %384, %421 : vector<16x128xf32>
    %c0_252 = arith.constant 0 : index
    %c2_253 = arith.constant 2 : index
    %423 = vector.load %arg6[%c0_252, %c2_253] : memref<16x132xf32, #tpu.memory_space<vmem>>, vector<16x128xf32>
    tpu.vector_store %arg6[%c0_252, %c2_253], %422 {strides = array<i32>} : memref<16x132xf32, #tpu.memory_space<vmem>>, vector<16x128xf32>,
    %c0_254 = arith.constant 0 : index
    %c0_255 = arith.constant 0 : index
    %424 = vector.load %arg6[%c0_254, %c0_255] : memref<16x132xf32, #tpu.memory_space<vmem>>, vector<16x128xf32>
    %c0_256 = arith.constant 0 : index
    %c0_257 = arith.constant 0 : index
    %425 = vector.load %arg7[%c0_256, %c0_257] : memref<80x128xf32, #tpu.memory_space<vmem>>, vector<16x128xf32>
    tpu.vector_store %arg7[%c0_256, %c0_257], %424 {strides = array<i32>} : memref<80x128xf32, #tpu.memory_space<vmem>>, vector<16x128xf32>,
    %c0_258 = arith.constant 0 : index
    %c1_259 = arith.constant 1 : index
    %426 = vector.load %arg6[%c0_258, %c1_259] : memref<16x132xf32, #tpu.memory_space<vmem>>, vector<16x128xf32>
    %c16_260 = arith.constant 16 : index
    %c0_261 = arith.constant 0 : index
    %427 = vector.load %arg7[%c16_260, %c0_261] : memref<80x128xf32, #tpu.memory_space<vmem>>, vector<16x128xf32>
    tpu.vector_store %arg7[%c16_260, %c0_261], %426 {strides = array<i32>} : memref<80x128xf32, #tpu.memory_space<vmem>>, vector<16x128xf32>,
    %c0_262 = arith.constant 0 : index
    %c2_263 = arith.constant 2 : index
    %428 = vector.load %arg6[%c0_262, %c2_263] : memref<16x132xf32, #tpu.memory_space<vmem>>, vector<16x128xf32>
    %c32_264 = arith.constant 32 : index
    %c0_265 = arith.constant 0 : index
    %429 = vector.load %arg7[%c32_264, %c0_265] : memref<80x128xf32, #tpu.memory_space<vmem>>, vector<16x128xf32>
    tpu.vector_store %arg7[%c32_264, %c0_265], %428 {strides = array<i32>} : memref<80x128xf32, #tpu.memory_space<vmem>>, vector<16x128xf32>,
    %c0_266 = arith.constant 0 : index
    %c3_267 = arith.constant 3 : index
    %430 = vector.load %arg6[%c0_266, %c3_267] : memref<16x132xf32, #tpu.memory_space<vmem>>, vector<16x128xf32>
    %c48_268 = arith.constant 48 : index
    %c0_269 = arith.constant 0 : index
    %431 = vector.load %arg7[%c48_268, %c0_269] : memref<80x128xf32, #tpu.memory_space<vmem>>, vector<16x128xf32>
    tpu.vector_store %arg7[%c48_268, %c0_269], %430 {strides = array<i32>} : memref<80x128xf32, #tpu.memory_space<vmem>>, vector<16x128xf32>,
    %c0_270 = arith.constant 0 : index
    %c4_271 = arith.constant 4 : index
    %432 = vector.load %arg6[%c0_270, %c4_271] : memref<16x132xf32, #tpu.memory_space<vmem>>, vector<16x128xf32>
    %c64_272 = arith.constant 64 : index
    %c0_273 = arith.constant 0 : index
    %433 = vector.load %arg7[%c64_272, %c0_273] : memref<80x128xf32, #tpu.memory_space<vmem>>, vector<16x128xf32>
    tpu.vector_store %arg7[%c64_272, %c0_273], %432 {strides = array<i32>} : memref<80x128xf32, #tpu.memory_space<vmem>>, vector<16x128xf32>,
    %c0_274 = arith.constant 0 : index
    %c0_275 = arith.constant 0 : index
    %434 = vector.load %arg7[%c0_274, %c0_275] : memref<80x128xf32, #tpu.memory_space<vmem>>, vector<80x128xf32>
    %cst_276 = arith.constant dense<0.000000e+00> : vector<16x128xf32>
    %435 = tpu.matmul %337, %434, %cst_276 {dimension_numbers = #tpu.dot_dimension_numbers<[1], [0], [0], [1], [0, 0, 1, 1], [], []>} : vector<16x80xf32>, vector<80x128xf32>, vector<16x128xf32> -> vector<16x128xf32>
    %436 = vector.broadcast %341 : vector<16x1xf32> to vector<16x128xf32>
    %437 = arith.addf %435, %436 : vector<16x128xf32>
    %438 = vector.shape_cast %437 : vector<16x128xf32> to vector<1x16x128xf32>
    %cst_277 = arith.constant dense<0.000000e+00> : vector<1xf32>
    %439 = vector.multi_reduction <add>, %438, %cst_277 [1, 2] : vector<1x16x128xf32> to vector<1xf32>
    %440 = vector.shape_cast %439 : vector<1xf32> to vector<1x1x1xf32>
    %441 = vector.extract %440[0, 0, 0] : f32 from vector<1x1x1xf32>
    %442 = arith.mulf %437, %437 : vector<16x128xf32>
    %443 = vector.shape_cast %442 : vector<16x128xf32> to vector<1x16x128xf32>
    %cst_278 = arith.constant dense<0.000000e+00> : vector<1xf32>
    %444 = vector.multi_reduction <add>, %443, %cst_278 [1, 2] : vector<1x16x128xf32> to vector<1xf32>
    %445 = vector.shape_cast %444 : vector<1xf32> to vector<1x1x1xf32>
    %446 = vector.extract %445[0, 0, 0] : f32 from vector<1x1x1xf32>
    %cst_279 = arith.constant 2.048000e+03 : f32
    %447 = arith.divf %441, %cst_279 : f32
    %cst_280 = arith.constant 2.048000e+03 : f32
    %448 = arith.divf %446, %cst_280 : f32
    %449 = arith.mulf %447, %447 : f32
    %450 = arith.subf %448, %449 : f32
    %cst_281 = arith.constant 0.000000e+00 : f32
    %451 = arith.maximumf %450, %cst_281 : f32
    %452 = vector.broadcast %447 : f32 to vector<16x128xf32>
    %453 = arith.subf %437, %452 : vector<16x128xf32>
    %cst_282 = arith.constant 9.99999974E-6 : f32
    %454 = arith.addf %451, %cst_282 : f32
    %455 = math.rsqrt %454 : f32
    %456 = vector.broadcast %455 : f32 to vector<16x128xf32>
    %457 = arith.mulf %453, %456 : vector<16x128xf32>
    %458 = vector.broadcast %342 : vector<16x1xf32> to vector<16x128xf32>
    %459 = arith.mulf %457, %458 : vector<16x128xf32>
    %460 = vector.broadcast %343 : vector<16x1xf32> to vector<16x128xf32>
    %461 = arith.addf %459, %460 : vector<16x128xf32>
    %cst_283 = arith.constant 5.000000e-01 : f32
    %462 = vector.broadcast %cst_283 : f32 to vector<16x128xf32>
    %463 = arith.mulf %462, %461 : vector<16x128xf32>
    %cst_284 = arith.constant 0.707106769 : f32
    %464 = vector.broadcast %cst_284 : f32 to vector<16x128xf32>
    %465 = arith.mulf %461, %464 : vector<16x128xf32>
    %466 = math.absf %465 : vector<16x128xf32>
    %cst_285 = arith.constant 0.327591091 : f32
    %467 = vector.broadcast %cst_285 : f32 to vector<16x128xf32>
    %468 = arith.mulf %467, %466 : vector<16x128xf32>
    %cst_286 = arith.constant 1.000000e+00 : f32
    %469 = vector.broadcast %cst_286 : f32 to vector<16x128xf32>
    %470 = arith.addf %469, %468 : vector<16x128xf32>
    %cst_287 = arith.constant 1.000000e+00 : f32
    %471 = vector.broadcast %cst_287 : f32 to vector<16x128xf32>
    %472 = arith.divf %471, %470 : vector<16x128xf32>
    %cst_288 = arith.constant 1.06140542 : f32
    %473 = vector.broadcast %cst_288 : f32 to vector<16x128xf32>
    %474 = arith.mulf %473, %472 : vector<16x128xf32>
    %cst_289 = arith.constant -1.45315206 : f32
    %475 = vector.broadcast %cst_289 : f32 to vector<16x128xf32>
    %476 = arith.addf %474, %475 : vector<16x128xf32>
    %477 = arith.mulf %476, %472 : vector<16x128xf32>
    %cst_290 = arith.constant 1.42141378 : f32
    %478 = vector.broadcast %cst_290 : f32 to vector<16x128xf32>
    %479 = arith.addf %477, %478 : vector<16x128xf32>
    %480 = arith.mulf %479, %472 : vector<16x128xf32>
    %cst_291 = arith.constant -0.284496725 : f32
    %481 = vector.broadcast %cst_291 : f32 to vector<16x128xf32>
    %482 = arith.addf %480, %481 : vector<16x128xf32>
    %483 = arith.mulf %482, %472 : vector<16x128xf32>
    %cst_292 = arith.constant 0.254829586 : f32
    %484 = vector.broadcast %cst_292 : f32 to vector<16x128xf32>
    %485 = arith.addf %483, %484 : vector<16x128xf32>
    %486 = arith.mulf %485, %472 : vector<16x128xf32>
    %cst_293 = arith.constant 0.000000e+00 : f32
    %487 = vector.broadcast %cst_293 : f32 to vector<16x128xf32>
    %488 = arith.subf %487, %466 : vector<16x128xf32>
    %489 = arith.mulf %488, %466 : vector<16x128xf32>
    %490 = math.exp %489 : vector<16x128xf32>
    %491 = arith.mulf %486, %490 : vector<16x128xf32>
    %cst_294 = arith.constant 1.000000e+00 : f32
    %492 = vector.broadcast %cst_294 : f32 to vector<16x128xf32>
    %493 = arith.subf %492, %491 : vector<16x128xf32>
    %cst_295 = arith.constant 0.000000e+00 : f32
    %494 = vector.broadcast %cst_295 : f32 to vector<16x128xf32>
    %495 = arith.cmpf oge, %465, %494 : vector<16x128xf32>
    %cst_296 = arith.constant 0.000000e+00 : f32
    %496 = vector.broadcast %cst_296 : f32 to vector<16x128xf32>
    %497 = arith.subf %496, %493 : vector<16x128xf32>
    %498 = arith.select %495, %493, %497 : vector<16x128xi1>, vector<16x128xf32>
    %cst_297 = arith.constant 1.000000e+00 : f32
    %499 = vector.broadcast %cst_297 : f32 to vector<16x128xf32>
    %500 = arith.addf %499, %498 : vector<16x128xf32>
    %501 = arith.mulf %463, %500 : vector<16x128xf32>
    %502 = arith.addf %501, %175 : vector<16x128xf32>
    %c0_298 = arith.constant 0 : index
    %c2_299 = arith.constant 2 : index
    %503 = vector.load %arg6[%c0_298, %c2_299] : memref<16x132xf32, #tpu.memory_space<vmem>>, vector<16x128xf32>
    tpu.vector_store %arg6[%c0_298, %c2_299], %335 {strides = array<i32>} : memref<16x132xf32, #tpu.memory_space<vmem>>, vector<16x128xf32>,
    %c0_300 = arith.constant 0 : index
    %c0_301 = arith.constant 0 : index
    %504 = vector.load %arg6[%c0_300, %c0_301] : memref<16x132xf32, #tpu.memory_space<vmem>>, vector<16x128xf32>
    %c0_302 = arith.constant 0 : index
    %c0_303 = arith.constant 0 : index
    %505 = vector.load %arg7[%c0_302, %c0_303] : memref<80x128xf32, #tpu.memory_space<vmem>>, vector<16x128xf32>
    tpu.vector_store %arg7[%c0_302, %c0_303], %504 {strides = array<i32>} : memref<80x128xf32, #tpu.memory_space<vmem>>, vector<16x128xf32>,
    %c0_304 = arith.constant 0 : index
    %c1_305 = arith.constant 1 : index
    %506 = vector.load %arg6[%c0_304, %c1_305] : memref<16x132xf32, #tpu.memory_space<vmem>>, vector<16x128xf32>
    %c16_306 = arith.constant 16 : index
    %c0_307 = arith.constant 0 : index
    %507 = vector.load %arg7[%c16_306, %c0_307] : memref<80x128xf32, #tpu.memory_space<vmem>>, vector<16x128xf32>
    tpu.vector_store %arg7[%c16_306, %c0_307], %506 {strides = array<i32>} : memref<80x128xf32, #tpu.memory_space<vmem>>, vector<16x128xf32>,
    %c0_308 = arith.constant 0 : index
    %c2_309 = arith.constant 2 : index
    %508 = vector.load %arg6[%c0_308, %c2_309] : memref<16x132xf32, #tpu.memory_space<vmem>>, vector<16x128xf32>
    %c32_310 = arith.constant 32 : index
    %c0_311 = arith.constant 0 : index
    %509 = vector.load %arg7[%c32_310, %c0_311] : memref<80x128xf32, #tpu.memory_space<vmem>>, vector<16x128xf32>
    tpu.vector_store %arg7[%c32_310, %c0_311], %508 {strides = array<i32>} : memref<80x128xf32, #tpu.memory_space<vmem>>, vector<16x128xf32>,
    %c0_312 = arith.constant 0 : index
    %c3_313 = arith.constant 3 : index
    %510 = vector.load %arg6[%c0_312, %c3_313] : memref<16x132xf32, #tpu.memory_space<vmem>>, vector<16x128xf32>
    %c48_314 = arith.constant 48 : index
    %c0_315 = arith.constant 0 : index
    %511 = vector.load %arg7[%c48_314, %c0_315] : memref<80x128xf32, #tpu.memory_space<vmem>>, vector<16x128xf32>
    tpu.vector_store %arg7[%c48_314, %c0_315], %510 {strides = array<i32>} : memref<80x128xf32, #tpu.memory_space<vmem>>, vector<16x128xf32>,
    %c0_316 = arith.constant 0 : index
    %c4_317 = arith.constant 4 : index
    %512 = vector.load %arg6[%c0_316, %c4_317] : memref<16x132xf32, #tpu.memory_space<vmem>>, vector<16x128xf32>
    %c64_318 = arith.constant 64 : index
    %c0_319 = arith.constant 0 : index
    %513 = vector.load %arg7[%c64_318, %c0_319] : memref<80x128xf32, #tpu.memory_space<vmem>>, vector<16x128xf32>
    tpu.vector_store %arg7[%c64_318, %c0_319], %512 {strides = array<i32>} : memref<80x128xf32, #tpu.memory_space<vmem>>, vector<16x128xf32>,
    %c0_320 = arith.constant 0 : index
    %c0_321 = arith.constant 0 : index
    %514 = vector.load %arg7[%c0_320, %c0_321] : memref<80x128xf32, #tpu.memory_space<vmem>>, vector<80x128xf32>
    %cst_322 = arith.constant dense<0.000000e+00> : vector<16x128xf32>
    %515 = tpu.matmul %336, %514, %cst_322 {dimension_numbers = #tpu.dot_dimension_numbers<[1], [0], [0], [1], [0, 0, 1, 1], [], []>} : vector<16x80xf32>, vector<80x128xf32>, vector<16x128xf32> -> vector<16x128xf32>
    %516 = vector.broadcast %338 : vector<16x1xf32> to vector<16x128xf32>
    %517 = arith.addf %515, %516 : vector<16x128xf32>
    %518 = vector.shape_cast %517 : vector<16x128xf32> to vector<1x16x128xf32>
    %cst_323 = arith.constant dense<0.000000e+00> : vector<1xf32>
    %519 = vector.multi_reduction <add>, %518, %cst_323 [1, 2] : vector<1x16x128xf32> to vector<1xf32>
    %520 = vector.shape_cast %519 : vector<1xf32> to vector<1x1x1xf32>
    %521 = vector.extract %520[0, 0, 0] : f32 from vector<1x1x1xf32>
    %522 = arith.mulf %517, %517 : vector<16x128xf32>
    %523 = vector.shape_cast %522 : vector<16x128xf32> to vector<1x16x128xf32>
    %cst_324 = arith.constant dense<0.000000e+00> : vector<1xf32>
    %524 = vector.multi_reduction <add>, %523, %cst_324 [1, 2] : vector<1x16x128xf32> to vector<1xf32>
    %525 = vector.shape_cast %524 : vector<1xf32> to vector<1x1x1xf32>
    %526 = vector.extract %525[0, 0, 0] : f32 from vector<1x1x1xf32>
    %cst_325 = arith.constant 2.048000e+03 : f32
    %527 = arith.divf %521, %cst_325 : f32
    %cst_326 = arith.constant 2.048000e+03 : f32
    %528 = arith.divf %526, %cst_326 : f32
    %529 = arith.mulf %527, %527 : f32
    %530 = arith.subf %528, %529 : f32
    %cst_327 = arith.constant 0.000000e+00 : f32
    %531 = arith.maximumf %530, %cst_327 : f32
    %532 = vector.broadcast %527 : f32 to vector<16x128xf32>
    %533 = arith.subf %517, %532 : vector<16x128xf32>
    %cst_328 = arith.constant 9.99999974E-6 : f32
    %534 = arith.addf %531, %cst_328 : f32
    %535 = math.rsqrt %534 : f32
    %536 = vector.broadcast %535 : f32 to vector<16x128xf32>
    %537 = arith.mulf %533, %536 : vector<16x128xf32>
    %538 = vector.broadcast %339 : vector<16x1xf32> to vector<16x128xf32>
    %539 = arith.mulf %537, %538 : vector<16x128xf32>
    %540 = vector.broadcast %340 : vector<16x1xf32> to vector<16x128xf32>
    %541 = arith.addf %539, %540 : vector<16x128xf32>
    %cst_329 = arith.constant 5.000000e-01 : f32
    %542 = vector.broadcast %cst_329 : f32 to vector<16x128xf32>
    %543 = arith.mulf %542, %541 : vector<16x128xf32>
    %cst_330 = arith.constant 0.707106769 : f32
    %544 = vector.broadcast %cst_330 : f32 to vector<16x128xf32>
    %545 = arith.mulf %541, %544 : vector<16x128xf32>
    %546 = math.absf %545 : vector<16x128xf32>
    %cst_331 = arith.constant 0.327591091 : f32
    %547 = vector.broadcast %cst_331 : f32 to vector<16x128xf32>
    %548 = arith.mulf %547, %546 : vector<16x128xf32>
    %cst_332 = arith.constant 1.000000e+00 : f32
    %549 = vector.broadcast %cst_332 : f32 to vector<16x128xf32>
    %550 = arith.addf %549, %548 : vector<16x128xf32>
    %cst_333 = arith.constant 1.000000e+00 : f32
    %551 = vector.broadcast %cst_333 : f32 to vector<16x128xf32>
    %552 = arith.divf %551, %550 : vector<16x128xf32>
    %cst_334 = arith.constant 1.06140542 : f32
    %553 = vector.broadcast %cst_334 : f32 to vector<16x128xf32>
    %554 = arith.mulf %553, %552 : vector<16x128xf32>
    %cst_335 = arith.constant -1.45315206 : f32
    %555 = vector.broadcast %cst_335 : f32 to vector<16x128xf32>
    %556 = arith.addf %554, %555 : vector<16x128xf32>
    %557 = arith.mulf %556, %552 : vector<16x128xf32>
    %cst_336 = arith.constant 1.42141378 : f32
    %558 = vector.broadcast %cst_336 : f32 to vector<16x128xf32>
    %559 = arith.addf %557, %558 : vector<16x128xf32>
    %560 = arith.mulf %559, %552 : vector<16x128xf32>
    %cst_337 = arith.constant -0.284496725 : f32
    %561 = vector.broadcast %cst_337 : f32 to vector<16x128xf32>
    %562 = arith.addf %560, %561 : vector<16x128xf32>
    %563 = arith.mulf %562, %552 : vector<16x128xf32>
    %cst_338 = arith.constant 0.254829586 : f32
    %564 = vector.broadcast %cst_338 : f32 to vector<16x128xf32>
    %565 = arith.addf %563, %564 : vector<16x128xf32>
    %566 = arith.mulf %565, %552 : vector<16x128xf32>
    %cst_339 = arith.constant 0.000000e+00 : f32
    %567 = vector.broadcast %cst_339 : f32 to vector<16x128xf32>
    %568 = arith.subf %567, %546 : vector<16x128xf32>
    %569 = arith.mulf %568, %546 : vector<16x128xf32>
    %570 = math.exp %569 : vector<16x128xf32>
    %571 = arith.mulf %566, %570 : vector<16x128xf32>
    %cst_340 = arith.constant 1.000000e+00 : f32
    %572 = vector.broadcast %cst_340 : f32 to vector<16x128xf32>
    %573 = arith.subf %572, %571 : vector<16x128xf32>
    %cst_341 = arith.constant 0.000000e+00 : f32
    %574 = vector.broadcast %cst_341 : f32 to vector<16x128xf32>
    %575 = arith.cmpf oge, %545, %574 : vector<16x128xf32>
    %cst_342 = arith.constant 0.000000e+00 : f32
    %576 = vector.broadcast %cst_342 : f32 to vector<16x128xf32>
    %577 = arith.subf %576, %573 : vector<16x128xf32>
    %578 = arith.select %575, %573, %577 : vector<16x128xi1>, vector<16x128xf32>
    %cst_343 = arith.constant 1.000000e+00 : f32
    %579 = vector.broadcast %cst_343 : f32 to vector<16x128xf32>
    %580 = arith.addf %579, %578 : vector<16x128xf32>
    %581 = arith.mulf %543, %580 : vector<16x128xf32>
    %c0_344 = arith.constant 0 : index
    %c2_345 = arith.constant 2 : index
    %582 = vector.load %arg6[%c0_344, %c2_345] : memref<16x132xf32, #tpu.memory_space<vmem>>, vector<16x128xf32>
    tpu.vector_store %arg6[%c0_344, %c2_345], %581 {strides = array<i32>} : memref<16x132xf32, #tpu.memory_space<vmem>>, vector<16x128xf32>,
    %c0_346 = arith.constant 0 : index
    %c0_347 = arith.constant 0 : index
    %583 = vector.load %arg6[%c0_346, %c0_347] : memref<16x132xf32, #tpu.memory_space<vmem>>, vector<16x128xf32>
    %c0_348 = arith.constant 0 : index
    %c0_349 = arith.constant 0 : index
    %584 = vector.load %arg7[%c0_348, %c0_349] : memref<80x128xf32, #tpu.memory_space<vmem>>, vector<16x128xf32>
    tpu.vector_store %arg7[%c0_348, %c0_349], %583 {strides = array<i32>} : memref<80x128xf32, #tpu.memory_space<vmem>>, vector<16x128xf32>,
    %c0_350 = arith.constant 0 : index
    %c1_351 = arith.constant 1 : index
    %585 = vector.load %arg6[%c0_350, %c1_351] : memref<16x132xf32, #tpu.memory_space<vmem>>, vector<16x128xf32>
    %c16_352 = arith.constant 16 : index
    %c0_353 = arith.constant 0 : index
    %586 = vector.load %arg7[%c16_352, %c0_353] : memref<80x128xf32, #tpu.memory_space<vmem>>, vector<16x128xf32>
    tpu.vector_store %arg7[%c16_352, %c0_353], %585 {strides = array<i32>} : memref<80x128xf32, #tpu.memory_space<vmem>>, vector<16x128xf32>,
    %c0_354 = arith.constant 0 : index
    %c2_355 = arith.constant 2 : index
    %587 = vector.load %arg6[%c0_354, %c2_355] : memref<16x132xf32, #tpu.memory_space<vmem>>, vector<16x128xf32>
    %c32_356 = arith.constant 32 : index
    %c0_357 = arith.constant 0 : index
    %588 = vector.load %arg7[%c32_356, %c0_357] : memref<80x128xf32, #tpu.memory_space<vmem>>, vector<16x128xf32>
    tpu.vector_store %arg7[%c32_356, %c0_357], %587 {strides = array<i32>} : memref<80x128xf32, #tpu.memory_space<vmem>>, vector<16x128xf32>,
    %c0_358 = arith.constant 0 : index
    %c3_359 = arith.constant 3 : index
    %589 = vector.load %arg6[%c0_358, %c3_359] : memref<16x132xf32, #tpu.memory_space<vmem>>, vector<16x128xf32>
    %c48_360 = arith.constant 48 : index
    %c0_361 = arith.constant 0 : index
    %590 = vector.load %arg7[%c48_360, %c0_361] : memref<80x128xf32, #tpu.memory_space<vmem>>, vector<16x128xf32>
    tpu.vector_store %arg7[%c48_360, %c0_361], %589 {strides = array<i32>} : memref<80x128xf32, #tpu.memory_space<vmem>>, vector<16x128xf32>,
    %c0_362 = arith.constant 0 : index
    %c4_363 = arith.constant 4 : index
    %591 = vector.load %arg6[%c0_362, %c4_363] : memref<16x132xf32, #tpu.memory_space<vmem>>, vector<16x128xf32>
    %c64_364 = arith.constant 64 : index
    %c0_365 = arith.constant 0 : index
    %592 = vector.load %arg7[%c64_364, %c0_365] : memref<80x128xf32, #tpu.memory_space<vmem>>, vector<16x128xf32>
    tpu.vector_store %arg7[%c64_364, %c0_365], %591 {strides = array<i32>} : memref<80x128xf32, #tpu.memory_space<vmem>>, vector<16x128xf32>,
    %c0_366 = arith.constant 0 : index
    %c0_367 = arith.constant 0 : index
    %593 = vector.load %arg7[%c0_366, %c0_367] : memref<80x128xf32, #tpu.memory_space<vmem>>, vector<80x128xf32>
    %cst_368 = arith.constant dense<0.000000e+00> : vector<16x128xf32>
    %594 = tpu.matmul %337, %593, %cst_368 {dimension_numbers = #tpu.dot_dimension_numbers<[1], [0], [0], [1], [0, 0, 1, 1], [], []>} : vector<16x80xf32>, vector<80x128xf32>, vector<16x128xf32> -> vector<16x128xf32>
    %595 = vector.broadcast %341 : vector<16x1xf32> to vector<16x128xf32>
    %596 = arith.addf %594, %595 : vector<16x128xf32>
    %597 = vector.shape_cast %596 : vector<16x128xf32> to vector<1x16x128xf32>
    %cst_369 = arith.constant dense<0.000000e+00> : vector<1xf32>
    %598 = vector.multi_reduction <add>, %597, %cst_369 [1, 2] : vector<1x16x128xf32> to vector<1xf32>
    %599 = vector.shape_cast %598 : vector<1xf32> to vector<1x1x1xf32>
    %600 = vector.extract %599[0, 0, 0] : f32 from vector<1x1x1xf32>
    %601 = arith.mulf %596, %596 : vector<16x128xf32>
    %602 = vector.shape_cast %601 : vector<16x128xf32> to vector<1x16x128xf32>
    %cst_370 = arith.constant dense<0.000000e+00> : vector<1xf32>
    %603 = vector.multi_reduction <add>, %602, %cst_370 [1, 2] : vector<1x16x128xf32> to vector<1xf32>
    %604 = vector.shape_cast %603 : vector<1xf32> to vector<1x1x1xf32>
    %605 = vector.extract %604[0, 0, 0] : f32 from vector<1x1x1xf32>
    %cst_371 = arith.constant 2.048000e+03 : f32
    %606 = arith.divf %600, %cst_371 : f32
    %cst_372 = arith.constant 2.048000e+03 : f32
    %607 = arith.divf %605, %cst_372 : f32
    %608 = arith.mulf %606, %606 : f32
    %609 = arith.subf %607, %608 : f32
    %cst_373 = arith.constant 0.000000e+00 : f32
    %610 = arith.maximumf %609, %cst_373 : f32
    %611 = vector.broadcast %606 : f32 to vector<16x128xf32>
    %612 = arith.subf %596, %611 : vector<16x128xf32>
    %cst_374 = arith.constant 9.99999974E-6 : f32
    %613 = arith.addf %610, %cst_374 : f32
    %614 = math.rsqrt %613 : f32
    %615 = vector.broadcast %614 : f32 to vector<16x128xf32>
    %616 = arith.mulf %612, %615 : vector<16x128xf32>
    %617 = vector.broadcast %342 : vector<16x1xf32> to vector<16x128xf32>
    %618 = arith.mulf %616, %617 : vector<16x128xf32>
    %619 = vector.broadcast %343 : vector<16x1xf32> to vector<16x128xf32>
    %620 = arith.addf %618, %619 : vector<16x128xf32>
    %cst_375 = arith.constant 5.000000e-01 : f32
    %621 = vector.broadcast %cst_375 : f32 to vector<16x128xf32>
    %622 = arith.mulf %621, %620 : vector<16x128xf32>
    %cst_376 = arith.constant 0.707106769 : f32
    %623 = vector.broadcast %cst_376 : f32 to vector<16x128xf32>
    %624 = arith.mulf %620, %623 : vector<16x128xf32>
    %625 = math.absf %624 : vector<16x128xf32>
    %cst_377 = arith.constant 0.327591091 : f32
    %626 = vector.broadcast %cst_377 : f32 to vector<16x128xf32>
    %627 = arith.mulf %626, %625 : vector<16x128xf32>
    %cst_378 = arith.constant 1.000000e+00 : f32
    %628 = vector.broadcast %cst_378 : f32 to vector<16x128xf32>
    %629 = arith.addf %628, %627 : vector<16x128xf32>
    %cst_379 = arith.constant 1.000000e+00 : f32
    %630 = vector.broadcast %cst_379 : f32 to vector<16x128xf32>
    %631 = arith.divf %630, %629 : vector<16x128xf32>
    %cst_380 = arith.constant 1.06140542 : f32
    %632 = vector.broadcast %cst_380 : f32 to vector<16x128xf32>
    %633 = arith.mulf %632, %631 : vector<16x128xf32>
    %cst_381 = arith.constant -1.45315206 : f32
    %634 = vector.broadcast %cst_381 : f32 to vector<16x128xf32>
    %635 = arith.addf %633, %634 : vector<16x128xf32>
    %636 = arith.mulf %635, %631 : vector<16x128xf32>
    %cst_382 = arith.constant 1.42141378 : f32
    %637 = vector.broadcast %cst_382 : f32 to vector<16x128xf32>
    %638 = arith.addf %636, %637 : vector<16x128xf32>
    %639 = arith.mulf %638, %631 : vector<16x128xf32>
    %cst_383 = arith.constant -0.284496725 : f32
    %640 = vector.broadcast %cst_383 : f32 to vector<16x128xf32>
    %641 = arith.addf %639, %640 : vector<16x128xf32>
    %642 = arith.mulf %641, %631 : vector<16x128xf32>
    %cst_384 = arith.constant 0.254829586 : f32
    %643 = vector.broadcast %cst_384 : f32 to vector<16x128xf32>
    %644 = arith.addf %642, %643 : vector<16x128xf32>
    %645 = arith.mulf %644, %631 : vector<16x128xf32>
    %cst_385 = arith.constant 0.000000e+00 : f32
    %646 = vector.broadcast %cst_385 : f32 to vector<16x128xf32>
    %647 = arith.subf %646, %625 : vector<16x128xf32>
    %648 = arith.mulf %647, %625 : vector<16x128xf32>
    %649 = math.exp %648 : vector<16x128xf32>
    %650 = arith.mulf %645, %649 : vector<16x128xf32>
    %cst_386 = arith.constant 1.000000e+00 : f32
    %651 = vector.broadcast %cst_386 : f32 to vector<16x128xf32>
    %652 = arith.subf %651, %650 : vector<16x128xf32>
    %cst_387 = arith.constant 0.000000e+00 : f32
    %653 = vector.broadcast %cst_387 : f32 to vector<16x128xf32>
    %654 = arith.cmpf oge, %624, %653 : vector<16x128xf32>
    %cst_388 = arith.constant 0.000000e+00 : f32
    %655 = vector.broadcast %cst_388 : f32 to vector<16x128xf32>
    %656 = arith.subf %655, %652 : vector<16x128xf32>
    %657 = arith.select %654, %652, %656 : vector<16x128xi1>, vector<16x128xf32>
    %cst_389 = arith.constant 1.000000e+00 : f32
    %658 = vector.broadcast %cst_389 : f32 to vector<16x128xf32>
    %659 = arith.addf %658, %657 : vector<16x128xf32>
    %660 = arith.mulf %622, %659 : vector<16x128xf32>
    %661 = arith.addf %660, %335 : vector<16x128xf32>
    %c0_390 = arith.constant 0 : index
    %c768 = arith.constant 768 : index
    %662 = vector.load %arg3[%c0_390, %c768] : memref<16x1024xf32, #tpu.memory_space<vmem>>, vector<16x80xf32>
    %c0_391 = arith.constant 0 : index
    %c896 = arith.constant 896 : index
    %663 = vector.load %arg3[%c0_391, %c896] : memref<16x1024xf32, #tpu.memory_space<vmem>>, vector<8x80xf32>
    %c0_392 = arith.constant 0 : index
    %c12 = arith.constant 12 : index
    %664 = vector.load %arg4[%c0_392, %c12] : memref<16x128xf32, #tpu.memory_space<vmem>>, vector<16x1xf32>
    %c0_393 = arith.constant 0 : index
    %c13 = arith.constant 13 : index
    %665 = vector.load %arg4[%c0_393, %c13] : memref<16x128xf32, #tpu.memory_space<vmem>>, vector<16x1xf32>
    %c0_394 = arith.constant 0 : index
    %c14 = arith.constant 14 : index
    %666 = vector.load %arg4[%c0_394, %c14] : memref<16x128xf32, #tpu.memory_space<vmem>>, vector<16x1xf32>
    %c0_395 = arith.constant 0 : index
    %c15 = arith.constant 15 : index
    %667 = vector.load %arg4[%c0_395, %c15] : memref<16x128xf32, #tpu.memory_space<vmem>>, vector<8x1xf32>
    %c0_396 = arith.constant 0 : index
    %c16_397 = arith.constant 16 : index
    %668 = vector.load %arg4[%c0_396, %c16_397] : memref<16x128xf32, #tpu.memory_space<vmem>>, vector<8x1xf32>
    %c0_398 = arith.constant 0 : index
    %c17 = arith.constant 17 : index
    %669 = vector.load %arg4[%c0_398, %c17] : memref<16x128xf32, #tpu.memory_space<vmem>>, vector<8x1xf32>
    %c0_399 = arith.constant 0 : index
    %c640 = arith.constant 640 : index
    %670 = vector.load %arg3[%c0_399, %c640] : memref<16x1024xf32, #tpu.memory_space<vmem>>, vector<8x16xf32>
    %cst_400 = arith.constant dense<0.000000e+00> : vector<8x128xf32>
    %671 = tpu.matmul %670, %502, %cst_400 {dimension_numbers = #tpu.dot_dimension_numbers<[1], [0], [0], [1], [0, 0, 1, 1], [], []>} : vector<8x16xf32>, vector<16x128xf32>, vector<8x128xf32> -> vector<8x128xf32>
    %c0_401 = arith.constant 0 : index
    %c2_402 = arith.constant 2 : index
    %672 = vector.load %arg6[%c0_401, %c2_402] : memref<16x132xf32, #tpu.memory_space<vmem>>, vector<16x128xf32>
    tpu.vector_store %arg6[%c0_401, %c2_402], %502 {strides = array<i32>} : memref<16x132xf32, #tpu.memory_space<vmem>>, vector<16x128xf32>,
    %c0_403 = arith.constant 0 : index
    %c0_404 = arith.constant 0 : index
    %673 = vector.load %arg6[%c0_403, %c0_404] : memref<16x132xf32, #tpu.memory_space<vmem>>, vector<16x128xf32>
    %c0_405 = arith.constant 0 : index
    %c0_406 = arith.constant 0 : index
    %674 = vector.load %arg7[%c0_405, %c0_406] : memref<80x128xf32, #tpu.memory_space<vmem>>, vector<16x128xf32>
    tpu.vector_store %arg7[%c0_405, %c0_406], %673 {strides = array<i32>} : memref<80x128xf32, #tpu.memory_space<vmem>>, vector<16x128xf32>,
    %c0_407 = arith.constant 0 : index
    %c1_408 = arith.constant 1 : index
    %675 = vector.load %arg6[%c0_407, %c1_408] : memref<16x132xf32, #tpu.memory_space<vmem>>, vector<16x128xf32>
    %c16_409 = arith.constant 16 : index
    %c0_410 = arith.constant 0 : index
    %676 = vector.load %arg7[%c16_409, %c0_410] : memref<80x128xf32, #tpu.memory_space<vmem>>, vector<16x128xf32>
    tpu.vector_store %arg7[%c16_409, %c0_410], %675 {strides = array<i32>} : memref<80x128xf32, #tpu.memory_space<vmem>>, vector<16x128xf32>,
    %c0_411 = arith.constant 0 : index
    %c2_412 = arith.constant 2 : index
    %677 = vector.load %arg6[%c0_411, %c2_412] : memref<16x132xf32, #tpu.memory_space<vmem>>, vector<16x128xf32>
    %c32_413 = arith.constant 32 : index
    %c0_414 = arith.constant 0 : index
    %678 = vector.load %arg7[%c32_413, %c0_414] : memref<80x128xf32, #tpu.memory_space<vmem>>, vector<16x128xf32>
    tpu.vector_store %arg7[%c32_413, %c0_414], %677 {strides = array<i32>} : memref<80x128xf32, #tpu.memory_space<vmem>>, vector<16x128xf32>,
    %c0_415 = arith.constant 0 : index
    %c3_416 = arith.constant 3 : index
    %679 = vector.load %arg6[%c0_415, %c3_416] : memref<16x132xf32, #tpu.memory_space<vmem>>, vector<16x128xf32>
    %c48_417 = arith.constant 48 : index
    %c0_418 = arith.constant 0 : index
    %680 = vector.load %arg7[%c48_417, %c0_418] : memref<80x128xf32, #tpu.memory_space<vmem>>, vector<16x128xf32>
    tpu.vector_store %arg7[%c48_417, %c0_418], %679 {strides = array<i32>} : memref<80x128xf32, #tpu.memory_space<vmem>>, vector<16x128xf32>,
    %c0_419 = arith.constant 0 : index
    %c4_420 = arith.constant 4 : index
    %681 = vector.load %arg6[%c0_419, %c4_420] : memref<16x132xf32, #tpu.memory_space<vmem>>, vector<16x128xf32>
    %c64_421 = arith.constant 64 : index
    %c0_422 = arith.constant 0 : index
    %682 = vector.load %arg7[%c64_421, %c0_422] : memref<80x128xf32, #tpu.memory_space<vmem>>, vector<16x128xf32>
    tpu.vector_store %arg7[%c64_421, %c0_422], %681 {strides = array<i32>} : memref<80x128xf32, #tpu.memory_space<vmem>>, vector<16x128xf32>,
    %c0_423 = arith.constant 0 : index
    %c0_424 = arith.constant 0 : index
    %683 = vector.load %arg7[%c0_423, %c0_424] : memref<80x128xf32, #tpu.memory_space<vmem>>, vector<80x128xf32>
    %cst_425 = arith.constant dense<0.000000e+00> : vector<16x128xf32>
    %684 = tpu.matmul %662, %683, %cst_425 {dimension_numbers = #tpu.dot_dimension_numbers<[1], [0], [0], [1], [0, 0, 1, 1], [], []>} : vector<16x80xf32>, vector<80x128xf32>, vector<16x128xf32> -> vector<16x128xf32>
    %685 = vector.broadcast %664 : vector<16x1xf32> to vector<16x128xf32>
    %686 = arith.addf %684, %685 : vector<16x128xf32>
    %687 = vector.shape_cast %686 : vector<16x128xf32> to vector<1x16x128xf32>
    %cst_426 = arith.constant dense<0.000000e+00> : vector<1xf32>
    %688 = vector.multi_reduction <add>, %687, %cst_426 [1, 2] : vector<1x16x128xf32> to vector<1xf32>
    %689 = vector.shape_cast %688 : vector<1xf32> to vector<1x1x1xf32>
    %690 = vector.extract %689[0, 0, 0] : f32 from vector<1x1x1xf32>
    %691 = arith.mulf %686, %686 : vector<16x128xf32>
    %692 = vector.shape_cast %691 : vector<16x128xf32> to vector<1x16x128xf32>
    %cst_427 = arith.constant dense<0.000000e+00> : vector<1xf32>
    %693 = vector.multi_reduction <add>, %692, %cst_427 [1, 2] : vector<1x16x128xf32> to vector<1xf32>
    %694 = vector.shape_cast %693 : vector<1xf32> to vector<1x1x1xf32>
    %695 = vector.extract %694[0, 0, 0] : f32 from vector<1x1x1xf32>
    %cst_428 = arith.constant 2.048000e+03 : f32
    %696 = arith.divf %690, %cst_428 : f32
    %cst_429 = arith.constant 2.048000e+03 : f32
    %697 = arith.divf %695, %cst_429 : f32
    %698 = arith.mulf %696, %696 : f32
    %699 = arith.subf %697, %698 : f32
    %cst_430 = arith.constant 0.000000e+00 : f32
    %700 = arith.maximumf %699, %cst_430 : f32
    %701 = vector.broadcast %696 : f32 to vector<16x128xf32>
    %702 = arith.subf %686, %701 : vector<16x128xf32>
    %cst_431 = arith.constant 9.99999974E-6 : f32
    %703 = arith.addf %700, %cst_431 : f32
    %704 = math.rsqrt %703 : f32
    %705 = vector.broadcast %704 : f32 to vector<16x128xf32>
    %706 = arith.mulf %702, %705 : vector<16x128xf32>
    %707 = vector.broadcast %665 : vector<16x1xf32> to vector<16x128xf32>
    %708 = arith.mulf %706, %707 : vector<16x128xf32>
    %709 = vector.broadcast %666 : vector<16x1xf32> to vector<16x128xf32>
    %710 = arith.addf %708, %709 : vector<16x128xf32>
    %cst_432 = arith.constant 5.000000e-01 : f32
    %711 = vector.broadcast %cst_432 : f32 to vector<16x128xf32>
    %712 = arith.mulf %711, %710 : vector<16x128xf32>
    %cst_433 = arith.constant 0.707106769 : f32
    %713 = vector.broadcast %cst_433 : f32 to vector<16x128xf32>
    %714 = arith.mulf %710, %713 : vector<16x128xf32>
    %715 = math.absf %714 : vector<16x128xf32>
    %cst_434 = arith.constant 0.327591091 : f32
    %716 = vector.broadcast %cst_434 : f32 to vector<16x128xf32>
    %717 = arith.mulf %716, %715 : vector<16x128xf32>
    %cst_435 = arith.constant 1.000000e+00 : f32
    %718 = vector.broadcast %cst_435 : f32 to vector<16x128xf32>
    %719 = arith.addf %718, %717 : vector<16x128xf32>
    %cst_436 = arith.constant 1.000000e+00 : f32
    %720 = vector.broadcast %cst_436 : f32 to vector<16x128xf32>
    %721 = arith.divf %720, %719 : vector<16x128xf32>
    %cst_437 = arith.constant 1.06140542 : f32
    %722 = vector.broadcast %cst_437 : f32 to vector<16x128xf32>
    %723 = arith.mulf %722, %721 : vector<16x128xf32>
    %cst_438 = arith.constant -1.45315206 : f32
    %724 = vector.broadcast %cst_438 : f32 to vector<16x128xf32>
    %725 = arith.addf %723, %724 : vector<16x128xf32>
    %726 = arith.mulf %725, %721 : vector<16x128xf32>
    %cst_439 = arith.constant 1.42141378 : f32
    %727 = vector.broadcast %cst_439 : f32 to vector<16x128xf32>
    %728 = arith.addf %726, %727 : vector<16x128xf32>
    %729 = arith.mulf %728, %721 : vector<16x128xf32>
    %cst_440 = arith.constant -0.284496725 : f32
    %730 = vector.broadcast %cst_440 : f32 to vector<16x128xf32>
    %731 = arith.addf %729, %730 : vector<16x128xf32>
    %732 = arith.mulf %731, %721 : vector<16x128xf32>
    %cst_441 = arith.constant 0.254829586 : f32
    %733 = vector.broadcast %cst_441 : f32 to vector<16x128xf32>
    %734 = arith.addf %732, %733 : vector<16x128xf32>
    %735 = arith.mulf %734, %721 : vector<16x128xf32>
    %cst_442 = arith.constant 0.000000e+00 : f32
    %736 = vector.broadcast %cst_442 : f32 to vector<16x128xf32>
    %737 = arith.subf %736, %715 : vector<16x128xf32>
    %738 = arith.mulf %737, %715 : vector<16x128xf32>
    %739 = math.exp %738 : vector<16x128xf32>
    %740 = arith.mulf %735, %739 : vector<16x128xf32>
    %cst_443 = arith.constant 1.000000e+00 : f32
    %741 = vector.broadcast %cst_443 : f32 to vector<16x128xf32>
    %742 = arith.subf %741, %740 : vector<16x128xf32>
    %cst_444 = arith.constant 0.000000e+00 : f32
    %743 = vector.broadcast %cst_444 : f32 to vector<16x128xf32>
    %744 = arith.cmpf oge, %714, %743 : vector<16x128xf32>
    %cst_445 = arith.constant 0.000000e+00 : f32
    %745 = vector.broadcast %cst_445 : f32 to vector<16x128xf32>
    %746 = arith.subf %745, %742 : vector<16x128xf32>
    %747 = arith.select %744, %742, %746 : vector<16x128xi1>, vector<16x128xf32>
    %cst_446 = arith.constant 1.000000e+00 : f32
    %748 = vector.broadcast %cst_446 : f32 to vector<16x128xf32>
    %749 = arith.addf %748, %747 : vector<16x128xf32>
    %750 = arith.mulf %712, %749 : vector<16x128xf32>
    %c0_447 = arith.constant 0 : index
    %c2_448 = arith.constant 2 : index
    %751 = vector.load %arg6[%c0_447, %c2_448] : memref<16x132xf32, #tpu.memory_space<vmem>>, vector<16x128xf32>
    tpu.vector_store %arg6[%c0_447, %c2_448], %750 {strides = array<i32>} : memref<16x132xf32, #tpu.memory_space<vmem>>, vector<16x128xf32>,
    %c0_449 = arith.constant 0 : index
    %c0_450 = arith.constant 0 : index
    %752 = vector.load %arg6[%c0_449, %c0_450] : memref<16x132xf32, #tpu.memory_space<vmem>>, vector<16x128xf32>
    %c0_451 = arith.constant 0 : index
    %c0_452 = arith.constant 0 : index
    %753 = vector.load %arg7[%c0_451, %c0_452] : memref<80x128xf32, #tpu.memory_space<vmem>>, vector<16x128xf32>
    tpu.vector_store %arg7[%c0_451, %c0_452], %752 {strides = array<i32>} : memref<80x128xf32, #tpu.memory_space<vmem>>, vector<16x128xf32>,
    %c0_453 = arith.constant 0 : index
    %c1_454 = arith.constant 1 : index
    %754 = vector.load %arg6[%c0_453, %c1_454] : memref<16x132xf32, #tpu.memory_space<vmem>>, vector<16x128xf32>
    %c16_455 = arith.constant 16 : index
    %c0_456 = arith.constant 0 : index
    %755 = vector.load %arg7[%c16_455, %c0_456] : memref<80x128xf32, #tpu.memory_space<vmem>>, vector<16x128xf32>
    tpu.vector_store %arg7[%c16_455, %c0_456], %754 {strides = array<i32>} : memref<80x128xf32, #tpu.memory_space<vmem>>, vector<16x128xf32>,
    %c0_457 = arith.constant 0 : index
    %c2_458 = arith.constant 2 : index
    %756 = vector.load %arg6[%c0_457, %c2_458] : memref<16x132xf32, #tpu.memory_space<vmem>>, vector<16x128xf32>
    %c32_459 = arith.constant 32 : index
    %c0_460 = arith.constant 0 : index
    %757 = vector.load %arg7[%c32_459, %c0_460] : memref<80x128xf32, #tpu.memory_space<vmem>>, vector<16x128xf32>
    tpu.vector_store %arg7[%c32_459, %c0_460], %756 {strides = array<i32>} : memref<80x128xf32, #tpu.memory_space<vmem>>, vector<16x128xf32>,
    %c0_461 = arith.constant 0 : index
    %c3_462 = arith.constant 3 : index
    %758 = vector.load %arg6[%c0_461, %c3_462] : memref<16x132xf32, #tpu.memory_space<vmem>>, vector<16x128xf32>
    %c48_463 = arith.constant 48 : index
    %c0_464 = arith.constant 0 : index
    %759 = vector.load %arg7[%c48_463, %c0_464] : memref<80x128xf32, #tpu.memory_space<vmem>>, vector<16x128xf32>
    tpu.vector_store %arg7[%c48_463, %c0_464], %758 {strides = array<i32>} : memref<80x128xf32, #tpu.memory_space<vmem>>, vector<16x128xf32>,
    %c0_465 = arith.constant 0 : index
    %c4_466 = arith.constant 4 : index
    %760 = vector.load %arg6[%c0_465, %c4_466] : memref<16x132xf32, #tpu.memory_space<vmem>>, vector<16x128xf32>
    %c64_467 = arith.constant 64 : index
    %c0_468 = arith.constant 0 : index
    %761 = vector.load %arg7[%c64_467, %c0_468] : memref<80x128xf32, #tpu.memory_space<vmem>>, vector<16x128xf32>
    tpu.vector_store %arg7[%c64_467, %c0_468], %760 {strides = array<i32>} : memref<80x128xf32, #tpu.memory_space<vmem>>, vector<16x128xf32>,
    %c0_469 = arith.constant 0 : index
    %c0_470 = arith.constant 0 : index
    %762 = vector.load %arg7[%c0_469, %c0_470] : memref<80x128xf32, #tpu.memory_space<vmem>>, vector<80x128xf32>
    %cst_471 = arith.constant dense<0.000000e+00> : vector<8x128xf32>
    %763 = tpu.matmul %663, %762, %cst_471 {dimension_numbers = #tpu.dot_dimension_numbers<[1], [0], [0], [1], [0, 0, 1, 1], [], []>} : vector<8x80xf32>, vector<80x128xf32>, vector<8x128xf32> -> vector<8x128xf32>
    %764 = vector.broadcast %667 : vector<8x1xf32> to vector<8x128xf32>
    %765 = arith.addf %763, %764 : vector<8x128xf32>
    %766 = vector.shape_cast %765 : vector<8x128xf32> to vector<1x8x128xf32>
    %cst_472 = arith.constant dense<0.000000e+00> : vector<1xf32>
    %767 = vector.multi_reduction <add>, %766, %cst_472 [1, 2] : vector<1x8x128xf32> to vector<1xf32>
    %768 = vector.shape_cast %767 : vector<1xf32> to vector<1x1x1xf32>
    %769 = vector.extract %768[0, 0, 0] : f32 from vector<1x1x1xf32>
    %770 = arith.mulf %765, %765 : vector<8x128xf32>
    %771 = vector.shape_cast %770 : vector<8x128xf32> to vector<1x8x128xf32>
    %cst_473 = arith.constant dense<0.000000e+00> : vector<1xf32>
    %772 = vector.multi_reduction <add>, %771, %cst_473 [1, 2] : vector<1x8x128xf32> to vector<1xf32>
    %773 = vector.shape_cast %772 : vector<1xf32> to vector<1x1x1xf32>
    %774 = vector.extract %773[0, 0, 0] : f32 from vector<1x1x1xf32>
    %cst_474 = arith.constant 1.024000e+03 : f32
    %775 = arith.divf %769, %cst_474 : f32
    %cst_475 = arith.constant 1.024000e+03 : f32
    %776 = arith.divf %774, %cst_475 : f32
    %777 = arith.mulf %775, %775 : f32
    %778 = arith.subf %776, %777 : f32
    %cst_476 = arith.constant 0.000000e+00 : f32
    %779 = arith.maximumf %778, %cst_476 : f32
    %780 = vector.broadcast %775 : f32 to vector<8x128xf32>
    %781 = arith.subf %765, %780 : vector<8x128xf32>
    %cst_477 = arith.constant 9.99999974E-6 : f32
    %782 = arith.addf %779, %cst_477 : f32
    %783 = math.rsqrt %782 : f32
    %784 = vector.broadcast %783 : f32 to vector<8x128xf32>
    %785 = arith.mulf %781, %784 : vector<8x128xf32>
    %786 = vector.broadcast %668 : vector<8x1xf32> to vector<8x128xf32>
    %787 = arith.mulf %785, %786 : vector<8x128xf32>
    %788 = vector.broadcast %669 : vector<8x1xf32> to vector<8x128xf32>
    %789 = arith.addf %787, %788 : vector<8x128xf32>
    %cst_478 = arith.constant 5.000000e-01 : f32
    %790 = vector.broadcast %cst_478 : f32 to vector<8x128xf32>
    %791 = arith.mulf %790, %789 : vector<8x128xf32>
    %cst_479 = arith.constant 0.707106769 : f32
    %792 = vector.broadcast %cst_479 : f32 to vector<8x128xf32>
    %793 = arith.mulf %789, %792 : vector<8x128xf32>
    %794 = math.absf %793 : vector<8x128xf32>
    %cst_480 = arith.constant 0.327591091 : f32
    %795 = vector.broadcast %cst_480 : f32 to vector<8x128xf32>
    %796 = arith.mulf %795, %794 : vector<8x128xf32>
    %cst_481 = arith.constant 1.000000e+00 : f32
    %797 = vector.broadcast %cst_481 : f32 to vector<8x128xf32>
    %798 = arith.addf %797, %796 : vector<8x128xf32>
    %cst_482 = arith.constant 1.000000e+00 : f32
    %799 = vector.broadcast %cst_482 : f32 to vector<8x128xf32>
    %800 = arith.divf %799, %798 : vector<8x128xf32>
    %cst_483 = arith.constant 1.06140542 : f32
    %801 = vector.broadcast %cst_483 : f32 to vector<8x128xf32>
    %802 = arith.mulf %801, %800 : vector<8x128xf32>
    %cst_484 = arith.constant -1.45315206 : f32
    %803 = vector.broadcast %cst_484 : f32 to vector<8x128xf32>
    %804 = arith.addf %802, %803 : vector<8x128xf32>
    %805 = arith.mulf %804, %800 : vector<8x128xf32>
    %cst_485 = arith.constant 1.42141378 : f32
    %806 = vector.broadcast %cst_485 : f32 to vector<8x128xf32>
    %807 = arith.addf %805, %806 : vector<8x128xf32>
    %808 = arith.mulf %807, %800 : vector<8x128xf32>
    %cst_486 = arith.constant -0.284496725 : f32
    %809 = vector.broadcast %cst_486 : f32 to vector<8x128xf32>
    %810 = arith.addf %808, %809 : vector<8x128xf32>
    %811 = arith.mulf %810, %800 : vector<8x128xf32>
    %cst_487 = arith.constant 0.254829586 : f32
    %812 = vector.broadcast %cst_487 : f32 to vector<8x128xf32>
    %813 = arith.addf %811, %812 : vector<8x128xf32>
    %814 = arith.mulf %813, %800 : vector<8x128xf32>
    %cst_488 = arith.constant 0.000000e+00 : f32
    %815 = vector.broadcast %cst_488 : f32 to vector<8x128xf32>
    %816 = arith.subf %815, %794 : vector<8x128xf32>
    %817 = arith.mulf %816, %794 : vector<8x128xf32>
    %818 = math.exp %817 : vector<8x128xf32>
    %819 = arith.mulf %814, %818 : vector<8x128xf32>
    %cst_489 = arith.constant 1.000000e+00 : f32
    %820 = vector.broadcast %cst_489 : f32 to vector<8x128xf32>
    %821 = arith.subf %820, %819 : vector<8x128xf32>
    %cst_490 = arith.constant 0.000000e+00 : f32
    %822 = vector.broadcast %cst_490 : f32 to vector<8x128xf32>
    %823 = arith.cmpf oge, %793, %822 : vector<8x128xf32>
    %cst_491 = arith.constant 0.000000e+00 : f32
    %824 = vector.broadcast %cst_491 : f32 to vector<8x128xf32>
    %825 = arith.subf %824, %821 : vector<8x128xf32>
    %826 = arith.select %823, %821, %825 : vector<8x128xi1>, vector<8x128xf32>
    %cst_492 = arith.constant 1.000000e+00 : f32
    %827 = vector.broadcast %cst_492 : f32 to vector<8x128xf32>
    %828 = arith.addf %827, %826 : vector<8x128xf32>
    %829 = arith.mulf %791, %828 : vector<8x128xf32>
    %830 = arith.addf %829, %671 : vector<8x128xf32>
    %cst_493 = arith.constant dense<0.000000e+00> : vector<8x128xf32>
    %831 = tpu.matmul %670, %661, %cst_493 {dimension_numbers = #tpu.dot_dimension_numbers<[1], [0], [0], [1], [0, 0, 1, 1], [], []>} : vector<8x16xf32>, vector<16x128xf32>, vector<8x128xf32> -> vector<8x128xf32>
    %c0_494 = arith.constant 0 : index
    %c2_495 = arith.constant 2 : index
    %832 = vector.load %arg6[%c0_494, %c2_495] : memref<16x132xf32, #tpu.memory_space<vmem>>, vector<16x128xf32>
    tpu.vector_store %arg6[%c0_494, %c2_495], %661 {strides = array<i32>} : memref<16x132xf32, #tpu.memory_space<vmem>>, vector<16x128xf32>,
    %c0_496 = arith.constant 0 : index
    %c0_497 = arith.constant 0 : index
    %833 = vector.load %arg6[%c0_496, %c0_497] : memref<16x132xf32, #tpu.memory_space<vmem>>, vector<16x128xf32>
    %c0_498 = arith.constant 0 : index
    %c0_499 = arith.constant 0 : index
    %834 = vector.load %arg7[%c0_498, %c0_499] : memref<80x128xf32, #tpu.memory_space<vmem>>, vector<16x128xf32>
    tpu.vector_store %arg7[%c0_498, %c0_499], %833 {strides = array<i32>} : memref<80x128xf32, #tpu.memory_space<vmem>>, vector<16x128xf32>,
    %c0_500 = arith.constant 0 : index
    %c1_501 = arith.constant 1 : index
    %835 = vector.load %arg6[%c0_500, %c1_501] : memref<16x132xf32, #tpu.memory_space<vmem>>, vector<16x128xf32>
    %c16_502 = arith.constant 16 : index
    %c0_503 = arith.constant 0 : index
    %836 = vector.load %arg7[%c16_502, %c0_503] : memref<80x128xf32, #tpu.memory_space<vmem>>, vector<16x128xf32>
    tpu.vector_store %arg7[%c16_502, %c0_503], %835 {strides = array<i32>} : memref<80x128xf32, #tpu.memory_space<vmem>>, vector<16x128xf32>,
    %c0_504 = arith.constant 0 : index
    %c2_505 = arith.constant 2 : index
    %837 = vector.load %arg6[%c0_504, %c2_505] : memref<16x132xf32, #tpu.memory_space<vmem>>, vector<16x128xf32>
    %c32_506 = arith.constant 32 : index
    %c0_507 = arith.constant 0 : index
    %838 = vector.load %arg7[%c32_506, %c0_507] : memref<80x128xf32, #tpu.memory_space<vmem>>, vector<16x128xf32>
    tpu.vector_store %arg7[%c32_506, %c0_507], %837 {strides = array<i32>} : memref<80x128xf32, #tpu.memory_space<vmem>>, vector<16x128xf32>,
    %c0_508 = arith.constant 0 : index
    %c3_509 = arith.constant 3 : index
    %839 = vector.load %arg6[%c0_508, %c3_509] : memref<16x132xf32, #tpu.memory_space<vmem>>, vector<16x128xf32>
    %c48_510 = arith.constant 48 : index
    %c0_511 = arith.constant 0 : index
    %840 = vector.load %arg7[%c48_510, %c0_511] : memref<80x128xf32, #tpu.memory_space<vmem>>, vector<16x128xf32>
    tpu.vector_store %arg7[%c48_510, %c0_511], %839 {strides = array<i32>} : memref<80x128xf32, #tpu.memory_space<vmem>>, vector<16x128xf32>,
    %c0_512 = arith.constant 0 : index
    %c4_513 = arith.constant 4 : index
    %841 = vector.load %arg6[%c0_512, %c4_513] : memref<16x132xf32, #tpu.memory_space<vmem>>, vector<16x128xf32>
    %c64_514 = arith.constant 64 : index
    %c0_515 = arith.constant 0 : index
    %842 = vector.load %arg7[%c64_514, %c0_515] : memref<80x128xf32, #tpu.memory_space<vmem>>, vector<16x128xf32>
    tpu.vector_store %arg7[%c64_514, %c0_515], %841 {strides = array<i32>} : memref<80x128xf32, #tpu.memory_space<vmem>>, vector<16x128xf32>,
    %c0_516 = arith.constant 0 : index
    %c0_517 = arith.constant 0 : index
    %843 = vector.load %arg7[%c0_516, %c0_517] : memref<80x128xf32, #tpu.memory_space<vmem>>, vector<80x128xf32>
    %cst_518 = arith.constant dense<0.000000e+00> : vector<16x128xf32>
    %844 = tpu.matmul %662, %843, %cst_518 {dimension_numbers = #tpu.dot_dimension_numbers<[1], [0], [0], [1], [0, 0, 1, 1], [], []>} : vector<16x80xf32>, vector<80x128xf32>, vector<16x128xf32> -> vector<16x128xf32>
    %845 = vector.broadcast %664 : vector<16x1xf32> to vector<16x128xf32>
    %846 = arith.addf %844, %845 : vector<16x128xf32>
    %847 = vector.shape_cast %846 : vector<16x128xf32> to vector<1x16x128xf32>
    %cst_519 = arith.constant dense<0.000000e+00> : vector<1xf32>
    %848 = vector.multi_reduction <add>, %847, %cst_519 [1, 2] : vector<1x16x128xf32> to vector<1xf32>
    %849 = vector.shape_cast %848 : vector<1xf32> to vector<1x1x1xf32>
    %850 = vector.extract %849[0, 0, 0] : f32 from vector<1x1x1xf32>
    %851 = arith.mulf %846, %846 : vector<16x128xf32>
    %852 = vector.shape_cast %851 : vector<16x128xf32> to vector<1x16x128xf32>
    %cst_520 = arith.constant dense<0.000000e+00> : vector<1xf32>
    %853 = vector.multi_reduction <add>, %852, %cst_520 [1, 2] : vector<1x16x128xf32> to vector<1xf32>
    %854 = vector.shape_cast %853 : vector<1xf32> to vector<1x1x1xf32>
    %855 = vector.extract %854[0, 0, 0] : f32 from vector<1x1x1xf32>
    %cst_521 = arith.constant 2.048000e+03 : f32
    %856 = arith.divf %850, %cst_521 : f32
    %cst_522 = arith.constant 2.048000e+03 : f32
    %857 = arith.divf %855, %cst_522 : f32
    %858 = arith.mulf %856, %856 : f32
    %859 = arith.subf %857, %858 : f32
    %cst_523 = arith.constant 0.000000e+00 : f32
    %860 = arith.maximumf %859, %cst_523 : f32
    %861 = vector.broadcast %856 : f32 to vector<16x128xf32>
    %862 = arith.subf %846, %861 : vector<16x128xf32>
    %cst_524 = arith.constant 9.99999974E-6 : f32
    %863 = arith.addf %860, %cst_524 : f32
    %864 = math.rsqrt %863 : f32
    %865 = vector.broadcast %864 : f32 to vector<16x128xf32>
    %866 = arith.mulf %862, %865 : vector<16x128xf32>
    %867 = vector.broadcast %665 : vector<16x1xf32> to vector<16x128xf32>
    %868 = arith.mulf %866, %867 : vector<16x128xf32>
    %869 = vector.broadcast %666 : vector<16x1xf32> to vector<16x128xf32>
    %870 = arith.addf %868, %869 : vector<16x128xf32>
    %cst_525 = arith.constant 5.000000e-01 : f32
    %871 = vector.broadcast %cst_525 : f32 to vector<16x128xf32>
    %872 = arith.mulf %871, %870 : vector<16x128xf32>
    %cst_526 = arith.constant 0.707106769 : f32
    %873 = vector.broadcast %cst_526 : f32 to vector<16x128xf32>
    %874 = arith.mulf %870, %873 : vector<16x128xf32>
    %875 = math.absf %874 : vector<16x128xf32>
    %cst_527 = arith.constant 0.327591091 : f32
    %876 = vector.broadcast %cst_527 : f32 to vector<16x128xf32>
    %877 = arith.mulf %876, %875 : vector<16x128xf32>
    %cst_528 = arith.constant 1.000000e+00 : f32
    %878 = vector.broadcast %cst_528 : f32 to vector<16x128xf32>
    %879 = arith.addf %878, %877 : vector<16x128xf32>
    %cst_529 = arith.constant 1.000000e+00 : f32
    %880 = vector.broadcast %cst_529 : f32 to vector<16x128xf32>
    %881 = arith.divf %880, %879 : vector<16x128xf32>
    %cst_530 = arith.constant 1.06140542 : f32
    %882 = vector.broadcast %cst_530 : f32 to vector<16x128xf32>
    %883 = arith.mulf %882, %881 : vector<16x128xf32>
    %cst_531 = arith.constant -1.45315206 : f32
    %884 = vector.broadcast %cst_531 : f32 to vector<16x128xf32>
    %885 = arith.addf %883, %884 : vector<16x128xf32>
    %886 = arith.mulf %885, %881 : vector<16x128xf32>
    %cst_532 = arith.constant 1.42141378 : f32
    %887 = vector.broadcast %cst_532 : f32 to vector<16x128xf32>
    %888 = arith.addf %886, %887 : vector<16x128xf32>
    %889 = arith.mulf %888, %881 : vector<16x128xf32>
    %cst_533 = arith.constant -0.284496725 : f32
    %890 = vector.broadcast %cst_533 : f32 to vector<16x128xf32>
    %891 = arith.addf %889, %890 : vector<16x128xf32>
    %892 = arith.mulf %891, %881 : vector<16x128xf32>
    %cst_534 = arith.constant 0.254829586 : f32
    %893 = vector.broadcast %cst_534 : f32 to vector<16x128xf32>
    %894 = arith.addf %892, %893 : vector<16x128xf32>
    %895 = arith.mulf %894, %881 : vector<16x128xf32>
    %cst_535 = arith.constant 0.000000e+00 : f32
    %896 = vector.broadcast %cst_535 : f32 to vector<16x128xf32>
    %897 = arith.subf %896, %875 : vector<16x128xf32>
    %898 = arith.mulf %897, %875 : vector<16x128xf32>
    %899 = math.exp %898 : vector<16x128xf32>
    %900 = arith.mulf %895, %899 : vector<16x128xf32>
    %cst_536 = arith.constant 1.000000e+00 : f32
    %901 = vector.broadcast %cst_536 : f32 to vector<16x128xf32>
    %902 = arith.subf %901, %900 : vector<16x128xf32>
    %cst_537 = arith.constant 0.000000e+00 : f32
    %903 = vector.broadcast %cst_537 : f32 to vector<16x128xf32>
    %904 = arith.cmpf oge, %874, %903 : vector<16x128xf32>
    %cst_538 = arith.constant 0.000000e+00 : f32
    %905 = vector.broadcast %cst_538 : f32 to vector<16x128xf32>
    %906 = arith.subf %905, %902 : vector<16x128xf32>
    %907 = arith.select %904, %902, %906 : vector<16x128xi1>, vector<16x128xf32>
    %cst_539 = arith.constant 1.000000e+00 : f32
    %908 = vector.broadcast %cst_539 : f32 to vector<16x128xf32>
    %909 = arith.addf %908, %907 : vector<16x128xf32>
    %910 = arith.mulf %872, %909 : vector<16x128xf32>
    %c0_540 = arith.constant 0 : index
    %c2_541 = arith.constant 2 : index
    %911 = vector.load %arg6[%c0_540, %c2_541] : memref<16x132xf32, #tpu.memory_space<vmem>>, vector<16x128xf32>
    tpu.vector_store %arg6[%c0_540, %c2_541], %910 {strides = array<i32>} : memref<16x132xf32, #tpu.memory_space<vmem>>, vector<16x128xf32>,
    %c0_542 = arith.constant 0 : index
    %c0_543 = arith.constant 0 : index
    %912 = vector.load %arg6[%c0_542, %c0_543] : memref<16x132xf32, #tpu.memory_space<vmem>>, vector<16x128xf32>
    %c0_544 = arith.constant 0 : index
    %c0_545 = arith.constant 0 : index
    %913 = vector.load %arg7[%c0_544, %c0_545] : memref<80x128xf32, #tpu.memory_space<vmem>>, vector<16x128xf32>
    tpu.vector_store %arg7[%c0_544, %c0_545], %912 {strides = array<i32>} : memref<80x128xf32, #tpu.memory_space<vmem>>, vector<16x128xf32>,
    %c0_546 = arith.constant 0 : index
    %c1_547 = arith.constant 1 : index
    %914 = vector.load %arg6[%c0_546, %c1_547] : memref<16x132xf32, #tpu.memory_space<vmem>>, vector<16x128xf32>
    %c16_548 = arith.constant 16 : index
    %c0_549 = arith.constant 0 : index
    %915 = vector.load %arg7[%c16_548, %c0_549] : memref<80x128xf32, #tpu.memory_space<vmem>>, vector<16x128xf32>
    tpu.vector_store %arg7[%c16_548, %c0_549], %914 {strides = array<i32>} : memref<80x128xf32, #tpu.memory_space<vmem>>, vector<16x128xf32>,
    %c0_550 = arith.constant 0 : index
    %c2_551 = arith.constant 2 : index
    %916 = vector.load %arg6[%c0_550, %c2_551] : memref<16x132xf32, #tpu.memory_space<vmem>>, vector<16x128xf32>
    %c32_552 = arith.constant 32 : index
    %c0_553 = arith.constant 0 : index
    %917 = vector.load %arg7[%c32_552, %c0_553] : memref<80x128xf32, #tpu.memory_space<vmem>>, vector<16x128xf32>
    tpu.vector_store %arg7[%c32_552, %c0_553], %916 {strides = array<i32>} : memref<80x128xf32, #tpu.memory_space<vmem>>, vector<16x128xf32>,
    %c0_554 = arith.constant 0 : index
    %c3_555 = arith.constant 3 : index
    %918 = vector.load %arg6[%c0_554, %c3_555] : memref<16x132xf32, #tpu.memory_space<vmem>>, vector<16x128xf32>
    %c48_556 = arith.constant 48 : index
    %c0_557 = arith.constant 0 : index
    %919 = vector.load %arg7[%c48_556, %c0_557] : memref<80x128xf32, #tpu.memory_space<vmem>>, vector<16x128xf32>
    tpu.vector_store %arg7[%c48_556, %c0_557], %918 {strides = array<i32>} : memref<80x128xf32, #tpu.memory_space<vmem>>, vector<16x128xf32>,
    %c0_558 = arith.constant 0 : index
    %c4_559 = arith.constant 4 : index
    %920 = vector.load %arg6[%c0_558, %c4_559] : memref<16x132xf32, #tpu.memory_space<vmem>>, vector<16x128xf32>
    %c64_560 = arith.constant 64 : index
    %c0_561 = arith.constant 0 : index
    %921 = vector.load %arg7[%c64_560, %c0_561] : memref<80x128xf32, #tpu.memory_space<vmem>>, vector<16x128xf32>
    tpu.vector_store %arg7[%c64_560, %c0_561], %920 {strides = array<i32>} : memref<80x128xf32, #tpu.memory_space<vmem>>, vector<16x128xf32>,
    %c0_562 = arith.constant 0 : index
    %c0_563 = arith.constant 0 : index
    %922 = vector.load %arg7[%c0_562, %c0_563] : memref<80x128xf32, #tpu.memory_space<vmem>>, vector<80x128xf32>
    %cst_564 = arith.constant dense<0.000000e+00> : vector<8x128xf32>
    %923 = tpu.matmul %663, %922, %cst_564 {dimension_numbers = #tpu.dot_dimension_numbers<[1], [0], [0], [1], [0, 0, 1, 1], [], []>} : vector<8x80xf32>, vector<80x128xf32>, vector<8x128xf32> -> vector<8x128xf32>
    %924 = vector.broadcast %667 : vector<8x1xf32> to vector<8x128xf32>
    %925 = arith.addf %923, %924 : vector<8x128xf32>
    %926 = vector.shape_cast %925 : vector<8x128xf32> to vector<1x8x128xf32>
    %cst_565 = arith.constant dense<0.000000e+00> : vector<1xf32>
    %927 = vector.multi_reduction <add>, %926, %cst_565 [1, 2] : vector<1x8x128xf32> to vector<1xf32>
    %928 = vector.shape_cast %927 : vector<1xf32> to vector<1x1x1xf32>
    %929 = vector.extract %928[0, 0, 0] : f32 from vector<1x1x1xf32>
    %930 = arith.mulf %925, %925 : vector<8x128xf32>
    %931 = vector.shape_cast %930 : vector<8x128xf32> to vector<1x8x128xf32>
    %cst_566 = arith.constant dense<0.000000e+00> : vector<1xf32>
    %932 = vector.multi_reduction <add>, %931, %cst_566 [1, 2] : vector<1x8x128xf32> to vector<1xf32>
    %933 = vector.shape_cast %932 : vector<1xf32> to vector<1x1x1xf32>
    %934 = vector.extract %933[0, 0, 0] : f32 from vector<1x1x1xf32>
    %cst_567 = arith.constant 1.024000e+03 : f32
    %935 = arith.divf %929, %cst_567 : f32
    %cst_568 = arith.constant 1.024000e+03 : f32
    %936 = arith.divf %934, %cst_568 : f32
    %937 = arith.mulf %935, %935 : f32
    %938 = arith.subf %936, %937 : f32
    %cst_569 = arith.constant 0.000000e+00 : f32
    %939 = arith.maximumf %938, %cst_569 : f32
    %940 = vector.broadcast %935 : f32 to vector<8x128xf32>
    %941 = arith.subf %925, %940 : vector<8x128xf32>
    %cst_570 = arith.constant 9.99999974E-6 : f32
    %942 = arith.addf %939, %cst_570 : f32
    %943 = math.rsqrt %942 : f32
    %944 = vector.broadcast %943 : f32 to vector<8x128xf32>
    %945 = arith.mulf %941, %944 : vector<8x128xf32>
    %946 = vector.broadcast %668 : vector<8x1xf32> to vector<8x128xf32>
    %947 = arith.mulf %945, %946 : vector<8x128xf32>
    %948 = vector.broadcast %669 : vector<8x1xf32> to vector<8x128xf32>
    %949 = arith.addf %947, %948 : vector<8x128xf32>
    %cst_571 = arith.constant 5.000000e-01 : f32
    %950 = vector.broadcast %cst_571 : f32 to vector<8x128xf32>
    %951 = arith.mulf %950, %949 : vector<8x128xf32>
    %cst_572 = arith.constant 0.707106769 : f32
    %952 = vector.broadcast %cst_572 : f32 to vector<8x128xf32>
    %953 = arith.mulf %949, %952 : vector<8x128xf32>
    %954 = math.absf %953 : vector<8x128xf32>
    %cst_573 = arith.constant 0.327591091 : f32
    %955 = vector.broadcast %cst_573 : f32 to vector<8x128xf32>
    %956 = arith.mulf %955, %954 : vector<8x128xf32>
    %cst_574 = arith.constant 1.000000e+00 : f32
    %957 = vector.broadcast %cst_574 : f32 to vector<8x128xf32>
    %958 = arith.addf %957, %956 : vector<8x128xf32>
    %cst_575 = arith.constant 1.000000e+00 : f32
    %959 = vector.broadcast %cst_575 : f32 to vector<8x128xf32>
    %960 = arith.divf %959, %958 : vector<8x128xf32>
    %cst_576 = arith.constant 1.06140542 : f32
    %961 = vector.broadcast %cst_576 : f32 to vector<8x128xf32>
    %962 = arith.mulf %961, %960 : vector<8x128xf32>
    %cst_577 = arith.constant -1.45315206 : f32
    %963 = vector.broadcast %cst_577 : f32 to vector<8x128xf32>
    %964 = arith.addf %962, %963 : vector<8x128xf32>
    %965 = arith.mulf %964, %960 : vector<8x128xf32>
    %cst_578 = arith.constant 1.42141378 : f32
    %966 = vector.broadcast %cst_578 : f32 to vector<8x128xf32>
    %967 = arith.addf %965, %966 : vector<8x128xf32>
    %968 = arith.mulf %967, %960 : vector<8x128xf32>
    %cst_579 = arith.constant -0.284496725 : f32
    %969 = vector.broadcast %cst_579 : f32 to vector<8x128xf32>
    %970 = arith.addf %968, %969 : vector<8x128xf32>
    %971 = arith.mulf %970, %960 : vector<8x128xf32>
    %cst_580 = arith.constant 0.254829586 : f32
    %972 = vector.broadcast %cst_580 : f32 to vector<8x128xf32>
    %973 = arith.addf %971, %972 : vector<8x128xf32>
    %974 = arith.mulf %973, %960 : vector<8x128xf32>
    %cst_581 = arith.constant 0.000000e+00 : f32
    %975 = vector.broadcast %cst_581 : f32 to vector<8x128xf32>
    %976 = arith.subf %975, %954 : vector<8x128xf32>
    %977 = arith.mulf %976, %954 : vector<8x128xf32>
    %978 = math.exp %977 : vector<8x128xf32>
    %979 = arith.mulf %974, %978 : vector<8x128xf32>
    %cst_582 = arith.constant 1.000000e+00 : f32
    %980 = vector.broadcast %cst_582 : f32 to vector<8x128xf32>
    %981 = arith.subf %980, %979 : vector<8x128xf32>
    %cst_583 = arith.constant 0.000000e+00 : f32
    %982 = vector.broadcast %cst_583 : f32 to vector<8x128xf32>
    %983 = arith.cmpf oge, %953, %982 : vector<8x128xf32>
    %cst_584 = arith.constant 0.000000e+00 : f32
    %984 = vector.broadcast %cst_584 : f32 to vector<8x128xf32>
    %985 = arith.subf %984, %981 : vector<8x128xf32>
    %986 = arith.select %983, %981, %985 : vector<8x128xi1>, vector<8x128xf32>
    %cst_585 = arith.constant 1.000000e+00 : f32
    %987 = vector.broadcast %cst_585 : f32 to vector<8x128xf32>
    %988 = arith.addf %987, %986 : vector<8x128xf32>
    %989 = arith.mulf %951, %988 : vector<8x128xf32>
    %990 = arith.addf %989, %831 : vector<8x128xf32>
    %c0_586 = arith.constant 0 : index
    %c0_587 = arith.constant 0 : index
    %c0_588 = arith.constant 0 : index
    %991 = vector.load %arg5[%c0_586, %c0_587, %c0_588] : memref<2x8x128xf32, #tpu.memory_space<vmem>>, vector<1x8x128xf32>
    %992 = vector.shape_cast %991 : vector<1x8x128xf32> to vector<8x128xf32>
    %993 = vector.shape_cast %830 : vector<8x128xf32> to vector<1x8x128xf32>
    tpu.vector_store %arg5[%c0_586, %c0_587, %c0_588], %993 {strides = array<i32>} : memref<2x8x128xf32, #tpu.memory_space<vmem>>, vector<1x8x128xf32>,
    %c1_589 = arith.constant 1 : index
    %c0_590 = arith.constant 0 : index
    %c0_591 = arith.constant 0 : index
    %994 = vector.load %arg5[%c1_589, %c0_590, %c0_591] : memref<2x8x128xf32, #tpu.memory_space<vmem>>, vector<1x8x128xf32>
    %995 = vector.shape_cast %994 : vector<1x8x128xf32> to vector<8x128xf32>
    %996 = vector.shape_cast %990 : vector<8x128xf32> to vector<1x8x128xf32>
    tpu.vector_store %arg5[%c1_589, %c0_590, %c0_591], %996 {strides = array<i32>} : memref<2x8x128xf32, #tpu.memory_space<vmem>>, vector<1x8x128xf32>,
    return
  }
  func.func @transform_0(%arg0: i32) -> (i32, i32) {
    %c0_i32 = arith.constant 0 : i32
    %c0_i32_0 = arith.constant 0 : i32
    %c0_i32_1 = arith.constant 0 : i32
    return %c0_i32, %c0_i32_0 : i32, i32
  }
  func.func @transform_1(%arg0: i32) -> (i32, i32) {
    %c0_i32 = arith.constant 0 : i32
    %c0_i32_0 = arith.constant 0 : i32
    %c0_i32_1 = arith.constant 0 : i32
    return %c0_i32, %c0_i32_0 : i32, i32
  }
  func.func @transform_2(%arg0: i32) -> (i32, i32) {
    %c0_i32 = arith.constant 0 : i32
    %c0_i32_0 = arith.constant 0 : i32
    %c0_i32_1 = arith.constant 0 : i32
    return %c0_i32, %c0_i32_0 : i32, i32
  }
  func.func @transform_3(%arg0: i32) -> (i32, i32) {
    %c0_i32 = arith.constant 0 : i32
    %c0_i32_0 = arith.constant 0 : i32
    %c0_i32_1 = arith.constant 0 : i32
    return %c0_i32, %c0_i32_0 : i32, i32
  }
  func.func @transform_4(%arg0: i32) -> (i32, i32, i32) {
    %c0_i32 = arith.constant 0 : i32
    %c0_i32_0 = arith.constant 0 : i32
    %c0_i32_1 = arith.constant 0 : i32
    %c0_i32_2 = arith.constant 0 : i32
    return %c0_i32, %c0_i32_0, %c0_i32_1 : i32, i32, i32
  }
}

</mosaic_0001>

<bundles_post_ra>
// kernel: tpu_custom_call.1
= control target key start
LH: loop header
LB: loop body
LE: loop exit
PB: predicated region body
PF: predicated region fallthrough
CT: control target
= control target key end

     0   :  { %9 = vsyncpa [#allocation5], 0  ;;  %s6383_s0 = inlined_call_operand.hbm [shape: f32[16,256], index: 0, kind: input, shape index: {}]   ;;  %s6384_s1 = inlined_call_operand.hbm [shape: f32[256,128], index: 1, kind: input, shape index: {}]   ;;  %s6385_s2 = inlined_call_operand.hbm [shape: f32[16,1024], index: 2, kind: input, shape index: {}]   ;;  %s6386_s3 = inlined_call_operand.hbm [shape: f32[16,128], index: 3, kind: input, shape index: {}]   ;;  %s6387_s4 = inlined_call_operand.hbm [shape: f32[2,8,128], index: 4, kind: output, shape index: {}]  }
   0x1   :  { %10 = vsyncpa [#allocation8], 0 }
   0x2   :  { %11 = vsyncpa [#allocation11], 0 }
   0x3   :  { %12 = vsyncpa [#allocation6], 0  ;;  %s5521_s15 = smov [#allocation7]   ;;  %s5403_s19 = scalar_lea.hbm %s6384_s1, 4096 }
   0x4   :  { %s30_s16 = sshll.u32 %s5521_s15, 4  ;;  %p5404_p0 = scmp.ne.s32.totalorder %s6384_s1, %s5403_s19  ;;  %s31_s16 = int_to_ptr.vmem [resolvable:$true] %s30_s16 }
   0x5   :  { %p5407_p1 = scmp.lt.u32.totalorder %s5403_s19, %s6384_s1 }
   0x7   :  { %p5409_p2 = pnand %p5407_p1, %p5404_p0 }
   0x9   :  { %5412 = shalt.err (!%p5409_p2)
}
   0xa   :  { %s5413_s24 = scalar_lea.vmem %s31_s16, 4096  ;;  %p5418_p4 = scmp.lt.s32.totalorder %s31_s16, %s31_s16 }
   0xb   :  { %p5414_p3 = scmp.ne.s32.totalorder %s31_s16, %s5413_s24  ;;  %p5419_p5 = scmp.lt.s32.totalorder %s5413_s24, %s5413_s24 }
   0xd   :  { %p5420_p6 = por %p5419_p5, %p5418_p4 }
   0xf   :  { %p5421_p7 = pnand %p5420_p6, %p5414_p3 }
  0x11   :  { %5424 = shalt.err (!%p5421_p7)
}
  0x12   :  { %s5522_s25 = smov 128   ;;  %s5523_s26 = smov 8  }
  0x13   :  { %36 = dma.hbm_to_vmem [thread:$0]  %s6384_s1, 4096, %s31_s16, [#allocation8], %s5522_s25, %s5522_s25, %s5523_s26  }
  0x14   :  { %s5524_s29 = smov [#allocation4]   ;;  %s5425_s7 = scalar_lea.hbm %s6383_s0, 512 }
  0x15   :  { %s18_s30 = sshll.u32 %s5524_s29, 4  ;;  %p5426_p8 = scmp.ne.s32.totalorder %s6383_s0, %s5425_s7  ;;  %s19_s30 = int_to_ptr.vmem [resolvable:$true] %s18_s30 }
  0x16   :  { %p5429_p9 = scmp.lt.u32.totalorder %s5425_s7, %s6383_s0 }
  0x18   :  { %p5431_p10 = pnand %p5429_p9, %p5426_p8 }
  0x1a   :  { %5434 = shalt.err (!%p5431_p10)
}
  0x1b   :  { %s5435_s12 = scalar_lea.vmem %s19_s30, 512  ;;  %p5440_p12 = scmp.lt.s32.totalorder %s19_s30, %s19_s30 }
  0x1c   :  { %p5436_p11 = scmp.ne.s32.totalorder %s19_s30, %s5435_s12  ;;  %p5441_p13 = scmp.lt.s32.totalorder %s5435_s12, %s5435_s12 }
  0x1e   :  { %p5442_p0 = por %p5441_p13, %p5440_p12 }
  0x20   :  { %p5443_p1 = pnand %p5442_p0, %p5436_p11 }
  0x22   :  { %5446 = shalt.err (!%p5443_p1)
}
  0x23   :  { %s5525_s1 = smov 256   ;;  %s5526_s13 = smov 16  }
  0x24   :  { %24 = dma.hbm_to_vmem [thread:$0]  %s6383_s0, 512, %s19_s30, [#allocation5], %s5525_s1, %s5525_s1, %s5526_s13  }
  0x25   :  { %s5527_s16 = smov [#allocation9]   ;;  %s5447_s20 = scalar_lea.hbm %s6385_s2, 2048 }
  0x26   :  { %s42_s17 = sshll.u32 %s5527_s16, 4  ;;  %p5448_p2 = scmp.ne.s32.totalorder %s6385_s2, %s5447_s20  ;;  %s43_s17 = int_to_ptr.vmem [resolvable:$true] %s42_s17 }
  0x27   :  { %p5451_p3 = scmp.lt.u32.totalorder %s5447_s20, %s6385_s2 }
  0x29   :  { %p5453_p4 = pnand %p5451_p3, %p5448_p2 }
  0x2b   :  { %5456 = shalt.err (!%p5453_p4)
}
  0x2c   :  { %s5457_s27 = scalar_lea.vmem %s43_s17, 2048  ;;  %p5462_p6 = scmp.lt.s32.totalorder %s43_s17, %s43_s17 }
  0x2d   :  { %p5458_p5 = scmp.ne.s32.totalorder %s43_s17, %s5457_s27  ;;  %p5463_p7 = scmp.lt.s32.totalorder %s5457_s27, %s5457_s27 }
  0x2f   :  { %p5464_p8 = por %p5463_p7, %p5462_p6 }
  0x31   :  { %p5465_p9 = pnand %p5464_p8, %p5458_p5 }
  0x33   :  { %5468 = shalt.err (!%p5465_p9)
}
  0x34   :  { %s5528_s0 = smov 1024   ;;  %s5529_s28 = smov 64  }
  0x35   :  { %48 = dma.hbm_to_vmem [thread:$0]  %s6385_s2, 2048, %s43_s17, [#allocation8], %s5528_s0, %s5528_s0, %s5529_s28  }
  0x36   :  { %s5530_s5 = smov [#allocation10]   ;;  %s5469_s9 = scalar_lea.hbm %s6386_s3, 256 }
  0x37   :  { %s54_s6 = sshll.u32 %s5530_s5, 4  ;;  %p5470_p10 = scmp.ne.s32.totalorder %s6386_s3, %s5469_s9  ;;  %s55_s6 = int_to_ptr.vmem [resolvable:$true] %s54_s6 }
  0x38   :  { %p5473_p11 = scmp.lt.u32.totalorder %s5469_s9, %s6386_s3 }
  0x3a   :  { %p5475_p12 = pnand %p5473_p11, %p5470_p10 }
  0x3c   :  { %5478 = shalt.err (!%p5475_p12)
}
  0x3d   :  { %s5479_s13 = scalar_lea.vmem %s55_s6, 256  ;;  %p5484_p0 = scmp.lt.s32.totalorder %s55_s6, %s55_s6 }
  0x3e   :  { %p5480_p13 = scmp.ne.s32.totalorder %s55_s6, %s5479_s13  ;;  %p5485_p1 = scmp.lt.s32.totalorder %s5479_s13, %s5479_s13 }
  0x40   :  { %p5486_p2 = por %p5485_p1, %p5484_p0 }
  0x42   :  { %p5487_p3 = pnand %p5486_p2, %p5480_p13 }
  0x44   :  { %5490 = shalt.err (!%p5487_p3)
}
  0x45   :  { %60 = dma.hbm_to_vmem [thread:$0]  %s6386_s3, 256, %s55_s6, [#allocation11], %s5522_s25, %s5522_s25, %s5523_s26  }
  0x46   :  { %5513 = dma.done.wait [#allocation5], 512  }
  0x47   :  { %5514 = vsyncadd [#allocation5], 4294966784 }
  0x48   :  { %5515 = dma.done.wait [#allocation8], 6144  }
  0x49   :  { %5516 = vsyncadd [#allocation8], 4294961152 }
  0x4a   :  { %5517 = dma.done.wait [#allocation11], 256  }
  0x4b   :  { %5518 = vsyncadd [#allocation11], 4294967040  ;;  %v98_v0 = vld [vmem:[#allocation7 + $0x80] sm:$0xff]  ;;  %v99_v1 = vld [vmem:[#allocation7 + $0x88] sm:$0xff]  ;;  %vm74_vm0 = vcmask 31744   ;;  %v5531_v50 = vmov 0.0  }
  0x4c   :  { %v82_v2 = vld [vmem:[#allocation7] sm:$0xff]  ;;  %v4477_v3 = vpack.c.bf16 %v99_v1, %v98_v0  ;;  %v83_v4 = vld [vmem:[#allocation7 + $0x8] sm:$0xff]  ;;  %v100_v5 = vld [vmem:[#allocation7 + $0x90] sm:$0xff]  ;;  %73 = vst [vmem:[#allocation2] sm:$0xff] %v5531_v50  ;;  %s5532_s3 = smov 2   ;;  %vm283_vm1 = vcmask 1047568  }
  0x4d   :  { %v101_v6 = vld [vmem:[#allocation7 + $0x98] sm:$0xff]  ;;  %v4479_v7 = vpack.c.bf16 %v83_v4, %v82_v2  ;;  %v84_v9 = vld [vmem:[#allocation7 + $0x10] sm:$0xff]  ;;  %v102_v11 = vld [vmem:[#allocation7 + $0xa0] sm:$0xff]  ;;  %75 = vst.msk [vmem:[#allocation2 + $0x8] sm:$0xff] %vm74_vm0, %v5531_v50  ;;  %vm285_vm2 = vcmask 15360   ;;  %vm197_vm3 = vcmask 64512  }
  0x4e   :  { %v4481_v8 = vpack.c.bf16 %v101_v6, %v100_v5  ;;  %v85_v10 = vld [vmem:[#allocation7 + $0x18] sm:$0xff]  ;;  %4478 = vmatprep.subr.bf16.mxu0 %v4477_v3  ;;  %v103_v12 = vld [vmem:[#allocation7 + $0xa8] sm:$0xff]  ;;  %v86_v15 = vld [vmem:[#allocation7 + $0x20] sm:$0xff]  ;;  %76 = vst [vmem:[#allocation2 + $0x10] sm:$0xff] %v5531_v50  ;;  %s5533_s15 = smov 126   ;;  %s5534_s16 = smov 127  }
  0x4f   :  { %4480 = vmatpush3.bf16.msra.mxu0 %v4479_v7  ;;  %v4483_v13 = vpack.c.bf16 %v85_v10, %v84_v9  ;;  %v4485_v14 = vpack.c.bf16 %v103_v12, %v102_v11  ;;  %v87_v16 = vld [vmem:[#allocation7 + $0x28] sm:$0xff]  ;;  %v104_v17 = vld [vmem:[#allocation7 + $0xb0] sm:$0xff]  ;;  %v105_v18 = vld [vmem:[#allocation7 + $0xb8] sm:$0xff]  ;;  %77 = vst.msk [vmem:[#allocation2 + $0x18] sm:$0xff] %vm74_vm0, %v5531_v50  ;;  %vm352_vm4 = vcmask 326656   ;;  %v5535_v61 = vmov 0  }
  0x50   :  { %4482 = vmatprep.subr.bf16.mxu0 %v4481_v8  ;;  %v4487_v19 = vpack.c.bf16 %v87_v16, %v86_v15  ;;  %v4489_v20 = vpack.c.bf16 %v105_v18, %v104_v17  ;;  %v88_v21 = vld [vmem:[#allocation7 + $0x30] sm:$0xff]  ;;  %v89_v22 = vld [vmem:[#allocation7 + $0x38] sm:$0xff]  ;;  %v106_v23 = vld [vmem:[#allocation7 + $0xc0] sm:$0xff]  ;;  %4847 = vset.pattern.permute.xlu1 %v5535_v61  ;;  %s5536_s17 = smov 125   ;;  %s5537_s18 = smov 124   ;;  %vm297_vm5 = vcmask 1039360  }
  0x51   :  { %v107_v24 = vld [vmem:[#allocation7 + $0xc8] sm:$0xff]  ;;  %v4491_v26 = vpack.c.bf16 %v89_v22, %v88_v21  ;;  %v90_v28 = vld [vmem:[#allocation7 + $0x40] sm:$0xff]  ;;  %v108_v30 = vld [vmem:[#allocation7 + $0xd0] sm:$0xff]  ;;  %4846 = vset.pattern.permute.xlu0 %v5535_v61  ;;  %vm309_vm6 = vcmask 1031168   ;;  %vm321_vm7 = vcmask 1022976   ;;  %vm333_vm8 = vcmask 1014784  }
  0x52   :  { %v79_v25 = vld [vmem:[#allocation4 + $0x8] sm:$0xff]  ;;  %v4493_v27 = vpack.c.bf16 %v107_v24, %v106_v23  ;;  %v109_v31 = vld [vmem:[#allocation7 + $0xd8] sm:$0xff]  ;;  %v92_v34 = vld [vmem:[#allocation7 + $0x50] sm:$0xff]  ;;  %s5540_s27 = smov 0.0   ;;  %vm671_vm11 = vcmask 654336  }
  0x53   :  { %4484 = vmatpush3.bf16.msra.mxu0 %v4483_v13  ;;  %178 = vmatprep.mubr.f32.mxu0 %v79_v25  ;;  %v91_v29 = vld [vmem:[#allocation7 + $0x48] sm:$0xff]  ;;  %v4497_v33 = vpack.c.bf16 %v109_v31, %v108_v30  ;;  %v93_v35 = vld [vmem:[#allocation7 + $0x58] sm:$0xff]  ;;  %v110_v36 = vld [vmem:[#allocation7 + $0xe0] sm:$0xff] }
  0x54   :  { %4486 = vmatprep.subr.bf16.mxu0 %v4485_v14  ;;  %v4495_v32 = vpack.c.bf16 %v91_v29, %v90_v28  ;;  %v111_v37 = vld [vmem:[#allocation7 + $0xe8] sm:$0xff]  ;;  %v4499_v38 = vpack.c.bf16 %v93_v35, %v92_v34  ;;  %v94_v40 = vld [vmem:[#allocation7 + $0x60] sm:$0xff]  ;;  %v112_v42 = vld [vmem:[#allocation7 + $0xf0] sm:$0xff] }
  0x55   :  { %v4501_v39 = vpack.c.bf16 %v111_v37, %v110_v36  ;;  %v95_v41 = vld [vmem:[#allocation7 + $0x68] sm:$0xff]  ;;  %v113_v43 = vld [vmem:[#allocation7 + $0xf8] sm:$0xff]  ;;  %v96_v46 = vld [vmem:[#allocation7 + $0x70] sm:$0xff] }
  0x56   :  { %v4503_v44 = vpack.c.bf16 %v95_v41, %v94_v40  ;;  %v4505_v45 = vpack.c.bf16 %v113_v43, %v112_v42  ;;  %v97_v47 = vld [vmem:[#allocation7 + $0x78] sm:$0xff]  ;;  %v78_v49 = vld [vmem:[#allocation4] sm:$0xff]  ;;  %v189_v60 = vld [vmem:[#allocation9 + $0x8] sm:$0xff] }
  0x57   :  { %4488 = vmatpush3.bf16.msra.mxu0 %v4487_v19  ;;  %v4507_v48 = vpack.c.bf16 %v97_v47, %v96_v46  ;;  %v5645_v55 = vld [vmem:[#allocation9] sm:$0xff]  ;;  %v5662_v63 = vld [vmem:[#allocation10 + $0x8] sm:$0xff]  ;;  %v80_v21 = vld [vmem:[#allocation4 + $0x10] sm:$0xff] }
  0x58   :  { %4490 = vmatprep.subr.bf16.mxu0 %v4489_v20  ;;  %4199 = vmatprep.mubr.msk.f32.mxu1 %vm197_vm3, %v5645_v55  ;;  %v5649_v56 = vld [vmem:[#allocation9 + $0x40] sm:$0xff]  ;;  %v5669_v17 = vld [vmem:[#allocation9 + $0x48] sm:$0xff]  ;;  %v81_v20 = vld [vmem:[#allocation4 + $0x18] sm:$0xff] }
  0x59   :  { %v5658_v62 = vld [vmem:[#allocation10] sm:$0xff] }
  0x5b   :  { %4492 = vmatpush3.bf16.msra.mxu0 %v4491_v26 }
  0x5c   :  { %4494 = vmatprep.subr.bf16.mxu0 %v4493_v27 }
  0x5f   :  { %4496 = vmatpush3.bf16.msra.mxu0 %v4495_v32  ;;  %v5538_v32 = vmov 1  }
  0x60   :  { %4498 = vmatprep.subr.bf16.mxu0 %v4497_v33  ;;  %v5539_v33 = vmov 2  }
  0x63   :  { %4500 = vmatpush3.bf16.msra.mxu0 %v4499_v38 }
  0x64   :  { %4502 = vmatprep.subr.bf16.mxu0 %v4501_v39 }
  0x67   :  { %4504 = vmatpush3.bf16.msra.mxu0 %v4503_v44 }
  0x68   :  { %4506 = vmatprep.subr.bf16.mxu0 %v4505_v45 }
  0x6b   :  { %4508 = vmatpush3.bf16.msra.mxu0 %v4507_v48 }
  0x6e   :  { %179 = vmatmul.mubr.f32.vlgmr.msra.gmra.mrb[0].mxu0 %v78_v49 }
  0x6f   :  { %183 = vmatprep.mubr.f32.mxu0 %v81_v20 }
  0x72   :  { %184 = vmatmul.mubr.f32.gmra.mrb[2].mxu0 %v80_v21 }
  0x73   :  { %4253 = vmatprep.mubr.msk.f32.mxu0 %vm352_vm4, %v189_v60 }
 0x141   :  { %v4047_v51 = vpop.f32.mrb[0].mxu0 }
 0x142   :  { %v4048_v52 = vpop.f32.mrb[1].mxu0 }
 0x143   :  { %v4049_v53 = vadd.f32 %v4048_v52, %v4047_v51 }
 0x145   :  { %280 = vrot.lane.b32.xlu0 %v4049_v53, %s5532_s3  ;;  %4197 = vmatprep.subr.mxu1 %v4049_v53  ;;  %v4050_v48 = vpop.f32.mrb[2].mxu0 }
 0x146   :  { %4198 = vmatpush3.msra.mxu1 %v4049_v53  ;;  %v4051_v49 = vpop.f32.mrb[3].mxu0 }
 0x147   :  { %4200 = vmatmul.mubr.msk.f32.vlgmr.msra.gmra.mrb[0].mxu1 %vm197_vm3, %v5649_v56  ;;  %v5688_v51 = vadd.f32 %v4051_v49, %v4050_v48 }
 0x148   :  { %4212 = vmatprep.mubr.msk.f32.mxu1 %vm352_vm4, %v189_v60 }
 0x1b7   :  { %v281_v54 = vpop.permute.xlu0 %280 }
 0x1b8   :  { %284 = vst.msk [vmem:[#allocation2] sm:$0xff] %vm283_vm1, %v281_v54 }
 0x1b9   :  { %286 = vst.msk [vmem:[#allocation2 + $0x8] sm:$0xff] %vm285_vm2, %v281_v54 }
 0x1bf   :  { %v301_v57 = vld [vmem:[#allocation2] sm:$0xff] }
 0x1c0   :  { %v302_v58 = vld [vmem:[#allocation2 + $0x8] sm:$0xff] }
 0x1c1   :  { %v4836_v59 = vpack.i.bf16 %v302_v58, %v301_v57 }
 0x1c3   :  { %4837 = vrot.lane.b32.xlu1 %v4836_v59, %s5533_s15  ;;  %4832 = vrot.lane.b32.xlu0 %v4836_v59, %s5534_s16 }
 0x1c7   :  { %4842 = vrot.lane.b32.xlu1 %v4836_v59, %s5536_s17  ;;  %329 = vrot.lane.b32.xlu0 %v301_v57, %s5537_s18 }
 0x1cb   :  { %331 = vrot.lane.b32.xlu1 %v302_v58, %s5537_s18  ;;  %344 = vperm.xlu0 %4846, %v5658_v62  }
 0x1cf   :  { %349 = vperm.xlu1 %4847, %v5662_v63   ;;  %4848 = vset.pattern.permute.xlu0 %v5538_v32 }
 0x1d3   :  { %4849 = vset.pattern.permute.xlu1 %v5538_v32 }
 0x21a   :  { %v5673_v18 = vpop.f32.mrb[0].mxu1 }
 0x21b   :  { %v5675_v19 = vpop.f32.mrb[1].mxu1 }
 0x235   :  { %v4838_v0 = vpop.permute.xlu1 %4837  ;;  %v4833_v1 = vpop.permute.xlu0 %4832 }
 0x236   :  { %v4835_v2 = vunpack.i.h.bf16 %v4833_v1  ;;  %v4834_v3 = vunpack.i.l.bf16 %v4833_v1  ;;  %v4840_v4 = vunpack.i.h.bf16 %v4838_v0  ;;  %v4839_v5 = vunpack.i.l.bf16 %v4838_v0 }
 0x238   :  { %v298_v6 = vsel %vm297_vm5, %v4834_v3, %v4835_v2  ;;  %v310_v11 = vsel %vm309_vm6, %v4839_v5, %v4840_v4 }
 0x239   :  { %v4843_v7 = vpop.permute.xlu1 %4842  ;;  %v4509_v8 = vpack.c.bf16 %v298_v6, %v301_v57  ;;  %v330_v15 = vpop.permute.xlu0 %329 }
 0x23a   :  { %v4845_v9 = vunpack.i.h.bf16 %v4843_v7  ;;  %v4844_v10 = vunpack.i.l.bf16 %v4843_v7 }
 0x23b   :  { %4510 = vmatprep.subr.bf16.mxu1 %v4509_v8 }
 0x23c   :  { %4512 = vmatpush3.bf16.msra.mxu1 %v4509_v8  ;;  %v322_v12 = vsel %vm321_vm7, %v4844_v10, %v4845_v9 }
 0x23d   :  { %v332_v13 = vpop.permute.xlu1 %331  ;;  %v4513_v14 = vpack.c.bf16 %v322_v12, %v310_v11 }
 0x23e   :  { %v334_v16 = vsel %vm333_vm8, %v330_v15, %v332_v13 }
 0x23f   :  { %4514 = vmatprep.subr.bf16.mxu1 %v4513_v14 }
 0x240   :  { %4516 = vmatpush3.bf16.msra.mxu1 %v4513_v14 }
 0x241   :  { %4210 = vmatprep.subr.mxu1 %v334_v16 }
 0x244   :  { %4211 = vmatpush3.msra.mxu1 %v334_v16 }
 0x245   :  { %4213 = vmatmul.mubr.msk.f32.vlgmr.msra.gmra.mrb[2].mxu1 %vm352_vm4, %v5669_v17 }
 0x24a   :  { %v5680_v23 = vpop.permute.xlu0 %344 }
 0x24e   :  { %v5678_v22 = vpop.permute.xlu1 %349 }
 0x318   :  { %v4214_v24 = vpop.f32.mrb[2].mxu1 }
 0x319   :  { %v431_v25 = vadd.f32 %v4214_v24, %v5678_v22  ;;  %v425_v26 = vpop.f32.mrb[3].mxu1 }
 0x31a   :  { %v426_v27 = vadd.f32 %v425_v26, %v5680_v23 }
 0x31b   :  { %v445_v28 = vmul.f32 %v431_v25, %v431_v25 }
 0x31c   :  { %v434_v29 = vadd.f32 %v431_v25, %v426_v27  ;;  %v444_v30 = vmul.f32 %v426_v27, %v426_v27 }
 0x31e   :  { %435 = vadd.xlane.f32.xlu1 %v434_v29  ;;  %v446_v31 = vadd.f32 %v445_v28, %v444_v30 }
 0x320   :  { %447 = vadd.xlane.f32.xlu0 %v446_v31 }
 0x32f   :  { %480 = vperm.xlu1 %4849, %v5662_v63  }
 0x333   :  { %4850 = vset.pattern.permute.xlu1 %v5539_v33 }
 0x334   :  { %486 = vperm.xlu1 %4850, %v5658_v62  }
 0x336   :  { %476 = vperm.xlu0 %4848, %v5658_v62  }
 0x338   :  { %490 = vperm.xlu1 %4850, %v5662_v63  }
 0x3ab   :  { %v436_v34 = vpop.xlane.xlu1 %435 }
 0x3ac   :  { %v437_v35 = vrot.slane %v436_v34, 4 }
 0x3ad   :  { %v448_v36 = vpop.xlane.xlu0 %447 }
 0x3ae   :  { %v438_v37 = vadd.f32 %v437_v35, %v436_v34  ;;  %v449_v38 = vrot.slane %v448_v36, 4 }
 0x3af   :  { %v5691_v54 = vpop.permute.xlu1 %480 }
 0x3b0   :  { %v450_v39 = vadd.f32 %v449_v38, %v448_v36  ;;  %v439_v40 = vrot.slane %v438_v37, 2 }
 0x3b2   :  { %v440_v41 = vadd.f32 %v439_v40, %v438_v37  ;;  %v451_v42 = vrot.slane %v450_v39, 2 }
 0x3b3   :  { %v5693_v58 = vpop.permute.xlu1 %486 }
 0x3b4   :  { %v441_v43 = vrot.slane %v440_v41, 1  ;;  %v452_v44 = vadd.f32 %v451_v42, %v450_v39 }
 0x3b5   :  { %v5695_v0 = vpop.permute.xlu0 %476 }
 0x3b6   :  { %v442_v45 = vadd.f32 %v441_v43, %v440_v41  ;;  %v453_v46 = vrot.slane %v452_v44, 1 }
 0x3b7   :  { %v5697_v3 = vpop.permute.xlu1 %490 }
 0x3b8   :  { %4721 = vpush %v442_v45  ;;  %v454_v47 = vadd.f32 %v453_v46, %v452_v44 }
 0x3ba   :  { %4723 = vpush %v454_v47 }
 0x3e9   :  { %s4722_s19 = spop %4721 }
 0x3ea   :  { %s458_s20 = smul.f32 0.00048828125, %s4722_s19 }
 0x3eb   :  { %s4724_s21 = spop %4723 }
 0x3ec   :  { %s462_s22 = smul.f32 %s458_s20, %s458_s20  ;;  %v465_v57 = vstv %s458_s20 }
 0x3ed   :  { %s461_s23 = smul.f32 0.00048828125, %s4724_s21  ;;  %v466_v59 = vsub.f32 %v426_v27, %v465_v57  ;;  %v467_v60 = vsub.f32 %v431_v25, %v465_v57 }
 0x3ef   :  { %s463_s24 = ssub.f32 %s461_s23, %s462_s22 }
 0x3f1   :  { %s464_s0 = smax.f32 %s5540_s27, %s463_s24 }
 0x3f2   :  { %s468_s28 = sadd.f32 1e-05, %s464_s0 }
 0x3f4   :  { %v469_v52 = vstv %s468_s28 }
 0x3f5   :  { %5290 = vrsqrt.f32 %v469_v52 }
 0x3ff   :  { %v5291_v53 = vpop.eup %5290 }
 0x400   :  { %4725 = vpush %v5291_v53 }
 0x431   :  { %s4726_s29 = spop %4725 }
 0x432   :  { %v472_v61 = vstv %s4726_s29 }
 0x433   :  { %v473_v1 = vmul.f32 %v472_v61, %v466_v59  ;;  %v474_v2 = vmul.f32 %v472_v61, %v467_v60 }
 0x435   :  { %v484_v4 = vmul.f32 %v5691_v54, %v474_v2  ;;  %v483_v5 = vmul.f32 %v5695_v0, %v473_v1 }
 0x437   :  { %v493_v6 = vadd.f32 %v5693_v58, %v483_v5  ;;  %v494_v7 = vadd.f32 %v5697_v3, %v484_v4 }
 0x439   :  { %v497_v8 = vmul.f32 0.70710677, %v493_v6  ;;  %v498_v9 = vmul.f32 0.70710677, %v494_v7  ;;  %v495_v1 = vmul.f32 0.5, %v493_v6 }
 0x43b   :  { %v499_v10 = vand.u32 2147483647, %v497_v8  ;;  %v500_v11 = vand.u32 2147483647, %v498_v9  ;;  %vm539_vm9 = vcmp.ge.f32.partialorder %v497_v8, 0.0  ;;  %vm540_vm10 = vcmp.ge.f32.partialorder %v498_v9, 0.0 }
 0x43d   :  { %v501_v12 = vmul.f32 0.3275911, %v499_v10  ;;  %v502_v13 = vmul.f32 0.3275911, %v500_v11  ;;  %v527_v16 = vsub.f32 0.0, %v499_v10  ;;  %v528_v20 = vsub.f32 0.0, %v500_v11 }
 0x43f   :  { %v503_v14 = vadd.f32 1.0, %v501_v12  ;;  %v504_v15 = vadd.f32 1.0, %v502_v13  ;;  %v529_v24 = vmul.f32 %v527_v16, %v499_v10  ;;  %v530_v26 = vmul.f32 %v528_v20, %v500_v11 }
 0x440   :  { %v496_v11 = vmul.f32 0.5, %v494_v7 }
 0x441   :  { %5292 = vrcp.f32 %v503_v14  ;;  %v531_v30 = vmul.f32 1.442695, %v529_v24  ;;  %v533_v32 = vmul.f32 1.442695, %v530_v26  ;;  %v5720_v26 = vld [vmem:[#allocation9 + $0x10] sm:$0xff] }
 0x442   :  { %5294 = vrcp.f32 %v504_v15  ;;  %4235 = vmatprep.mubr.msk.f32.mxu1 %vm671_vm11, %v5720_v26 }
 0x443   :  { %5296 = vpow2.f32 %v531_v30 }
 0x444   :  { %5298 = vpow2.f32 %v533_v32 }
 0x44b   :  { %v5293_v21 = vpop.eup %5292 }
 0x44c   :  { %v5295_v25 = vpop.eup %5294  ;;  %v509_v27 = vmul.f32 1.0614054, %v5293_v21 }
 0x44d   :  { %v510_v28 = vmul.f32 1.0614054, %v5295_v25  ;;  %v5297_v46 = vpop.eup %5296 }
 0x44e   :  { %v511_v29 = vadd.f32 -1.4531521, %v509_v27  ;;  %v5299_v48 = vpop.eup %5298 }
 0x44f   :  { %v512_v31 = vadd.f32 -1.4531521, %v510_v28  ;;  %v5541_v28 = vmov 3  }
 0x450   :  { %v513_v33 = vmul.f32 %v5293_v21, %v511_v29  ;;  %4907 = vset.pattern.permute.xlu0 %v5541_v28  ;;  %4906 = vset.pattern.permute.xlu1 %v5541_v28 }
 0x451   :  { %v514_v34 = vmul.f32 %v5295_v25, %v512_v31 }
 0x452   :  { %v515_v35 = vadd.f32 1.4214138, %v513_v33 }
 0x453   :  { %v516_v36 = vadd.f32 1.4214138, %v514_v34 }
 0x454   :  { %v517_v37 = vmul.f32 %v5293_v21, %v515_v35 }
 0x455   :  { %v518_v38 = vmul.f32 %v5295_v25, %v516_v36 }
 0x456   :  { %v519_v39 = vadd.f32 -0.28449672, %v517_v37 }
 0x457   :  { %v520_v40 = vadd.f32 -0.28449672, %v518_v38 }
 0x458   :  { %v521_v41 = vmul.f32 %v5293_v21, %v519_v39 }
 0x459   :  { %v522_v42 = vmul.f32 %v5295_v25, %v520_v40 }
 0x45a   :  { %v523_v43 = vadd.f32 0.2548296, %v521_v41 }
 0x45b   :  { %v524_v44 = vadd.f32 0.2548296, %v522_v42 }
 0x45c   :  { %v525_v45 = vmul.f32 %v5293_v21, %v523_v43 }
 0x45d   :  { %v526_v47 = vmul.f32 %v5295_v25, %v524_v44 }
 0x45e   :  { %v535_v49 = vmul.f32 %v5297_v46, %v525_v45 }
 0x45f   :  { %v536_v52 = vmul.f32 %v5299_v48, %v526_v47 }
 0x460   :  { %v537_v53 = vsub.f32 1.0, %v535_v49 }
 0x461   :  { %v538_v57 = vsub.f32 1.0, %v536_v52 }
 0x462   :  { %v541_v59 = vsub.f32 0.0, %v537_v53 }
 0x463   :  { %v542_v60 = vsub.f32 0.0, %v538_v57 }
 0x464   :  { %v543_v61 = vsel %vm539_vm9, %v537_v53, %v541_v59 }
 0x465   :  { %v545_v2 = vadd.f32 1.0, %v543_v61  ;;  %v544_v4 = vsel %vm540_vm10, %v538_v57, %v542_v60 }
 0x466   :  { %v546_v10 = vadd.f32 1.0, %v544_v4 }
 0x467   :  { %v547_v5 = vmul.f32 %v545_v2, %v495_v1 }
 0x468   :  { %v548_v12 = vmul.f32 %v546_v10, %v496_v11 }
 0x469   :  { %551 = vrot.lane.b32.xlu1 %v547_v5, %s5532_s3 }
 0x46d   :  { %553 = vrot.lane.b32.xlu1 %v548_v12, %s5532_s3 }
 0x471   :  { %946 = vrot.lane.b32.xlu1 %v5688_v51, %s5532_s3 }
 0x4db   :  { %v552_v13 = vpop.permute.xlu1 %551 }
 0x4dc   :  { %557 = vst.msk [vmem:[#allocation2] sm:$0xff] %vm283_vm1, %v552_v13 }
 0x4dd   :  { %558 = vst.msk [vmem:[#allocation2 + $0x8] sm:$0xff] %vm285_vm2, %v552_v13 }
 0x4df   :  { %v554_v8 = vpop.permute.xlu1 %553 }
 0x4e0   :  { %559 = vst.msk [vmem:[#allocation2 + $0x10] sm:$0xff] %vm283_vm1, %v554_v8 }
 0x4e1   :  { %560 = vst.msk [vmem:[#allocation2 + $0x18] sm:$0xff] %vm285_vm2, %v554_v8 }
 0x4e3   :  { %v565_v6 = vld [vmem:[#allocation2] sm:$0xff]  ;;  %v947_v9 = vpop.permute.xlu1 %946 }
 0x4e4   :  { %v566_v7 = vld [vmem:[#allocation2 + $0x8] sm:$0xff]  ;;  %949 = vst.msk [vmem:[#allocation2] sm:$0xff] %vm283_vm1, %v947_v9 }
 0x4e5   :  { %v4851_v14 = vpack.i.bf16 %v566_v7, %v565_v6  ;;  %950 = vst.msk [vmem:[#allocation2 + $0x8] sm:$0xff] %vm285_vm2, %v947_v9 }
 0x4e7   :  { %4852 = vrot.lane.b32.xlu1 %v4851_v14, %s5534_s16  ;;  %v589_v15 = vld [vmem:[#allocation2 + $0x10] sm:$0xff] }
 0x4e8   :  { %v590_v16 = vld [vmem:[#allocation2 + $0x18] sm:$0xff]  ;;  %v4517_v21 = vpack.c.bf16 %v589_v15, %v565_v6 }
 0x4e9   :  { %v4866_v20 = vpack.i.bf16 %v590_v16, %v589_v15 }
 0x4ea   :  { %4518 = vmatprep.subr.bf16.mxu1 %v4517_v21 }
 0x4eb   :  { %4867 = vrot.lane.b32.xlu0 %v4866_v20, %s5533_s15  ;;  %4857 = vrot.lane.b32.xlu1 %v4866_v20, %s5534_s16  ;;  %v5718_v24 = vld [vmem:[#allocation2] sm:$0xff] }
 0x4ec   :  { %4520 = vmatpush3.bf16.msra.mxu1 %v4517_v21  ;;  %v954_v25 = vld [vmem:[#allocation2 + $0x8] sm:$0xff] }
 0x4ed   :  { %v4891_v27 = vpack.i.bf16 %v954_v25, %v5718_v24 }
 0x4ef   :  { %4877 = vrot.lane.b32.xlu0 %v4866_v20, %s5536_s17  ;;  %4862 = vrot.lane.b32.xlu1 %v4851_v14, %s5533_s15 }
 0x4f3   :  { %4882 = vrot.lane.b32.xlu0 %v4851_v14, %s5537_s18  ;;  %4872 = vrot.lane.b32.xlu1 %v4851_v14, %s5536_s17 }
 0x4f7   :  { %4887 = vrot.lane.b32.xlu1 %v4866_v20, %s5537_s18  ;;  %4892 = vrot.lane.b32.xlu0 %v4891_v27, %s5534_s16 }
 0x4fb   :  { %4897 = vrot.lane.b32.xlu1 %v4891_v27, %s5533_s15  ;;  %4902 = vrot.lane.b32.xlu0 %v4891_v27, %s5536_s17 }
 0x4ff   :  { %990 = vrot.lane.b32.xlu1 %v5718_v24, %s5537_s18  ;;  %992 = vrot.lane.b32.xlu0 %v954_v25, %s5537_s18 }
 0x503   :  { %668 = vperm.xlu0 %4907, %v5662_v63   ;;  %664 = vperm.xlu1 %4906, %v5658_v62  }
 0x559   :  { %v4853_v29 = vpop.permute.xlu1 %4852 }
 0x55a   :  { %v4855_v30 = vunpack.i.h.bf16 %v4853_v29  ;;  %v4854_v31 = vunpack.i.l.bf16 %v4853_v29  ;;  %v5746_v29 = vld [vmem:[#allocation9 + $0x50] sm:$0xff] }
 0x55c   :  { %v581_v38 = vsel %vm297_vm5, %v4854_v31, %v4855_v30 }
 0x55d   :  { %v4868_v32 = vpop.permute.xlu0 %4867  ;;  %v4858_v33 = vpop.permute.xlu1 %4857 }
 0x55e   :  { %v4860_v34 = vunpack.i.h.bf16 %v4858_v33  ;;  %v4859_v35 = vunpack.i.l.bf16 %v4858_v33  ;;  %v4870_v36 = vunpack.i.h.bf16 %v4868_v32  ;;  %v4869_v37 = vunpack.i.l.bf16 %v4868_v32 }
 0x560   :  { %v582_v39 = vsel %vm297_vm5, %v4859_v35, %v4860_v34  ;;  %v604_v48 = vsel %vm309_vm6, %v4869_v37, %v4870_v36 }
 0x561   :  { %v4878_v40 = vpop.permute.xlu0 %4877  ;;  %v4863_v41 = vpop.permute.xlu1 %4862  ;;  %v4521_v42 = vpack.c.bf16 %v582_v39, %v581_v38 }
 0x562   :  { %v4865_v43 = vunpack.i.h.bf16 %v4863_v41  ;;  %v4864_v44 = vunpack.i.l.bf16 %v4863_v41  ;;  %v4880_v45 = vunpack.i.h.bf16 %v4878_v40  ;;  %v4879_v46 = vunpack.i.l.bf16 %v4878_v40 }
 0x563   :  { %4522 = vmatprep.subr.bf16.mxu1 %v4521_v42 }
 0x564   :  { %4524 = vmatpush3.bf16.msra.mxu1 %v4521_v42  ;;  %v603_v47 = vsel %vm309_vm6, %v4864_v44, %v4865_v43  ;;  %v626_v2 = vsel %vm321_vm7, %v4879_v46, %v4880_v45 }
 0x565   :  { %v4883_v49 = vpop.permute.xlu0 %4882  ;;  %v4873_v52 = vpop.permute.xlu1 %4872  ;;  %v4525_v53 = vpack.c.bf16 %v604_v48, %v603_v47  ;;  %v5542_v48 = vmov 4  }
 0x566   :  { %v4875_v57 = vunpack.i.h.bf16 %v4873_v52  ;;  %v4874_v59 = vunpack.i.l.bf16 %v4873_v52  ;;  %v4885_v60 = vunpack.i.h.bf16 %v4883_v49  ;;  %v4884_v61 = vunpack.i.l.bf16 %v4883_v49  ;;  %4908 = vset.pattern.permute.xlu1 %v5542_v48  ;;  %4909 = vset.pattern.permute.xlu0 %v5542_v48 }
 0x567   :  { %4526 = vmatprep.subr.bf16.mxu1 %v4525_v53 }
 0x568   :  { %4528 = vmatpush3.bf16.msra.mxu1 %v4525_v53  ;;  %v625_v1 = vsel %vm321_vm7, %v4874_v59, %v4875_v57  ;;  %v647_v6 = vsel %vm333_vm8, %v4884_v61, %v4885_v60 }
 0x569   :  { %v4893_v4 = vpop.permute.xlu0 %4892  ;;  %v4888_v5 = vpop.permute.xlu1 %4887  ;;  %v4529_v10 = vpack.c.bf16 %v626_v2, %v625_v1 }
 0x56a   :  { %v4895_v11 = vunpack.i.h.bf16 %v4893_v4  ;;  %v4894_v12 = vunpack.i.l.bf16 %v4893_v4  ;;  %v4890_v13 = vunpack.i.h.bf16 %v4888_v5  ;;  %v4889_v8 = vunpack.i.l.bf16 %v4888_v5 }
 0x56b   :  { %4530 = vmatprep.subr.bf16.mxu1 %v4529_v10 }
 0x56c   :  { %4532 = vmatpush3.bf16.msra.mxu1 %v4529_v10  ;;  %v648_v7 = vsel %vm333_vm8, %v4889_v8, %v4890_v13  ;;  %v961_v9 = vsel %vm297_vm5, %v4894_v12, %v4895_v11 }
 0x56d   :  { %v4903_v14 = vpop.permute.xlu0 %4902  ;;  %v4898_v15 = vpop.permute.xlu1 %4897  ;;  %v4533_v16 = vpack.c.bf16 %v648_v7, %v647_v6  ;;  %v4537_v20 = vpack.c.bf16 %v961_v9, %v5718_v24 }
 0x56e   :  { %v4905_v21 = vunpack.i.h.bf16 %v4903_v14  ;;  %v4904_v25 = vunpack.i.l.bf16 %v4903_v14  ;;  %v4900_v27 = vunpack.i.h.bf16 %v4898_v15  ;;  %v4899_v28 = vunpack.i.l.bf16 %v4898_v15 }
 0x56f   :  { %4534 = vmatprep.subr.bf16.mxu1 %v4533_v16  ;;  %4538 = vmatprep.subr.bf16.mxu0 %v4537_v20 }
 0x570   :  { %4536 = vmatpush3.bf16.msra.mxu1 %v4533_v16  ;;  %4540 = vmatpush3.bf16.msra.mxu0 %v4537_v20  ;;  %v972_v30 = vsel %vm309_vm6, %v4899_v28, %v4900_v27  ;;  %v983_v31 = vsel %vm321_vm7, %v4904_v25, %v4905_v21 }
 0x571   :  { %4238 = vmatprep.subr.mxu1 %v5688_v51  ;;  %v4541_v32 = vpack.c.bf16 %v983_v31, %v972_v30  ;;  %v993_v33 = vpop.permute.xlu0 %992  ;;  %v991_v34 = vpop.permute.xlu1 %990 }
 0x572   :  { %v994_v24 = vsel %vm333_vm8, %v991_v34, %v993_v33 }
 0x573   :  { %4236 = vmatmul.mubr.msk.f32.vlgmr.msra.gmra.mrb[4].mxu1 %vm671_vm11, %v5746_v29  ;;  %4542 = vmatprep.subr.bf16.mxu0 %v4541_v32 }
 0x574   :  { %4239 = vmatpush3.msra.mxu1 %v5688_v51  ;;  %4544 = vmatpush3.bf16.msra.mxu0 %v4541_v32 }
 0x575   :  { %4251 = vmatprep.subr.mxu0 %v994_v24  ;;  %4240 = vmatprep.mubr.msk.f32.mxu1 %vm197_vm3, %v5645_v55 }
 0x577   :  { %4241 = vmatmul.mubr.msk.f32.vlgmr.msra.gmra.mrb[6].mxu1 %vm197_vm3, %v5649_v56 }
 0x578   :  { %4252 = vmatpush3.msra.mxu0 %v994_v24  ;;  %4276 = vmatprep.mubr.msk.f32.mxu1 %vm671_vm11, %v5720_v26 }
 0x579   :  { %4254 = vmatmul.mubr.msk.f32.vlgmr.msra.gmra.mrb[4].mxu0 %vm352_vm4, %v5669_v17 }
 0x582   :  { %v5763_v35 = vpop.permute.xlu0 %668  ;;  %v5765_v36 = vpop.permute.xlu1 %664 }
 0x646   :  { %v4237_v51 = vpop.f32.mrb[4].mxu1 }
 0x647   :  { %v5768_v37 = vadd.f32 %v4237_v51, %v5763_v35  ;;  %v744_v38 = vpop.f32.mrb[5].mxu1 }
 0x648   :  { %v5771_v55 = vadd.f32 %v744_v38, %v5765_v36 }
 0x649   :  { %v764_v56 = vmul.f32 %v5768_v37, %v5768_v37 }
 0x64a   :  { %v753_v26 = vadd.f32 %v5768_v37, %v5771_v55  ;;  %v763_v17 = vmul.f32 %v5771_v55, %v5771_v55 }
 0x64c   :  { %v4255_v39 = vpop.f32.mrb[4].mxu0  ;;  %754 = vadd.xlane.f32.xlu1 %v753_v26  ;;  %v765_v40 = vadd.f32 %v764_v56, %v763_v17 }
 0x64d   :  { %v5780_v41 = vadd.f32 %v4255_v39, %v5678_v22  ;;  %v1068_v42 = vpop.f32.mrb[5].mxu0  ;;  %v5543_v22 = vmov 5  }
 0x64e   :  { %v5783_v43 = vadd.f32 %v1068_v42, %v5680_v23  ;;  %766 = vadd.xlane.f32.xlu0 %v765_v40 }
 0x64f   :  { %v1088_v44 = vmul.f32 %v5780_v41, %v5780_v41 }
 0x650   :  { %v1077_v45 = vadd.f32 %v5780_v41, %v5783_v43  ;;  %v1087_v46 = vmul.f32 %v5783_v43, %v5783_v43 }
 0x652   :  { %1078 = vadd.xlane.f32.xlu1 %v1077_v45  ;;  %v1089_v47 = vadd.f32 %v1088_v44, %v1087_v46 }
 0x654   :  { %1090 = vadd.xlane.f32.xlu0 %v1089_v47 }
 0x663   :  { %795 = vperm.xlu1 %4908, %v5658_v62  }
 0x667   :  { %4910 = vset.pattern.permute.xlu1 %v5543_v22 }
 0x668   :  { %805 = vperm.xlu1 %4910, %v5658_v62  }
 0x66a   :  { %799 = vperm.xlu0 %4909, %v5662_v63  }
 0x66c   :  { %809 = vperm.xlu1 %4910, %v5662_v63  }
 0x6d9   :  { %v755_v23 = vpop.xlane.xlu1 %754 }
 0x6da   :  { %v756_v49 = vrot.slane %v755_v23, 4 }
 0x6db   :  { %v767_v52 = vpop.xlane.xlu0 %766 }
 0x6dc   :  { %v757_v53 = vadd.f32 %v756_v49, %v755_v23  ;;  %v768_v57 = vrot.slane %v767_v52, 4 }
 0x6de   :  { %v769_v59 = vadd.f32 %v768_v57, %v767_v52  ;;  %v758_v60 = vrot.slane %v757_v53, 2 }
 0x6df   :  { %v1079_v62 = vpop.xlane.xlu1 %1078 }
 0x6e0   :  { %v759_v61 = vadd.f32 %v758_v60, %v757_v53  ;;  %v770_v1 = vrot.slane %v769_v59, 2  ;;  %v1080_v63 = vrot.slane %v1079_v62, 4 }
 0x6e1   :  { %v1091_v12 = vpop.xlane.xlu0 %1090 }
 0x6e2   :  { %v760_v2 = vrot.slane %v759_v61, 1  ;;  %v771_v4 = vadd.f32 %v770_v1, %v769_v59  ;;  %v1092_v13 = vrot.slane %v1091_v12, 4  ;;  %v1081_v8 = vadd.f32 %v1080_v63, %v1079_v62 }
 0x6e3   :  { %v5796_v30 = vpop.permute.xlu1 %795 }
 0x6e4   :  { %v761_v5 = vadd.f32 %v760_v2, %v759_v61  ;;  %v772_v10 = vrot.slane %v771_v4, 1  ;;  %v1093_v6 = vadd.f32 %v1092_v13, %v1091_v12  ;;  %v1082_v7 = vrot.slane %v1081_v8, 2 }
 0x6e6   :  { %4727 = vpush %v761_v5  ;;  %v773_v11 = vadd.f32 %v772_v10, %v771_v4  ;;  %v1094_v9 = vrot.slane %v1093_v6, 2  ;;  %v1083_v15 = vadd.f32 %v1082_v7, %v1081_v8 }
 0x6e7   :  { %v5798_v32 = vpop.permute.xlu1 %805 }
 0x6e8   :  { %4729 = vpush %v773_v11  ;;  %v1095_v16 = vadd.f32 %v1094_v9, %v1093_v6  ;;  %v1084_v20 = vrot.slane %v1083_v15, 1 }
 0x6e9   :  { %v5802_v51 = vpop.permute.xlu0 %799 }
 0x6ea   :  { %v1096_v21 = vrot.slane %v1095_v16, 1  ;;  %v1085_v27 = vadd.f32 %v1084_v20, %v1083_v15 }
 0x6eb   :  { %v5806_v26 = vpop.permute.xlu1 %809 }
 0x6ec   :  { %v1097_v28 = vadd.f32 %v1096_v21, %v1095_v16 }
 0x717   :  { %s4728_s30 = spop %4727 }
 0x718   :  { %s777_s5 = smul.f32 0.00048828125, %s4728_s30 }
 0x719   :  { %s4730_s6 = spop %4729 }
 0x71a   :  { %s781_s7 = smul.f32 %s777_s5, %s777_s5  ;;  %v784_v31 = vstv %s777_s5 }
 0x71b   :  { %s780_s8 = smul.f32 0.00048828125, %s4730_s6  ;;  %v785_v33 = vsub.f32 %v5771_v55, %v784_v31  ;;  %v786_v34 = vsub.f32 %v5768_v37, %v784_v31 }
 0x71d   :  { %s782_s9 = ssub.f32 %s780_s8, %s781_s7 }
 0x71f   :  { %s783_s10 = smax.f32 %s5540_s27, %s782_s9 }
 0x720   :  { %s787_s11 = sadd.f32 1e-05, %s783_s10 }
 0x722   :  { %v788_v14 = vstv %s787_s11 }
 0x723   :  { %5300 = vrsqrt.f32 %v788_v14 }
 0x72d   :  { %v5301_v25 = vpop.eup %5300 }
 0x72e   :  { %4731 = vpush %v5301_v25 }
 0x72f   :  { %4733 = vpush %v1085_v27 }
 0x730   :  { %4735 = vpush %v1097_v28 }
 0x75f   :  { %s4732_s12 = spop %4731 }
 0x760   :  { %v791_v24 = vstv %s4732_s12  ;;  %s4734_s1 = spop %4733 }
 0x761   :  { %v792_v38 = vmul.f32 %v791_v24, %v785_v33  ;;  %v793_v56 = vmul.f32 %v791_v24, %v786_v34  ;;  %s5804_s13 = smul.f32 0.00048828125, %s4734_s1  ;;  %s4736_s2 = spop %4735 }
 0x762   :  { %s1104_s14 = smul.f32 0.00048828125, %s4736_s2 }
 0x763   :  { %v802_v17 = vmul.f32 %v5796_v30, %v792_v38  ;;  %s1105_s19 = smul.f32 %s5804_s13, %s5804_s13  ;;  %v803_v37 = vmul.f32 %v5802_v51, %v793_v56 }
 0x765   :  { %s1106_s20 = ssub.f32 %s1104_s14, %s1105_s19  ;;  %v812_v55 = vadd.f32 %v5798_v32, %v802_v17  ;;  %v813_v39 = vadd.f32 %v5806_v26, %v803_v37 }
 0x767   :  { %s1107_s21 = smax.f32 %s5540_s27, %s1106_s20  ;;  %v816_v40 = vmul.f32 0.70710677, %v812_v55  ;;  %v817_v42 = vmul.f32 0.70710677, %v813_v39  ;;  %v814_v37 = vmul.f32 0.5, %v812_v55 }
 0x768   :  { %s1111_s22 = sadd.f32 1e-05, %s1107_s21 }
 0x769   :  { %v818_v44 = vand.u32 2147483647, %v816_v40  ;;  %v819_v45 = vand.u32 2147483647, %v817_v42  ;;  %vm858_vm12 = vcmp.ge.f32.partialorder %v816_v40, 0.0  ;;  %vm859_vm13 = vcmp.ge.f32.partialorder %v817_v42, 0.0 }
 0x76a   :  { %v1112_v46 = vstv %s1111_s22  ;;  %v1108_v40 = vstv %s5804_s13 }
 0x76b   :  { %5302 = vrsqrt.f32 %v1112_v46  ;;  %v820_v47 = vmul.f32 0.3275911, %v818_v44  ;;  %v821_v48 = vmul.f32 0.3275911, %v819_v45  ;;  %v846_v52 = vsub.f32 0.0, %v818_v44 }
 0x76c   :  { %v847_v53 = vsub.f32 0.0, %v819_v45  ;;  %v815_v46 = vmul.f32 0.5, %v813_v39  ;;  %v1109_v42 = vsub.f32 %v5783_v43, %v1108_v40  ;;  %v1110_v55 = vsub.f32 %v5780_v41, %v1108_v40 }
 0x76d   :  { %v822_v22 = vadd.f32 1.0, %v820_v47  ;;  %v823_v23 = vadd.f32 1.0, %v821_v48  ;;  %v848_v59 = vmul.f32 %v846_v52, %v818_v44 }
 0x76e   :  { %v849_v61 = vmul.f32 %v847_v53, %v819_v45 }
 0x76f   :  { %5304 = vrcp.f32 %v822_v22  ;;  %v850_v5 = vmul.f32 1.442695, %v848_v59 }
 0x770   :  { %5306 = vrcp.f32 %v823_v23  ;;  %v852_v11 = vmul.f32 1.442695, %v849_v61 }
 0x771   :  { %5308 = vpow2.f32 %v850_v5 }
 0x772   :  { %5310 = vpow2.f32 %v852_v11 }
 0x775   :  { %v5303_v49 = vpop.eup %5302 }
 0x776   :  { %4737 = vpush %v5303_v49 }
 0x779   :  { %v5305_v57 = vpop.eup %5304 }
 0x77a   :  { %v5307_v60 = vpop.eup %5306  ;;  %v828_v1 = vmul.f32 1.0614054, %v5305_v57 }
 0x77b   :  { %v829_v2 = vmul.f32 1.0614054, %v5307_v60  ;;  %v5309_v25 = vpop.eup %5308 }
 0x77c   :  { %v830_v4 = vadd.f32 -1.4531521, %v828_v1  ;;  %v5311_v28 = vpop.eup %5310 }
 0x77d   :  { %v831_v10 = vadd.f32 -1.4531521, %v829_v2 }
 0x77e   :  { %v832_v62 = vmul.f32 %v5305_v57, %v830_v4 }
 0x77f   :  { %v833_v12 = vmul.f32 %v5307_v60, %v831_v10 }
 0x780   :  { %v834_v63 = vadd.f32 1.4214138, %v832_v62 }
 0x781   :  { %v835_v13 = vadd.f32 1.4214138, %v833_v12 }
 0x782   :  { %v836_v8 = vmul.f32 %v5305_v57, %v834_v63 }
 0x783   :  { %v837_v6 = vmul.f32 %v5307_v60, %v835_v13 }
 0x784   :  { %v838_v7 = vadd.f32 -0.28449672, %v836_v8 }
 0x785   :  { %v839_v9 = vadd.f32 -0.28449672, %v837_v6 }
 0x786   :  { %v840_v14 = vmul.f32 %v5305_v57, %v838_v7 }
 0x787   :  { %v841_v15 = vmul.f32 %v5307_v60, %v839_v9 }
 0x788   :  { %v842_v16 = vadd.f32 0.2548296, %v840_v14 }
 0x789   :  { %v843_v20 = vadd.f32 0.2548296, %v841_v15 }
 0x78a   :  { %v844_v21 = vmul.f32 %v5305_v57, %v842_v16 }
 0x78b   :  { %v845_v27 = vmul.f32 %v5307_v60, %v843_v20 }
 0x78c   :  { %v854_v31 = vmul.f32 %v5309_v25, %v844_v21 }
 0x78d   :  { %v855_v33 = vmul.f32 %v5311_v28, %v845_v27 }
 0x78e   :  { %v856_v34 = vsub.f32 1.0, %v854_v31 }
 0x78f   :  { %v857_v24 = vsub.f32 1.0, %v855_v33 }
 0x790   :  { %v860_v38 = vsub.f32 0.0, %v856_v34 }
 0x791   :  { %v861_v56 = vsub.f32 0.0, %v857_v24 }
 0x792   :  { %v862_v17 = vsel %vm858_vm12, %v856_v34, %v860_v38 }
 0x793   :  { %v863_v44 = vsel %vm859_vm13, %v857_v24, %v861_v56  ;;  %v864_v45 = vadd.f32 1.0, %v862_v17 }
 0x794   :  { %v865_v47 = vadd.f32 1.0, %v863_v44 }
 0x795   :  { %v866_v48 = vmul.f32 %v864_v45, %v814_v37 }
 0x796   :  { %v867_v22 = vmul.f32 %v865_v47, %v815_v46 }
 0x797   :  { %v5816_v23 = vadd.f32 %v866_v48, %v5675_v19 }
 0x798   :  { %v5819_v49 = vadd.f32 %v5673_v18, %v867_v22 }
 0x79a   :  { %1476 = vrot.lane.b32.xlu0 %v5819_v49, %s5532_s3 }
 0x7a7   :  { %s4738_s23 = spop %4737 }
 0x7a8   :  { %v1115_v52 = vstv %s4738_s23 }
 0x7a9   :  { %v1116_v39 = vmul.f32 %v1115_v52, %v1109_v42  ;;  %v1117_v53 = vmul.f32 %v1115_v52, %v1110_v55 }
 0x7ab   :  { %v1118_v57 = vmul.f32 %v1116_v39, %v5695_v0  ;;  %v1119_v19 = vmul.f32 %v1117_v53, %v5691_v54 }
 0x7ad   :  { %v1120_v59 = vadd.f32 %v1118_v57, %v5693_v58  ;;  %v1121_v18 = vadd.f32 %v1119_v19, %v5697_v3 }
 0x7af   :  { %v1124_v60 = vmul.f32 0.70710677, %v1120_v59  ;;  %v1125_v61 = vmul.f32 0.70710677, %v1121_v18  ;;  %v1122_v22 = vmul.f32 0.5, %v1120_v59  ;;  %v1123_v39 = vmul.f32 0.5, %v1121_v18 }
 0x7b1   :  { %v1126_v1 = vand.u32 2147483647, %v1124_v60  ;;  %v1127_v2 = vand.u32 2147483647, %v1125_v61  ;;  %vm1166_vm14 = vcmp.ge.f32.partialorder %v1124_v60, 0.0  ;;  %vm1167_vm15 = vcmp.ge.f32.partialorder %v1125_v61, 0.0 }
 0x7b3   :  { %v1128_v4 = vmul.f32 0.3275911, %v1126_v1  ;;  %v1129_v43 = vmul.f32 0.3275911, %v1127_v2  ;;  %v1154_v10 = vsub.f32 0.0, %v1126_v1  ;;  %v1155_v11 = vsub.f32 0.0, %v1127_v2 }
 0x7b5   :  { %v1130_v5 = vadd.f32 1.0, %v1128_v4  ;;  %v1131_v41 = vadd.f32 1.0, %v1129_v43  ;;  %v1156_v0 = vmul.f32 %v1154_v10, %v1126_v1  ;;  %v1157_v54 = vmul.f32 %v1155_v11, %v1127_v2 }
 0x7b7   :  { %5312 = vrcp.f32 %v1130_v5  ;;  %v1158_v3 = vmul.f32 1.442695, %v1156_v0  ;;  %v1160_v6 = vmul.f32 1.442695, %v1157_v54 }
 0x7b8   :  { %5314 = vrcp.f32 %v1131_v41 }
 0x7b9   :  { %5316 = vpow2.f32 %v1158_v3 }
 0x7ba   :  { %5318 = vpow2.f32 %v1160_v6 }
 0x7c1   :  { %v5313_v62 = vpop.eup %5312 }
 0x7c2   :  { %v5315_v12 = vpop.eup %5314  ;;  %v1136_v63 = vmul.f32 1.0614054, %v5313_v62 }
 0x7c3   :  { %v1137_v58 = vmul.f32 1.0614054, %v5315_v12  ;;  %v5317_v24 = vpop.eup %5316 }
 0x7c4   :  { %v1138_v13 = vadd.f32 -1.4531521, %v1136_v63  ;;  %v5319_v56 = vpop.eup %5318  ;;  %v5855_v63 = vld [vmem:[#allocation9 + $0x18] sm:$0xff] }
 0x7c5   :  { %v1139_v8 = vadd.f32 -1.4531521, %v1137_v58  ;;  %4299 = vmatprep.mubr.msk.f32.mxu0 %vm671_vm11, %v5855_v63  ;;  %v5861_v58 = vpop.f32.mrb[6].mxu1 }
 0x7c6   :  { %v1140_v7 = vmul.f32 %v5313_v62, %v1138_v13  ;;  %v5863_v13 = vpop.f32.mrb[7].mxu1 }
 0x7c7   :  { %v1141_v9 = vmul.f32 %v5315_v12, %v1139_v8 }
 0x7c8   :  { %v1142_v14 = vadd.f32 1.4214138, %v1140_v7 }
 0x7c9   :  { %v1143_v15 = vadd.f32 1.4214138, %v1141_v9 }
 0x7ca   :  { %v1144_v16 = vmul.f32 %v5313_v62, %v1142_v14 }
 0x7cb   :  { %v1145_v20 = vmul.f32 %v5315_v12, %v1143_v15 }
 0x7cc   :  { %v1146_v21 = vadd.f32 -0.28449672, %v1144_v16 }
 0x7cd   :  { %v1147_v25 = vadd.f32 -0.28449672, %v1145_v20 }
 0x7ce   :  { %v1148_v27 = vmul.f32 %v5313_v62, %v1146_v21 }
 0x7cf   :  { %v1149_v28 = vmul.f32 %v5315_v12, %v1147_v25 }
 0x7d0   :  { %v1150_v31 = vadd.f32 0.2548296, %v1148_v27 }
 0x7d1   :  { %v1151_v33 = vadd.f32 0.2548296, %v1149_v28 }
 0x7d2   :  { %v1152_v34 = vmul.f32 %v5313_v62, %v1150_v31 }
 0x7d3   :  { %v1153_v38 = vmul.f32 %v5315_v12, %v1151_v33 }
 0x7d4   :  { %v1162_v17 = vmul.f32 %v5317_v24, %v1152_v34 }
 0x7d5   :  { %v1163_v37 = vmul.f32 %v5319_v56, %v1153_v38 }
 0x7d6   :  { %v1164_v44 = vsub.f32 1.0, %v1162_v17 }
 0x7d7   :  { %v1165_v45 = vsub.f32 1.0, %v1163_v37 }
 0x7d8   :  { %v1168_v46 = vsub.f32 0.0, %v1164_v44 }
 0x7d9   :  { %v1169_v47 = vsub.f32 0.0, %v1165_v45 }
 0x7da   :  { %v1170_v48 = vsel %vm1166_vm14, %v1164_v44, %v1168_v46 }
 0x7db   :  { %v1172_v40 = vadd.f32 1.0, %v1170_v48  ;;  %v1171_v42 = vsel %vm1167_vm15, %v1165_v45, %v1169_v47  ;;  %vm5551_vm15 = vmmov 0  }
 0x7dc   :  { %v1173_v52 = vadd.f32 1.0, %v1171_v42 }
 0x7dd   :  { %v1174_v55 = vmul.f32 %v1172_v40, %v1122_v22 }
 0x7de   :  { %v1175_v53 = vmul.f32 %v1173_v52, %v1123_v39 }
 0x7df   :  { %1178 = vrot.lane.b32.xlu1 %v1174_v55, %s5532_s3 }
 0x7e3   :  { %1180 = vrot.lane.b32.xlu1 %v1175_v53, %s5532_s3 }
 0x7e7   :  { %1474 = vrot.lane.b32.xlu1 %v5816_v23, %s5532_s3 }
 0x80c   :  { %v1477_v1 = vpop.permute.xlu0 %1476 }
 0x851   :  { %v1179_v57 = vpop.permute.xlu1 %1178 }
 0x852   :  { %1184 = vst.msk [vmem:[#allocation2] sm:$0xff] %vm283_vm1, %v1179_v57 }
 0x853   :  { %1185 = vst.msk [vmem:[#allocation2 + $0x8] sm:$0xff] %vm285_vm2, %v1179_v57 }
 0x855   :  { %v1181_v19 = vpop.permute.xlu1 %1180 }
 0x856   :  { %1186 = vst.msk [vmem:[#allocation2 + $0x10] sm:$0xff] %vm283_vm1, %v1181_v19 }
 0x857   :  { %1187 = vst.msk [vmem:[#allocation2 + $0x18] sm:$0xff] %vm285_vm2, %v1181_v19 }
 0x859   :  { %v1475_v59 = vpop.permute.xlu1 %1474  ;;  %v1192_v60 = vld [vmem:[#allocation2] sm:$0xff] }
 0x85a   :  { %v1193_v61 = vld [vmem:[#allocation2 + $0x8] sm:$0xff]  ;;  %1480 = vst.msk [vmem:[#allocation2] sm:$0xff] %vm283_vm1, %v1475_v59 }
 0x85b   :  { %v4911_v18 = vpack.i.bf16 %v1193_v61, %v1192_v60  ;;  %1481 = vst.msk [vmem:[#allocation2 + $0x8] sm:$0xff] %vm285_vm2, %v1475_v59 }
 0x85d   :  { %4912 = vrot.lane.b32.xlu1 %v4911_v18, %s5534_s16  ;;  %v1216_v2 = vld [vmem:[#allocation2 + $0x10] sm:$0xff] }
 0x85e   :  { %v1217_v4 = vld [vmem:[#allocation2 + $0x18] sm:$0xff]  ;;  %v4545_v5 = vpack.c.bf16 %v1216_v2, %v1192_v60  ;;  %1482 = vst.msk [vmem:[#allocation2 + $0x10] sm:$0xff] %vm283_vm1, %v1477_v1 }
 0x85f   :  { %v4926_v43 = vpack.i.bf16 %v1217_v4, %v1216_v2  ;;  %1483 = vst.msk [vmem:[#allocation2 + $0x18] sm:$0xff] %vm285_vm2, %v1477_v1 }
 0x860   :  { %4546 = vmatprep.subr.bf16.mxu1 %v4545_v5 }
 0x861   :  { %4927 = vrot.lane.b32.xlu0 %v4926_v43, %s5533_s15  ;;  %4917 = vrot.lane.b32.xlu1 %v4926_v43, %s5534_s16  ;;  %v1484_v41 = vld [vmem:[#allocation2] sm:$0xff] }
 0x862   :  { %4548 = vmatpush3.bf16.msra.mxu1 %v4545_v5  ;;  %v1489_v12 = vld [vmem:[#allocation2 + $0x8] sm:$0xff] }
 0x863   :  { %v4951_v54 = vpack.i.bf16 %v1489_v12, %v1484_v41 }
 0x865   :  { %4937 = vrot.lane.b32.xlu0 %v4926_v43, %s5536_s17  ;;  %4922 = vrot.lane.b32.xlu1 %v4911_v18, %s5533_s15  ;;  %v1485_v10 = vld [vmem:[#allocation2 + $0x10] sm:$0xff] }
 0x866   :  { %v4565_v11 = vpack.c.bf16 %v1485_v10, %v1484_v41  ;;  %v1491_v62 = vld [vmem:[#allocation2 + $0x18] sm:$0xff] }
 0x867   :  { %v4956_v0 = vpack.i.bf16 %v1491_v62, %v1485_v10 }
 0x868   :  { %4566 = vmatprep.subr.bf16.mxu0 %v4565_v11 }
 0x869   :  { %4947 = vrot.lane.b32.xlu0 %v4926_v43, %s5537_s18  ;;  %4932 = vrot.lane.b32.xlu1 %v4911_v18, %s5536_s17 }
 0x86a   :  { %4568 = vmatpush3.bf16.msra.mxu0 %v4565_v11 }
 0x86d   :  { %4942 = vrot.lane.b32.xlu1 %v4911_v18, %s5537_s18  ;;  %4957 = vrot.lane.b32.xlu0 %v4956_v0, %s5534_s16 }
 0x871   :  { %4967 = vrot.lane.b32.xlu0 %v4956_v0, %s5533_s15  ;;  %4952 = vrot.lane.b32.xlu1 %v4951_v54, %s5534_s16 }
 0x875   :  { %4977 = vrot.lane.b32.xlu0 %v4956_v0, %s5536_s17  ;;  %4962 = vrot.lane.b32.xlu1 %v4951_v54, %s5533_s15 }
 0x879   :  { %4987 = vrot.lane.b32.xlu0 %v4956_v0, %s5537_s18  ;;  %4972 = vrot.lane.b32.xlu1 %v4951_v54, %s5536_s17 }
 0x87d   :  { %4982 = vrot.lane.b32.xlu1 %v4951_v54, %s5537_s18 }
 0x8cf   :  { %v4913_v3 = vpop.permute.xlu1 %4912 }
 0x8d0   :  { %v4915_v8 = vunpack.i.h.bf16 %v4913_v3  ;;  %v4914_v6 = vunpack.i.l.bf16 %v4913_v3 }
 0x8d2   :  { %v1208_v21 = vsel %vm297_vm5, %v4914_v6, %v4915_v8 }
 0x8d3   :  { %v4928_v7 = vpop.permute.xlu0 %4927  ;;  %v4918_v9 = vpop.permute.xlu1 %4917 }
 0x8d4   :  { %v4920_v14 = vunpack.i.h.bf16 %v4918_v9  ;;  %v4919_v15 = vunpack.i.l.bf16 %v4918_v9  ;;  %v4930_v16 = vunpack.i.h.bf16 %v4928_v7  ;;  %v4929_v20 = vunpack.i.l.bf16 %v4928_v7 }
 0x8d6   :  { %v1209_v25 = vsel %vm297_vm5, %v4919_v15, %v4920_v14  ;;  %v1231_v17 = vsel %vm309_vm6, %v4929_v20, %v4930_v16 }
 0x8d7   :  { %v4938_v27 = vpop.permute.xlu0 %4937  ;;  %v4923_v28 = vpop.permute.xlu1 %4922  ;;  %v4549_v31 = vpack.c.bf16 %v1209_v25, %v1208_v21 }
 0x8d8   :  { %v4925_v33 = vunpack.i.h.bf16 %v4923_v28  ;;  %v4924_v34 = vunpack.i.l.bf16 %v4923_v28  ;;  %v4940_v24 = vunpack.i.h.bf16 %v4938_v27  ;;  %v4939_v38 = vunpack.i.l.bf16 %v4938_v27 }
 0x8d9   :  { %4550 = vmatprep.subr.bf16.mxu1 %v4549_v31 }
 0x8da   :  { %4552 = vmatpush3.bf16.msra.mxu1 %v4549_v31  ;;  %v1230_v56 = vsel %vm309_vm6, %v4924_v34, %v4925_v33  ;;  %v1253_v42 = vsel %vm321_vm7, %v4939_v38, %v4940_v24 }
 0x8db   :  { %v4948_v37 = vpop.permute.xlu0 %4947  ;;  %v4933_v44 = vpop.permute.xlu1 %4932  ;;  %v4553_v45 = vpack.c.bf16 %v1231_v17, %v1230_v56 }
 0x8dc   :  { %v4935_v46 = vunpack.i.h.bf16 %v4933_v44  ;;  %v4934_v47 = vunpack.i.l.bf16 %v4933_v44  ;;  %v4950_v48 = vunpack.i.h.bf16 %v4948_v37  ;;  %v4949_v22 = vunpack.i.l.bf16 %v4948_v37  ;;  %v5884_v37 = vld [vmem:[#allocation9 + $0x58] sm:$0xff] }
 0x8dd   :  { %4554 = vmatprep.subr.bf16.mxu1 %v4553_v45  ;;  %v5544_v44 = vmov 6  }
 0x8de   :  { %4556 = vmatpush3.bf16.msra.mxu1 %v4553_v45  ;;  %v1252_v40 = vsel %vm321_vm7, %v4934_v47, %v4935_v46  ;;  %v1275_v61 = vsel %vm333_vm8, %v4949_v22, %v4950_v48  ;;  %4992 = vset.pattern.permute.xlu1 %v5544_v44 }
 0x8df   :  { %v4958_v55 = vpop.permute.xlu0 %4957  ;;  %v4943_v52 = vpop.permute.xlu1 %4942  ;;  %v4557_v39 = vpack.c.bf16 %v1253_v42, %v1252_v40  ;;  %4991 = vset.pattern.permute.xlu0 %v5544_v44 }
 0x8e0   :  { %v4945_v53 = vunpack.i.h.bf16 %v4943_v52  ;;  %v4944_v57 = vunpack.i.l.bf16 %v4943_v52  ;;  %v4960_v19 = vunpack.i.h.bf16 %v4958_v55  ;;  %v4959_v59 = vunpack.i.l.bf16 %v4958_v55 }
 0x8e1   :  { %4558 = vmatprep.subr.bf16.mxu1 %v4557_v39 }
 0x8e2   :  { %4560 = vmatpush3.bf16.msra.mxu1 %v4557_v39  ;;  %v1274_v60 = vsel %vm333_vm8, %v4944_v57, %v4945_v53  ;;  %v1505_v11 = vsel %vm297_vm5, %v4959_v59, %v4960_v19  ;;  %v5900_v39 = vld [vmem:[#allocation10] sm:$0xff] }
 0x8e3   :  { %v4968_v18 = vpop.permute.xlu0 %4967  ;;  %v4953_v1 = vpop.permute.xlu1 %4952  ;;  %v4561_v2 = vpack.c.bf16 %v1275_v61, %v1274_v60 }
 0x8e4   :  { %v4955_v4 = vunpack.i.h.bf16 %v4953_v1  ;;  %v4954_v43 = vunpack.i.l.bf16 %v4953_v1  ;;  %v4970_v5 = vunpack.i.h.bf16 %v4968_v18  ;;  %v4969_v41 = vunpack.i.l.bf16 %v4968_v18 }
 0x8e5   :  { %4562 = vmatprep.subr.bf16.mxu1 %v4561_v2 }
 0x8e6   :  { %4564 = vmatpush3.bf16.msra.mxu1 %v4561_v2  ;;  %v1504_v10 = vsel %vm297_vm5, %v4954_v43, %v4955_v4  ;;  %v1527_v9 = vsel %vm309_vm6, %v4969_v41, %v4970_v5 }
 0x8e7   :  { %v4978_v62 = vpop.permute.xlu0 %4977  ;;  %v4963_v0 = vpop.permute.xlu1 %4962  ;;  %v4569_v12 = vpack.c.bf16 %v1505_v11, %v1504_v10 }
 0x8e8   :  { %v4965_v54 = vunpack.i.h.bf16 %v4963_v0  ;;  %v4964_v3 = vunpack.i.l.bf16 %v4963_v0  ;;  %v4980_v8 = vunpack.i.h.bf16 %v4978_v62  ;;  %v4979_v6 = vunpack.i.l.bf16 %v4978_v62 }
 0x8e9   :  { %4277 = vmatmul.mubr.msk.f32.vlgmr.msra.gmra.mrb[8].mxu1 %vm671_vm11, %v5746_v29  ;;  %4570 = vmatprep.subr.bf16.mxu0 %v4569_v12 }
 0x8ea   :  { %4572 = vmatpush3.bf16.msra.mxu0 %v4569_v12  ;;  %v1526_v7 = vsel %vm309_vm6, %v4964_v3, %v4965_v54  ;;  %v1549_v29 = vsel %vm321_vm7, %v4979_v6, %v4980_v8  ;;  %v5545_v6 = vmov 7  }
 0x8eb   :  { %v4988_v14 = vpop.permute.xlu0 %4987  ;;  %v4973_v15 = vpop.permute.xlu1 %4972  ;;  %v4573_v16 = vpack.c.bf16 %v1527_v9, %v1526_v7  ;;  %v5546_v7 = vmov 8  }
 0x8ec   :  { %v4975_v20 = vunpack.i.h.bf16 %v4973_v15  ;;  %v4974_v21 = vunpack.i.l.bf16 %v4973_v15  ;;  %v4990_v25 = vunpack.i.h.bf16 %v4988_v14  ;;  %v4989_v27 = vunpack.i.l.bf16 %v4988_v14 }
 0x8ed   :  { %4574 = vmatprep.subr.bf16.mxu0 %v4573_v16 }
 0x8ee   :  { %4576 = vmatpush3.bf16.msra.mxu0 %v4573_v16  ;;  %v1548_v28 = vsel %vm321_vm7, %v4974_v21, %v4975_v20  ;;  %v1571_v56 = vsel %vm333_vm8, %v4989_v27, %v4990_v25 }
 0x8ef   :  { %v4983_v31 = vpop.permute.xlu1 %4982  ;;  %v4577_v33 = vpack.c.bf16 %v1549_v29, %v1548_v28 }
 0x8f0   :  { %v4985_v34 = vunpack.i.h.bf16 %v4983_v31  ;;  %v4984_v24 = vunpack.i.l.bf16 %v4983_v31 }
 0x8f1   :  { %4578 = vmatprep.subr.bf16.mxu0 %v4577_v33 }
 0x8f2   :  { %4580 = vmatpush3.bf16.msra.mxu0 %v4577_v33  ;;  %v1570_v38 = vsel %vm333_vm8, %v4984_v24, %v4985_v34 }
 0x8f3   :  { %v4581_v17 = vpack.c.bf16 %v1571_v56, %v1570_v38 }
 0x8f5   :  { %4582 = vmatprep.subr.bf16.mxu0 %v4581_v17 }
 0x8f6   :  { %4584 = vmatpush3.bf16.msra.mxu0 %v4581_v17 }
 0x8f9   :  { %4300 = vmatmul.mubr.msk.f32.vlgmr.msra.gmra.mrb[6].mxu0 %vm671_vm11, %v5884_v37 }
 0x8fa   :  { %4345 = vmatprep.mubr.msk.f32.mxu0 %vm671_vm11, %v5855_v63  ;;  %v5897_v63 = vld [vmem:[#allocation10 + $0x8] sm:$0xff] }
 0x9bc   :  { %v4278_v45 = vpop.f32.mrb[8].mxu1 }
 0x9bd   :  { %v5891_v46 = vadd.f32 %v4278_v45, %v5763_v35  ;;  %v1356_v47 = vpop.f32.mrb[9].mxu1 }
 0x9be   :  { %v1357_v48 = vadd.f32 %v1356_v47, %v5765_v36 }
 0x9bf   :  { %v1376_v22 = vmul.f32 %v5891_v46, %v5891_v46 }
 0x9c0   :  { %v1365_v40 = vadd.f32 %v5891_v46, %v1357_v48  ;;  %v1375_v42 = vmul.f32 %v1357_v48, %v1357_v48 }
 0x9c2   :  { %1366 = vadd.xlane.f32.xlu1 %v1365_v40  ;;  %v1377_v55 = vadd.f32 %v1376_v22, %v1375_v42 }
 0x9c4   :  { %1378 = vadd.xlane.f32.xlu0 %v1377_v55 }
 0x9cc   :  { %v4301_v52 = vpop.f32.mrb[6].mxu0 }
 0x9cd   :  { %v1668_v35 = vpop.f32.mrb[7].mxu0 }
 0x9d3   :  { %1593 = vperm.xlu1 %4992, %v5897_v63  }
 0x9d7   :  { %4993 = vset.pattern.permute.xlu1 %v5545_v6 }
 0x9da   :  { %1588 = vperm.xlu0 %4991, %v5900_v39  }
 0x9de   :  { %4994 = vset.pattern.permute.xlu0 %v5546_v7 }
 0xa4f   :  { %v1367_v36 = vpop.xlane.xlu1 %1366 }
 0xa50   :  { %v1368_v53 = vrot.slane %v1367_v36, 4 }
 0xa51   :  { %v1379_v57 = vpop.xlane.xlu0 %1378 }
 0xa52   :  { %v1369_v19 = vadd.f32 %v1368_v53, %v1367_v36  ;;  %v1380_v59 = vrot.slane %v1379_v57, 4 }
 0xa53   :  { %v5903_v60 = vpop.permute.xlu1 %1593 }
 0xa54   :  { %v1381_v61 = vadd.f32 %v1380_v59, %v1379_v57  ;;  %v1370_v18 = vrot.slane %v1369_v19, 2  ;;  %v5906_v2 = vadd.f32 %v4301_v52, %v5903_v60 }
 0xa56   :  { %v1382_v1 = vrot.slane %v1381_v61, 2  ;;  %v1371_v4 = vadd.f32 %v1370_v18, %v1369_v19  ;;  %v1688_v0 = vmul.f32 %v5906_v2, %v5906_v2 }
 0xa58   :  { %v1372_v43 = vrot.slane %v1371_v4, 1  ;;  %v1383_v5 = vadd.f32 %v1382_v1, %v1381_v61 }
 0xa59   :  { %v5908_v41 = vpop.permute.xlu0 %1588 }
 0xa5a   :  { %v5911_v10 = vadd.f32 %v1668_v35, %v5908_v41  ;;  %v1373_v11 = vadd.f32 %v1372_v43, %v1371_v4  ;;  %v1384_v62 = vrot.slane %v1383_v5, 1 }
 0xa5c   :  { %4739 = vpush %v1373_v11  ;;  %v1385_v12 = vadd.f32 %v1384_v62, %v1383_v5  ;;  %v1677_v54 = vadd.f32 %v5906_v2, %v5911_v10  ;;  %v1687_v3 = vmul.f32 %v5911_v10, %v5911_v10 }
 0xa5e   :  { %4741 = vpush %v1385_v12  ;;  %1678 = vadd.xlane.f32.xlu1 %v1677_v54  ;;  %v1689_v8 = vadd.f32 %v1688_v0, %v1687_v3 }
 0xa60   :  { %1690 = vadd.xlane.f32.xlu0 %v1689_v8 }
 0xa6f   :  { %1719 = vperm.xlu1 %4993, %v5900_v39  }
 0xa73   :  { %1723 = vperm.xlu1 %4993, %v5897_v63  }
 0xa76   :  { %1729 = vperm.xlu0 %4994, %v5900_v39  }
 0xa77   :  { %4995 = vset.pattern.permute.xlu1 %v5546_v7 }
 0xa78   :  { %1733 = vperm.xlu1 %4995, %v5897_v63  }
 0xa8d   :  { %s4740_s24 = spop %4739 }
 0xa8e   :  { %s1389_s0 = smul.f32 0.00048828125, %s4740_s24 }
 0xa8f   :  { %s4742_s28 = spop %4741 }
 0xa90   :  { %s1393_s29 = smul.f32 %s1389_s0, %s1389_s0  ;;  %v1396_v15 = vstv %s1389_s0 }
 0xa91   :  { %s1392_s30 = smul.f32 0.00048828125, %s4742_s28  ;;  %v1397_v16 = vsub.f32 %v1357_v48, %v1396_v15  ;;  %v1398_v20 = vsub.f32 %v5891_v46, %v1396_v15 }
 0xa93   :  { %s1394_s5 = ssub.f32 %s1392_s30, %s1393_s29 }
 0xa95   :  { %s1395_s6 = smax.f32 %s5540_s27, %s1394_s5 }
 0xa96   :  { %s1399_s7 = sadd.f32 1e-05, %s1395_s6 }
 0xa98   :  { %v1400_v9 = vstv %s1399_s7 }
 0xa99   :  { %5320 = vrsqrt.f32 %v1400_v9 }
 0xaa3   :  { %v5321_v14 = vpop.eup %5320 }
 0xaa4   :  { %4743 = vpush %v5321_v14 }
 0xad5   :  { %s4744_s8 = spop %4743 }
 0xad6   :  { %v1403_v21 = vstv %s4744_s8 }
 0xad7   :  { %v1404_v25 = vmul.f32 %v1403_v21, %v1397_v16  ;;  %v1405_v27 = vmul.f32 %v1403_v21, %v1398_v20 }
 0xad9   :  { %v1406_v28 = vmul.f32 %v1404_v25, %v5796_v30  ;;  %v1407_v29 = vmul.f32 %v1405_v27, %v5802_v51 }
 0xadb   :  { %v5928_v31 = vadd.f32 %v1406_v28, %v5798_v32  ;;  %v5931_v33 = vadd.f32 %v1407_v29, %v5806_v26 }
 0xadd   :  { %v5934_v34 = vmul.f32 0.70710677, %v5928_v31  ;;  %v5937_v24 = vmul.f32 0.70710677, %v5931_v33 }
 0xadf   :  { %v1414_v38 = vand.u32 2147483647, %v5934_v34  ;;  %v1415_v56 = vand.u32 2147483647, %v5937_v24  ;;  %vm1454_vm0 = vcmp.ge.f32.partialorder %v5934_v34, 0.0  ;;  %vm1455_vm3 = vcmp.ge.f32.partialorder %v5937_v24, 0.0 }
 0xae1   :  { %v1416_v17 = vmul.f32 0.3275911, %v1414_v38  ;;  %v1417_v30 = vmul.f32 0.3275911, %v1415_v56  ;;  %v1442_v32 = vsub.f32 0.0, %v1414_v38  ;;  %v1443_v26 = vsub.f32 0.0, %v1415_v56 }
 0xae3   :  { %v1418_v44 = vadd.f32 1.0, %v1416_v17  ;;  %v1419_v51 = vadd.f32 1.0, %v1417_v30  ;;  %v1444_v42 = vmul.f32 %v1442_v32, %v1414_v38  ;;  %v1445_v52 = vmul.f32 %v1443_v26, %v1415_v56 }
 0xae5   :  { %5322 = vrcp.f32 %v1418_v44  ;;  %v1446_v18 = vmul.f32 1.442695, %v1444_v42  ;;  %v1448_v4 = vmul.f32 1.442695, %v1445_v52 }
 0xae6   :  { %5324 = vrcp.f32 %v1419_v51 }
 0xae7   :  { %5326 = vpow2.f32 %v1446_v18 }
 0xae8   :  { %5328 = vpow2.f32 %v1448_v4 }
 0xaeb   :  { %v1679_v45 = vpop.xlane.xlu1 %1678 }
 0xaec   :  { %v1680_v46 = vrot.slane %v1679_v45, 4 }
 0xaed   :  { %v1691_v47 = vpop.xlane.xlu0 %1690 }
 0xaee   :  { %v1681_v48 = vadd.f32 %v1680_v46, %v1679_v45  ;;  %v1692_v22 = vrot.slane %v1691_v47, 4  ;;  %v1410_v45 = vmul.f32 0.5, %v5928_v31 }
 0xaef   :  { %v5323_v40 = vpop.eup %5322  ;;  %v5952_v34 = vpop.permute.xlu1 %1719 }
 0xaf0   :  { %v5325_v55 = vpop.eup %5324  ;;  %v1693_v35 = vadd.f32 %v1692_v22, %v1691_v47  ;;  %v1682_v36 = vrot.slane %v1681_v48, 2  ;;  %v1424_v53 = vmul.f32 1.0614054, %v5323_v40  ;;  %v1411_v47 = vmul.f32 0.5, %v5931_v33 }
 0xaf1   :  { %v1425_v57 = vmul.f32 1.0614054, %v5325_v55  ;;  %v5327_v27 = vpop.eup %5326 }
 0xaf2   :  { %v1694_v19 = vrot.slane %v1693_v35, 2  ;;  %v1683_v59 = vadd.f32 %v1682_v36, %v1681_v48  ;;  %v1426_v61 = vadd.f32 -1.4531521, %v1424_v53  ;;  %v5329_v29 = vpop.eup %5328 }
 0xaf3   :  { %v1427_v1 = vadd.f32 -1.4531521, %v1425_v57  ;;  %v5954_v24 = vpop.permute.xlu1 %1723 }
 0xaf4   :  { %v1684_v43 = vrot.slane %v1683_v59, 1  ;;  %v1695_v5 = vadd.f32 %v1694_v19, %v1693_v35  ;;  %v1428_v11 = vmul.f32 %v5323_v40, %v1426_v61 }
 0xaf5   :  { %v1429_v62 = vmul.f32 %v5325_v55, %v1427_v1  ;;  %v5958_v57 = vpop.permute.xlu0 %1729 }
 0xaf6   :  { %v1685_v0 = vadd.f32 %v1684_v43, %v1683_v59  ;;  %v1696_v12 = vrot.slane %v1695_v5, 1  ;;  %v1430_v54 = vadd.f32 1.4214138, %v1428_v11 }
 0xaf7   :  { %v1431_v3 = vadd.f32 1.4214138, %v1429_v62  ;;  %v5960_v19 = vpop.permute.xlu1 %1733 }
 0xaf8   :  { %4745 = vpush %v1685_v0  ;;  %v1697_v8 = vadd.f32 %v1696_v12, %v1695_v5  ;;  %v1432_v6 = vmul.f32 %v5323_v40, %v1430_v54 }
 0xaf9   :  { %v1433_v7 = vmul.f32 %v5325_v55, %v1431_v3 }
 0xafa   :  { %4747 = vpush %v1697_v8  ;;  %v1434_v9 = vadd.f32 -0.28449672, %v1432_v6 }
 0xafb   :  { %v1435_v14 = vadd.f32 -0.28449672, %v1433_v7 }
 0xafc   :  { %v1436_v15 = vmul.f32 %v5323_v40, %v1434_v9 }
 0xafd   :  { %v1437_v16 = vmul.f32 %v5325_v55, %v1435_v14 }
 0xafe   :  { %v1438_v20 = vadd.f32 0.2548296, %v1436_v15 }
 0xaff   :  { %v1439_v21 = vadd.f32 0.2548296, %v1437_v16 }
 0xb00   :  { %v1440_v25 = vmul.f32 %v5323_v40, %v1438_v20 }
 0xb01   :  { %v1441_v28 = vmul.f32 %v5325_v55, %v1439_v21 }
 0xb02   :  { %v1450_v38 = vmul.f32 %v5327_v27, %v1440_v25 }
 0xb03   :  { %v1451_v56 = vmul.f32 %v5329_v29, %v1441_v28 }
 0xb04   :  { %v1452_v17 = vsub.f32 1.0, %v1450_v38 }
 0xb05   :  { %v1453_v30 = vsub.f32 1.0, %v1451_v56 }
 0xb06   :  { %v1456_v44 = vsub.f32 0.0, %v1452_v17 }
 0xb07   :  { %v1457_v51 = vsub.f32 0.0, %v1453_v30 }
 0xb08   :  { %v1458_v32 = vsel %vm1454_vm0, %v1452_v17, %v1456_v44  ;;  %vm2697_vm0 = vcmask 130048  }
 0xb09   :  { %v1460_v26 = vadd.f32 1.0, %v1458_v32  ;;  %v1459_v46 = vsel %vm1455_vm3, %v1453_v30, %v1457_v51 }
 0xb0a   :  { %v1461_v48 = vadd.f32 1.0, %v1459_v46 }
 0xb0b   :  { %v1462_v22 = vmul.f32 %v1460_v26, %v1410_v45 }
 0xb0c   :  { %v1463_v40 = vmul.f32 %v1461_v48, %v1411_v47 }
 0xb0d   :  { %v5946_v42 = vadd.f32 %v1462_v22, %v5863_v13 }
 0xb0e   :  { %v5949_v55 = vadd.f32 %v5861_v58, %v1463_v40 }
 0xb29   :  { %s4746_s9 = spop %4745 }
 0xb2a   :  { %s1701_s10 = smul.f32 0.00048828125, %s4746_s9 }
 0xb2b   :  { %s4748_s11 = spop %4747 }
 0xb2c   :  { %s1705_s12 = smul.f32 %s1701_s10, %s1701_s10  ;;  %v1708_v13 = vstv %s1701_s10 }
 0xb2d   :  { %s1704_s1 = smul.f32 0.00048828125, %s4748_s11  ;;  %v1709_v58 = vsub.f32 %v5911_v10, %v1708_v13  ;;  %v1710_v52 = vsub.f32 %v5906_v2, %v1708_v13 }
 0xb2f   :  { %s1706_s13 = ssub.f32 %s1704_s1, %s1705_s12 }
 0xb31   :  { %s1707_s2 = smax.f32 %s5540_s27, %s1706_s13 }
 0xb32   :  { %s1711_s14 = sadd.f32 1e-05, %s1707_s2 }
 0xb34   :  { %v1712_v31 = vstv %s1711_s14 }
 0xb35   :  { %5330 = vrsqrt.f32 %v1712_v31 }
 0xb3f   :  { %v5331_v33 = vpop.eup %5330 }
 0xb40   :  { %4749 = vpush %v5331_v33 }
 0xb71   :  { %s4750_s19 = spop %4749 }
 0xb72   :  { %v1715_v35 = vstv %s4750_s19 }
 0xb73   :  { %v1716_v36 = vmul.f32 %v1715_v35, %v1709_v58  ;;  %v1717_v53 = vmul.f32 %v1715_v35, %v1710_v52 }
 0xb75   :  { %v1726_v59 = vmul.f32 %v5952_v34, %v1716_v36  ;;  %v1727_v61 = vmul.f32 %v5954_v24, %v1717_v53 }
 0xb77   :  { %v1736_v18 = vadd.f32 %v5958_v57, %v1726_v59  ;;  %v1737_v1 = vadd.f32 %v5960_v19, %v1727_v61 }
 0xb79   :  { %v1740_v4 = vmul.f32 0.70710677, %v1736_v18  ;;  %v1741_v10 = vmul.f32 0.70710677, %v1737_v1  ;;  %v1738_v35 = vmul.f32 0.5, %v1736_v18 }
 0xb7b   :  { %v1742_v43 = vand.u32 2147483647, %v1740_v4  ;;  %v1743_v2 = vand.u32 2147483647, %v1741_v10  ;;  %vm1782_vm4 = vcmp.ge.f32.partialorder %v1740_v4, 0.0  ;;  %vm1783_vm9 = vcmp.ge.f32.partialorder %v1741_v10, 0.0 }
 0xb7d   :  { %v1744_v5 = vmul.f32 0.3275911, %v1742_v43  ;;  %v1745_v11 = vmul.f32 0.3275911, %v1743_v2  ;;  %v1770_v12 = vsub.f32 0.0, %v1742_v43  ;;  %v1771_v54 = vsub.f32 0.0, %v1743_v2 }
 0xb7f   :  { %v1746_v62 = vadd.f32 1.0, %v1744_v5  ;;  %v1747_v0 = vadd.f32 1.0, %v1745_v11  ;;  %v1772_v8 = vmul.f32 %v1770_v12, %v1742_v43  ;;  %v1773_v7 = vmul.f32 %v1771_v54, %v1743_v2 }
 0xb80   :  { %v1739_v43 = vmul.f32 0.5, %v1737_v1 }
 0xb81   :  { %5332 = vrcp.f32 %v1746_v62  ;;  %v1774_v16 = vmul.f32 1.442695, %v1772_v8  ;;  %v1776_v21 = vmul.f32 1.442695, %v1773_v7 }
 0xb82   :  { %5334 = vrcp.f32 %v1747_v0 }
 0xb83   :  { %5336 = vpow2.f32 %v1774_v16 }
 0xb84   :  { %5338 = vpow2.f32 %v1776_v21  ;;  %v5547_v21 = vmov 9  }
 0xb85   :  { %5077 = vset.pattern.permute.xlu1 %v5547_v21  ;;  %5076 = vset.pattern.permute.xlu0 %v5547_v21 }
 0xb8b   :  { %v5333_v3 = vpop.eup %5332 }
 0xb8c   :  { %v5335_v6 = vpop.eup %5334  ;;  %v1752_v9 = vmul.f32 1.0614054, %v5333_v3 }
 0xb8d   :  { %v1753_v14 = vmul.f32 1.0614054, %v5335_v6  ;;  %v5337_v46 = vpop.eup %5336 }
 0xb8e   :  { %v1754_v15 = vadd.f32 -1.4531521, %v1752_v9  ;;  %v5339_v48 = vpop.eup %5338 }
 0xb8f   :  { %v1755_v20 = vadd.f32 -1.4531521, %v1753_v14 }
 0xb90   :  { %v1756_v25 = vmul.f32 %v5333_v3, %v1754_v15  ;;  %v5989_v15 = vld [vmem:[#allocation9 + $0x20] sm:$0xff] }
 0xb91   :  { %v1757_v27 = vmul.f32 %v5335_v6, %v1755_v20  ;;  %4322 = vmatprep.mubr.msk.f32.mxu1 %vm671_vm11, %v5989_v15 }
 0xb92   :  { %v1758_v28 = vadd.f32 1.4214138, %v1756_v25 }
 0xb93   :  { %v1759_v29 = vadd.f32 1.4214138, %v1757_v27 }
 0xb94   :  { %v1760_v38 = vmul.f32 %v5333_v3, %v1758_v28 }
 0xb95   :  { %v1761_v56 = vmul.f32 %v5335_v6, %v1759_v29 }
 0xb96   :  { %v1762_v17 = vadd.f32 -0.28449672, %v1760_v38 }
 0xb97   :  { %v1763_v30 = vadd.f32 -0.28449672, %v1761_v56 }
 0xb98   :  { %v1764_v44 = vmul.f32 %v5333_v3, %v1762_v17 }
 0xb99   :  { %v1765_v51 = vmul.f32 %v5335_v6, %v1763_v30 }
 0xb9a   :  { %v1766_v32 = vadd.f32 0.2548296, %v1764_v44 }
 0xb9b   :  { %v1767_v45 = vadd.f32 0.2548296, %v1765_v51 }
 0xb9c   :  { %v1768_v26 = vmul.f32 %v5333_v3, %v1766_v32 }
 0xb9d   :  { %v1769_v47 = vmul.f32 %v5335_v6, %v1767_v45 }
 0xb9e   :  { %v1778_v22 = vmul.f32 %v5337_v46, %v1768_v26 }
 0xb9f   :  { %v1779_v40 = vmul.f32 %v5339_v48, %v1769_v47 }
 0xba0   :  { %v1780_v31 = vsub.f32 1.0, %v1778_v22 }
 0xba1   :  { %v1781_v33 = vsub.f32 1.0, %v1779_v40 }
 0xba2   :  { %v1784_v13 = vsub.f32 0.0, %v1780_v31 }
 0xba3   :  { %v1785_v58 = vsub.f32 0.0, %v1781_v33 }
 0xba4   :  { %v1786_v52 = vsel %vm1782_vm4, %v1780_v31, %v1784_v13 }
 0xba5   :  { %v1788_v36 = vadd.f32 1.0, %v1786_v52  ;;  %v1787_v53 = vsel %vm1783_vm9, %v1781_v33, %v1785_v58 }
 0xba6   :  { %v1789_v61 = vadd.f32 1.0, %v1787_v53 }
 0xba7   :  { %v1790_v59 = vmul.f32 %v1788_v36, %v1738_v35 }
 0xba8   :  { %v1791_v2 = vmul.f32 %v1789_v61, %v1739_v43 }
 0xba9   :  { %1794 = vrot.lane.b32.xlu1 %v1790_v59, %s5532_s3 }
 0xbad   :  { %1796 = vrot.lane.b32.xlu1 %v1791_v2, %s5532_s3 }
 0xbb1   :  { %2114 = vrot.lane.b32.xlu1 %v5946_v42, %s5532_s3 }
 0xbb5   :  { %2116 = vrot.lane.b32.xlu1 %v5949_v55, %s5532_s3 }
 0xc1b   :  { %v1795_v4 = vpop.permute.xlu1 %1794 }
 0xc1c   :  { %1800 = vst.msk [vmem:[#allocation2] sm:$0xff] %vm283_vm1, %v1795_v4 }
 0xc1d   :  { %1801 = vst.msk [vmem:[#allocation2 + $0x8] sm:$0xff] %vm285_vm2, %v1795_v4 }
 0xc1f   :  { %v1797_v18 = vpop.permute.xlu1 %1796 }
 0xc20   :  { %1802 = vst.msk [vmem:[#allocation2 + $0x10] sm:$0xff] %vm283_vm1, %v1797_v18 }
 0xc21   :  { %1803 = vst.msk [vmem:[#allocation2 + $0x18] sm:$0xff] %vm285_vm2, %v1797_v18 }
 0xc23   :  { %v2115_v1 = vpop.permute.xlu1 %2114  ;;  %v1874_v10 = vld [vmem:[#allocation2] sm:$0xff] }
 0xc24   :  { %v1875_v5 = vld [vmem:[#allocation2 + $0x8] sm:$0xff]  ;;  %2120 = vst.msk [vmem:[#allocation2] sm:$0xff] %vm283_vm1, %v2115_v1 }
 0xc25   :  { %v5026_v11 = vpack.i.bf16 %v1875_v5, %v1874_v10  ;;  %2121 = vst.msk [vmem:[#allocation2 + $0x8] sm:$0xff] %vm285_vm2, %v2115_v1 }
 0xc27   :  { %5027 = vrot.lane.b32.xlu0 %v5026_v11, %s5537_s18  ;;  %4997 = vrot.lane.b32.xlu1 %v5026_v11, %s5534_s16  ;;  %v2117_v62 = vpop.permute.xlu1 %2116  ;;  %v1810_v0 = vld [vmem:[#allocation2 + $0x10] sm:$0xff] }
 0xc28   :  { %v1811_v12 = vld [vmem:[#allocation2 + $0x18] sm:$0xff]  ;;  %v4585_v3 = vpack.c.bf16 %v1810_v0, %v1874_v10  ;;  %2122 = vst.msk [vmem:[#allocation2 + $0x10] sm:$0xff] %vm283_vm1, %v2117_v62 }
 0xc29   :  { %v5001_v54 = vpack.i.bf16 %v1811_v12, %v1810_v0  ;;  %2123 = vst.msk [vmem:[#allocation2 + $0x18] sm:$0xff] %vm285_vm2, %v2117_v62 }
 0xc2a   :  { %4586 = vmatprep.subr.bf16.mxu1 %v4585_v3 }
 0xc2b   :  { %5002 = vrot.lane.b32.xlu1 %v5001_v54, %s5534_s16  ;;  %4588 = vmatpush3.bf16.msra.mxu1 %v4585_v3  ;;  %v2128_v8 = vld [vmem:[#allocation2] sm:$0xff] }
 0xc2c   :  { %v2129_v6 = vld [vmem:[#allocation2 + $0x8] sm:$0xff] }
 0xc2d   :  { %v5036_v7 = vpack.i.bf16 %v2129_v6, %v2128_v8 }
 0xc2f   :  { %5007 = vrot.lane.b32.xlu1 %v5026_v11, %s5533_s15  ;;  %5037 = vrot.lane.b32.xlu0 %v5036_v7, %s5534_s16  ;;  %v2125_v9 = vld [vmem:[#allocation2 + $0x10] sm:$0xff] }
 0xc30   :  { %v4605_v14 = vpack.c.bf16 %v2125_v9, %v2128_v8  ;;  %v2131_v16 = vld [vmem:[#allocation2 + $0x18] sm:$0xff] }
 0xc31   :  { %v5041_v20 = vpack.i.bf16 %v2131_v16, %v2125_v9  ;;  %v6010_v16 = vld [vmem:[#allocation9 + $0x60] sm:$0xff] }
 0xc32   :  { %4606 = vmatprep.subr.bf16.mxu0 %v4605_v14 }
 0xc33   :  { %5012 = vrot.lane.b32.xlu1 %v5001_v54, %s5533_s15  ;;  %5047 = vrot.lane.b32.xlu0 %v5036_v7, %s5533_s15 }
 0xc34   :  { %4608 = vmatpush3.bf16.msra.mxu0 %v4605_v14 }
 0xc37   :  { %5017 = vrot.lane.b32.xlu1 %v5026_v11, %s5536_s17  ;;  %5057 = vrot.lane.b32.xlu0 %v5036_v7, %s5536_s17 }
 0xc3b   :  { %5022 = vrot.lane.b32.xlu1 %v5001_v54, %s5536_s17  ;;  %5067 = vrot.lane.b32.xlu0 %v5036_v7, %s5537_s18 }
 0xc3f   :  { %5032 = vrot.lane.b32.xlu1 %v5001_v54, %s5537_s18  ;;  %1907 = vperm.xlu0 %5076, %v5900_v39  }
 0xc43   :  { %5042 = vrot.lane.b32.xlu1 %v5041_v20, %s5534_s16 }
 0xc47   :  { %5052 = vrot.lane.b32.xlu1 %v5041_v20, %s5533_s15 }
 0xc4b   :  { %5062 = vrot.lane.b32.xlu1 %v5041_v20, %s5536_s17 }
 0xc4f   :  { %5072 = vrot.lane.b32.xlu1 %v5041_v20, %s5537_s18 }
 0xc53   :  { %1911 = vperm.xlu1 %5077, %v5897_v63  }
 0xc99   :  { %v4998_v25 = vpop.permute.xlu1 %4997  ;;  %v5028_v48 = vpop.permute.xlu0 %5027 }
 0xc9a   :  { %v5000_v27 = vunpack.i.h.bf16 %v4998_v25  ;;  %v4999_v28 = vunpack.i.l.bf16 %v4998_v25  ;;  %v5030_v59 = vunpack.i.h.bf16 %v5028_v48  ;;  %v5029_v61 = vunpack.i.l.bf16 %v5028_v48 }
 0xc9c   :  { %v1824_v17 = vsel %vm297_vm5, %v4999_v28, %v5000_v27  ;;  %v1890_v0 = vsel %vm333_vm8, %v5029_v61, %v5030_v59 }
 0xc9d   :  { %v5003_v29 = vpop.permute.xlu1 %5002 }
 0xc9e   :  { %v5005_v38 = vunpack.i.h.bf16 %v5003_v29  ;;  %v5004_v56 = vunpack.i.l.bf16 %v5003_v29 }
 0xca0   :  { %v1825_v30 = vsel %vm297_vm5, %v5004_v56, %v5005_v38 }
 0xca1   :  { %v5008_v44 = vpop.permute.xlu1 %5007  ;;  %v4589_v51 = vpack.c.bf16 %v1825_v30, %v1824_v17  ;;  %v5038_v13 = vpop.permute.xlu0 %5037 }
 0xca2   :  { %v5010_v32 = vunpack.i.h.bf16 %v5008_v44  ;;  %v5009_v45 = vunpack.i.l.bf16 %v5008_v44  ;;  %v5040_v11 = vunpack.i.h.bf16 %v5038_v13  ;;  %v5039_v62 = vunpack.i.l.bf16 %v5038_v13 }
 0xca3   :  { %4590 = vmatprep.subr.bf16.mxu1 %v4589_v51 }
 0xca4   :  { %4592 = vmatpush3.bf16.msra.mxu1 %v4589_v51  ;;  %v1846_v22 = vsel %vm309_vm6, %v5009_v45, %v5010_v32  ;;  %v2144_v20 = vsel %vm297_vm5, %v5039_v62, %v5040_v11 }
 0xca5   :  { %v5013_v26 = vpop.permute.xlu1 %5012  ;;  %v5048_v4 = vpop.permute.xlu0 %5047 }
 0xca6   :  { %v5015_v46 = vunpack.i.h.bf16 %v5013_v26  ;;  %v5014_v47 = vunpack.i.l.bf16 %v5013_v26  ;;  %v5050_v9 = vunpack.i.h.bf16 %v5048_v4  ;;  %v5049_v14 = vunpack.i.l.bf16 %v5048_v4 }
 0xca8   :  { %v1847_v40 = vsel %vm309_vm6, %v5014_v47, %v5015_v46  ;;  %v2166_v17 = vsel %vm309_vm6, %v5049_v14, %v5050_v9 }
 0xca9   :  { %v5018_v31 = vpop.permute.xlu1 %5017  ;;  %v4593_v33 = vpack.c.bf16 %v1847_v40, %v1846_v22  ;;  %v5058_v7 = vpop.permute.xlu0 %5057 }
 0xcaa   :  { %v5020_v58 = vunpack.i.h.bf16 %v5018_v31  ;;  %v5019_v52 = vunpack.i.l.bf16 %v5018_v31  ;;  %v5060_v38 = vunpack.i.h.bf16 %v5058_v7  ;;  %v5059_v56 = vunpack.i.l.bf16 %v5058_v7 }
 0xcab   :  { %4594 = vmatprep.subr.bf16.mxu1 %v4593_v33 }
 0xcac   :  { %4596 = vmatpush3.bf16.msra.mxu1 %v4593_v33  ;;  %v1868_v43 = vsel %vm321_vm7, %v5019_v52, %v5020_v58  ;;  %v2188_v48 = vsel %vm321_vm7, %v5059_v56, %v5060_v38 }
 0xcad   :  { %v5023_v35 = vpop.permute.xlu1 %5022  ;;  %v5068_v44 = vpop.permute.xlu0 %5067 }
 0xcae   :  { %v5025_v36 = vunpack.i.h.bf16 %v5023_v35  ;;  %v5024_v53 = vunpack.i.l.bf16 %v5023_v35  ;;  %v5070_v46 = vunpack.i.h.bf16 %v5068_v44  ;;  %v5069_v47 = vunpack.i.l.bf16 %v5068_v44 }
 0xcaf   :  { %v5550_v44 = vmov 0.0|0.0  }
 0xcb0   :  { %v1869_v2 = vsel %vm321_vm7, %v5024_v53, %v5025_v36 }
 0xcb1   :  { %v5033_v18 = vpop.permute.xlu1 %5032  ;;  %v4597_v1 = vpack.c.bf16 %v1869_v2, %v1868_v43 }
 0xcb2   :  { %v5035_v10 = vunpack.i.h.bf16 %v5033_v18  ;;  %v5034_v5 = vunpack.i.l.bf16 %v5033_v18 }
 0xcb3   :  { %4598 = vmatprep.subr.bf16.mxu1 %v4597_v1 }
 0xcb4   :  { %4600 = vmatpush3.bf16.msra.mxu1 %v4597_v1  ;;  %v1891_v12 = vsel %vm333_vm8, %v5034_v5, %v5035_v10 }
 0xcb5   :  { %v5043_v54 = vpop.permute.xlu1 %5042  ;;  %v4601_v3 = vpack.c.bf16 %v1891_v12, %v1890_v0 }
 0xcb6   :  { %v5045_v8 = vunpack.i.h.bf16 %v5043_v54  ;;  %v5044_v6 = vunpack.i.l.bf16 %v5043_v54  ;;  %v5548_v54 = vmov 10  }
 0xcb7   :  { %4602 = vmatprep.subr.bf16.mxu1 %v4601_v3  ;;  %5079 = vset.pattern.permute.xlu1 %v5548_v54 }
 0xcb8   :  { %4604 = vmatpush3.bf16.msra.mxu1 %v4601_v3  ;;  %v2145_v21 = vsel %vm297_vm5, %v5044_v6, %v5045_v8  ;;  %5078 = vset.pattern.permute.xlu0 %v5548_v54 }
 0xcb9   :  { %v5053_v25 = vpop.permute.xlu1 %5052  ;;  %v4609_v27 = vpack.c.bf16 %v2145_v21, %v2144_v20 }
 0xcba   :  { %v5055_v28 = vunpack.i.h.bf16 %v5053_v25  ;;  %v5054_v29 = vunpack.i.l.bf16 %v5053_v25 }
 0xcbb   :  { %4323 = vmatmul.mubr.msk.f32.vlgmr.msra.gmra.mrb[10].mxu1 %vm671_vm11, %v6010_v16  ;;  %4610 = vmatprep.subr.bf16.mxu0 %v4609_v27 }
 0xcbc   :  { %4612 = vmatpush3.bf16.msra.mxu0 %v4609_v27  ;;  %v2167_v30 = vsel %vm309_vm6, %v5054_v29, %v5055_v28  ;;  %4368 = vmatprep.mubr.msk.f32.mxu1 %vm671_vm11, %v5989_v15  ;;  %v2210_v15 = vsel %vm333_vm8, %v5069_v47, %v5070_v46 }
 0xcbd   :  { %v5063_v51 = vpop.permute.xlu1 %5062  ;;  %v4613_v32 = vpack.c.bf16 %v2167_v30, %v2166_v17 }
 0xcbe   :  { %v5065_v45 = vunpack.i.h.bf16 %v5063_v51  ;;  %v5064_v26 = vunpack.i.l.bf16 %v5063_v51  ;;  %v6028_v36 = vpop.permute.xlu0 %1907 }
 0xcbf   :  { %4614 = vmatprep.subr.bf16.mxu0 %v4613_v32 }
 0xcc0   :  { %4616 = vmatpush3.bf16.msra.mxu0 %v4613_v32  ;;  %v2189_v22 = vsel %vm321_vm7, %v5064_v26, %v5065_v45 }
 0xcc1   :  { %v5073_v40 = vpop.permute.xlu1 %5072  ;;  %v4617_v31 = vpack.c.bf16 %v2189_v22, %v2188_v48 }
 0xcc2   :  { %v5075_v33 = vunpack.i.h.bf16 %v5073_v40  ;;  %v5074_v13 = vunpack.i.l.bf16 %v5073_v40 }
 0xcc3   :  { %4618 = vmatprep.subr.bf16.mxu0 %v4617_v31 }
 0xcc4   :  { %4620 = vmatpush3.bf16.msra.mxu0 %v4617_v31  ;;  %v2211_v58 = vsel %vm333_vm8, %v5074_v13, %v5075_v33 }
 0xcc5   :  { %v4621_v52 = vpack.c.bf16 %v2211_v58, %v2210_v15 }
 0xcc7   :  { %4622 = vmatprep.subr.bf16.mxu0 %v4621_v52 }
 0xcc8   :  { %4624 = vmatpush3.bf16.msra.mxu0 %v4621_v52 }
 0xcc9   :  { %4645 = vmatprep.subr.bf16.mxu0 %v5550_v44 }
 0xccb   :  { %4346 = vmatmul.mubr.msk.f32.vlgmr.msra.gmra.mrb[8].mxu0 %vm671_vm11, %v5884_v37 }
 0xccc   :  { %4375 = vmatprep.mubr.msk.f32.mxu0 %vm5551_vm15, %v5531_v50 }
 0xcd2   :  { %v6026_v35 = vpop.permute.xlu1 %1911 }
 0xd8e   :  { %v4324_v53 = vpop.f32.mrb[10].mxu1 }
 0xd8f   :  { %v6031_v59 = vadd.f32 %v4324_v53, %v6026_v35  ;;  %v1986_v61 = vpop.f32.mrb[11].mxu1 }
 0xd90   :  { %v6034_v43 = vadd.f32 %v1986_v61, %v6028_v36 }
 0xd91   :  { %v2006_v2 = vmul.f32 %v6031_v59, %v6031_v59 }
 0xd92   :  { %v1995_v4 = vadd.f32 %v6031_v59, %v6034_v43  ;;  %v2005_v37 = vmul.f32 %v6034_v43, %v6034_v43 }
 0xd94   :  { %1996 = vadd.xlane.f32.xlu1 %v1995_v4  ;;  %v2007_v18 = vadd.f32 %v2006_v2, %v2005_v37 }
 0xd96   :  { %2008 = vadd.xlane.f32.xlu0 %v2007_v18 }
 0xd9e   :  { %v4347_v1 = vpop.f32.mrb[8].mxu0 }
 0xd9f   :  { %v6043_v10 = vadd.f32 %v4347_v1, %v5903_v60  ;;  %v2292_v5 = vpop.f32.mrb[9].mxu0  ;;  %v5549_v60 = vmov 11  }
 0xda0   :  { %v6046_v11 = vadd.f32 %v2292_v5, %v5908_v41 }
 0xda1   :  { %v2312_v62 = vmul.f32 %v6043_v10, %v6043_v10 }
 0xda2   :  { %v2311_v0 = vmul.f32 %v6046_v11, %v6046_v11  ;;  %v2301_v12 = vadd.f32 %v6043_v10, %v6046_v11 }
 0xda4   :  { %2302 = vadd.xlane.f32.xlu0 %v2301_v12  ;;  %v2313_v3 = vadd.f32 %v2312_v62, %v2311_v0 }
 0xda6   :  { %2314 = vadd.xlane.f32.xlu1 %v2313_v3 }
 0xdb7   :  { %2041 = vperm.xlu1 %5079, %v5897_v63  }
 0xdba   :  { %2037 = vperm.xlu0 %5078, %v5900_v39  }
 0xdbb   :  { %5080 = vset.pattern.permute.xlu1 %v5549_v60 }
 0xdbc   :  { %2047 = vperm.xlu1 %5080, %v5900_v39  }
 0xdc0   :  { %2051 = vperm.xlu1 %5080, %v5897_v63  }
 0xe21   :  { %v1997_v41 = vpop.xlane.xlu1 %1996 }
 0xe22   :  { %v1998_v8 = vrot.slane %v1997_v41, 4 }
 0xe23   :  { %v2009_v6 = vpop.xlane.xlu0 %2008 }
 0xe24   :  { %v1999_v7 = vadd.f32 %v1998_v8, %v1997_v41  ;;  %v2010_v9 = vrot.slane %v2009_v6, 4 }
 0xe26   :  { %v2000_v14 = vrot.slane %v1999_v7, 2  ;;  %v2011_v20 = vadd.f32 %v2010_v9, %v2009_v6 }
 0xe28   :  { %v2012_v21 = vrot.slane %v2011_v20, 2  ;;  %v2001_v25 = vadd.f32 %v2000_v14, %v1999_v7 }
 0xe2a   :  { %v2002_v27 = vrot.slane %v2001_v25, 1  ;;  %v2013_v28 = vadd.f32 %v2012_v21, %v2011_v20 }
 0xe2c   :  { %v2003_v29 = vadd.f32 %v2002_v27, %v2001_v25  ;;  %v2014_v38 = vrot.slane %v2013_v28, 1 }
 0xe2e   :  { %4751 = vpush %v2003_v29  ;;  %v2015_v56 = vadd.f32 %v2014_v38, %v2013_v28 }
 0xe30   :  { %4753 = vpush %v2015_v56 }
 0xe31   :  { %v2303_v17 = vpop.xlane.xlu0 %2302 }
 0xe32   :  { %v2304_v63 = vrot.slane %v2303_v17, 4 }
 0xe33   :  { %v2315_v39 = vpop.xlane.xlu1 %2314 }
 0xe34   :  { %v2316_v30 = vrot.slane %v2315_v39, 4  ;;  %v2305_v51 = vadd.f32 %v2304_v63, %v2303_v17 }
 0xe36   :  { %v2317_v32 = vadd.f32 %v2316_v30, %v2315_v39  ;;  %v2306_v45 = vrot.slane %v2305_v51, 2 }
 0xe37   :  { %v6064_v15 = vpop.permute.xlu1 %2041 }
 0xe38   :  { %v2318_v26 = vrot.slane %v2317_v32, 2  ;;  %v2307_v47 = vadd.f32 %v2306_v45, %v2305_v51 }
 0xe39   :  { %v6071_v4 = vpop.permute.xlu0 %2037 }
 0xe3a   :  { %v2319_v48 = vadd.f32 %v2318_v26, %v2317_v32  ;;  %v2308_v22 = vrot.slane %v2307_v47, 1 }
 0xe3b   :  { %v6067_v52 = vpop.permute.xlu1 %2047 }
 0xe3c   :  { %v2320_v40 = vrot.slane %v2319_v48, 1  ;;  %v2309_v33 = vadd.f32 %v2308_v22, %v2307_v47 }
 0xe3e   :  { %v2321_v13 = vadd.f32 %v2320_v40, %v2319_v48 }
 0xe3f   :  { %v6075_v1 = vpop.permute.xlu1 %2051 }
 0xe5f   :  { %s4752_s20 = spop %4751 }
 0xe60   :  { %s6058_s21 = smul.f32 0.00048828125, %s4752_s20 }
 0xe61   :  { %s4754_s22 = spop %4753 }
 0xe62   :  { %s2023_s23 = smul.f32 %s6058_s21, %s6058_s21  ;;  %v2026_v58 = vstv %s6058_s21 }
 0xe63   :  { %s2022_s24 = smul.f32 0.00048828125, %s4754_s22  ;;  %v2027_v53 = vsub.f32 %v6034_v43, %v2026_v58  ;;  %v2028_v61 = vsub.f32 %v6031_v59, %v2026_v58 }
 0xe65   :  { %s2024_s0 = ssub.f32 %s2022_s24, %s2023_s23 }
 0xe67   :  { %s2025_s28 = smax.f32 %s5540_s27, %s2024_s0 }
 0xe68   :  { %s2029_s29 = sadd.f32 1e-05, %s2025_s28 }
 0xe6a   :  { %v2030_v46 = vstv %s2029_s29 }
 0xe6b   :  { %5340 = vrsqrt.f32 %v2030_v46 }
 0xe75   :  { %v5341_v31 = vpop.eup %5340 }
 0xe76   :  { %4755 = vpush %v5341_v31 }
 0xe77   :  { %4757 = vpush %v2309_v33 }
 0xe78   :  { %4759 = vpush %v2321_v13 }
 0xea7   :  { %s4756_s30 = spop %4755 }
 0xea8   :  { %v2033_v2 = vstv %s4756_s30  ;;  %s4758_s5 = spop %4757 }
 0xea9   :  { %v2034_v37 = vmul.f32 %v2033_v2, %v2027_v53  ;;  %v2035_v18 = vmul.f32 %v2033_v2, %v2028_v61  ;;  %s6073_s6 = smul.f32 0.00048828125, %s4758_s5  ;;  %s4760_s7 = spop %4759 }
 0xeaa   :  { %s2328_s8 = smul.f32 0.00048828125, %s4760_s7 }
 0xeab   :  { %v2045_v5 = vmul.f32 %v6064_v15, %v2035_v18  ;;  %s2329_s9 = smul.f32 %s6073_s6, %s6073_s6  ;;  %v2044_v59 = vmul.f32 %v6071_v4, %v2034_v37 }
 0xead   :  { %s2330_s10 = ssub.f32 %s2328_s8, %s2329_s9  ;;  %v2054_v43 = vadd.f32 %v6067_v52, %v2044_v59  ;;  %v2055_v62 = vadd.f32 %v6075_v1, %v2045_v5 }
 0xeaf   :  { %s2331_s11 = smax.f32 %s5540_s27, %s2330_s10  ;;  %v2058_v0 = vmul.f32 0.70710677, %v2054_v43  ;;  %v2059_v12 = vmul.f32 0.70710677, %v2055_v62 }
 0xeb0   :  { %s2335_s12 = sadd.f32 1e-05, %s2331_s11 }
 0xeb1   :  { %v2060_v54 = vand.u32 2147483647, %v2058_v0  ;;  %v2061_v3 = vand.u32 2147483647, %v2059_v12  ;;  %vm2100_vm10 = vcmp.ge.f32.partialorder %v2058_v0, 0.0  ;;  %vm2101_vm12 = vcmp.ge.f32.partialorder %v2059_v12, 0.0 }
 0xeb2   :  { %v2336_v60 = vstv %s2335_s12 }
 0xeb3   :  { %5342 = vrsqrt.f32 %v2336_v60  ;;  %v2062_v41 = vmul.f32 0.3275911, %v2060_v54  ;;  %v2063_v8 = vmul.f32 0.3275911, %v2061_v3  ;;  %v2088_v14 = vsub.f32 0.0, %v2060_v54 }
 0xeb4   :  { %v2089_v20 = vsub.f32 0.0, %v2061_v3  ;;  %v2056_v60 = vmul.f32 0.5, %v2054_v43 }
 0xeb5   :  { %v2064_v6 = vadd.f32 1.0, %v2062_v41  ;;  %v2065_v7 = vadd.f32 1.0, %v2063_v8  ;;  %v2090_v25 = vmul.f32 %v2088_v14, %v2060_v54 }
 0xeb6   :  { %v2091_v29 = vmul.f32 %v2089_v20, %v2061_v3 }
 0xeb7   :  { %5344 = vrcp.f32 %v2064_v6  ;;  %v2092_v17 = vmul.f32 1.442695, %v2090_v25  ;;  %v2057_v6 = vmul.f32 0.5, %v2055_v62  ;;  %v2332_v25 = vstv %s6073_s6 }
 0xeb8   :  { %5346 = vrcp.f32 %v2065_v7  ;;  %v2094_v30 = vmul.f32 1.442695, %v2091_v29  ;;  %v2333_v12 = vsub.f32 %v6046_v11, %v2332_v25  ;;  %v2334_v43 = vsub.f32 %v6043_v10, %v2332_v25 }
 0xeb9   :  { %5348 = vpow2.f32 %v2092_v17 }
 0xeba   :  { %5350 = vpow2.f32 %v2094_v30 }
 0xebd   :  { %v5343_v9 = vpop.eup %5342 }
 0xebe   :  { %4761 = vpush %v5343_v9 }
 0xec1   :  { %v5345_v21 = vpop.eup %5344 }
 0xec2   :  { %v5347_v27 = vpop.eup %5346  ;;  %v2070_v28 = vmul.f32 1.0614054, %v5345_v21 }
 0xec3   :  { %v2071_v38 = vmul.f32 1.0614054, %v5347_v27  ;;  %v5349_v58 = vpop.eup %5348 }
 0xec4   :  { %v2072_v56 = vadd.f32 -1.4531521, %v2070_v28  ;;  %v5351_v61 = vpop.eup %5350 }
 0xec5   :  { %v2073_v39 = vadd.f32 -1.4531521, %v2071_v38 }
 0xec6   :  { %v2074_v63 = vmul.f32 %v5345_v21, %v2072_v56 }
 0xec7   :  { %v2075_v51 = vmul.f32 %v5347_v27, %v2073_v39 }
 0xec8   :  { %v2076_v32 = vadd.f32 1.4214138, %v2074_v63 }
 0xec9   :  { %v2077_v45 = vadd.f32 1.4214138, %v2075_v51 }
 0xeca   :  { %v2078_v26 = vmul.f32 %v5345_v21, %v2076_v32 }
 0xecb   :  { %v2079_v46 = vmul.f32 %v5347_v27, %v2077_v45 }
 0xecc   :  { %v2080_v47 = vadd.f32 -0.28449672, %v2078_v26 }
 0xecd   :  { %v2081_v48 = vadd.f32 -0.28449672, %v2079_v46 }
 0xece   :  { %v2082_v22 = vmul.f32 %v5345_v21, %v2080_v47 }
 0xecf   :  { %v2083_v40 = vmul.f32 %v5347_v27, %v2081_v48 }
 0xed0   :  { %v2084_v31 = vadd.f32 0.2548296, %v2082_v22 }
 0xed1   :  { %v2085_v33 = vadd.f32 0.2548296, %v2083_v40 }
 0xed2   :  { %v2086_v13 = vmul.f32 %v5345_v21, %v2084_v31 }
 0xed3   :  { %v2087_v53 = vmul.f32 %v5347_v27, %v2085_v33 }
 0xed4   :  { %v2096_v2 = vmul.f32 %v5349_v58, %v2086_v13 }
 0xed5   :  { %v2097_v37 = vmul.f32 %v5351_v61, %v2087_v53 }
 0xed6   :  { %v2098_v18 = vsub.f32 1.0, %v2096_v2 }
 0xed7   :  { %v2099_v5 = vsub.f32 1.0, %v2097_v37 }
 0xed8   :  { %v2102_v59 = vsub.f32 0.0, %v2098_v18 }
 0xed9   :  { %v2103_v54 = vsub.f32 0.0, %v2099_v5 }
 0xeda   :  { %v2104_v3 = vsel %vm2100_vm10, %v2098_v18, %v2102_v59 }
 0xedb   :  { %v2106_v41 = vadd.f32 1.0, %v2104_v3  ;;  %v2105_v8 = vsel %vm2101_vm12, %v2099_v5, %v2103_v54 }
 0xedc   :  { %v2107_v7 = vadd.f32 1.0, %v2105_v8 }
 0xedd   :  { %v2108_v9 = vmul.f32 %v2106_v41, %v2056_v60 }
 0xede   :  { %v2109_v14 = vmul.f32 %v2107_v7, %v2057_v6 }
 0xedf   :  { %v6085_v20 = vadd.f32 %v2108_v9, %v5816_v23 }
 0xee0   :  { %v2111_v21 = vadd.f32 %v2109_v14, %v5819_v49 }
 0xee2   :  { %2775 = vrot.lane.b32.xlu0 %v2111_v21, %s5532_s3  ;;  %v4646_v0 = vpack.c.bf16 %v2111_v21, %v6085_v20 }
 0xee4   :  { %4647 = vmatpush3.bf16.msra.mxu0 %v4646_v0 }
 0xeef   :  { %s4762_s1 = spop %4761 }
 0xef0   :  { %v2339_v62 = vstv %s4762_s1 }
 0xef1   :  { %v2340_v27 = vmul.f32 %v2339_v62, %v2333_v12  ;;  %v2341_v28 = vmul.f32 %v2339_v62, %v2334_v43 }
 0xef3   :  { %v2342_v29 = vmul.f32 %v2340_v27, %v5952_v34  ;;  %v2343_v23 = vmul.f32 %v2341_v28, %v5954_v24 }
 0xef5   :  { %v2344_v49 = vadd.f32 %v2342_v29, %v5958_v57  ;;  %v2345_v38 = vadd.f32 %v2343_v23, %v5960_v19 }
 0xef7   :  { %v2348_v56 = vmul.f32 0.70710677, %v2344_v49  ;;  %v2349_v17 = vmul.f32 0.70710677, %v2345_v38  ;;  %v2346_v12 = vmul.f32 0.5, %v2344_v49  ;;  %v2347_v29 = vmul.f32 0.5, %v2345_v38 }
 0xef9   :  { %v2350_v39 = vand.u32 2147483647, %v2348_v56  ;;  %v2351_v63 = vand.u32 2147483647, %v2349_v17  ;;  %vm2390_vm13 = vcmp.ge.f32.partialorder %v2348_v56, 0.0  ;;  %vm2391_vm14 = vcmp.ge.f32.partialorder %v2349_v17, 0.0 }
 0xefa   :  { %v6103_v56 = vld [vmem:[#allocation9 + $0x28] sm:$0xff] }
 0xefb   :  { %v2352_v30 = vmul.f32 0.3275911, %v2350_v39  ;;  %v2353_v11 = vmul.f32 0.3275911, %v2351_v63  ;;  %v2378_v32 = vsub.f32 0.0, %v2350_v39  ;;  %v2379_v45 = vsub.f32 0.0, %v2351_v63  ;;  %4376 = vmatmul.mubr.msk.f32.vlgmr.msra.gmra.mrb[10].mxu0 %vm2697_vm0, %v6103_v56 }
 0xefd   :  { %v2354_v51 = vadd.f32 1.0, %v2352_v30  ;;  %v2355_v10 = vadd.f32 1.0, %v2353_v11  ;;  %v2380_v34 = vmul.f32 %v2378_v32, %v2350_v39  ;;  %v2381_v24 = vmul.f32 %v2379_v45, %v2351_v63 }
 0xeff   :  { %5352 = vrcp.f32 %v2354_v51  ;;  %v2382_v19 = vmul.f32 1.442695, %v2380_v34  ;;  %v2384_v40 = vmul.f32 1.442695, %v2381_v24 }
 0xf00   :  { %5354 = vrcp.f32 %v2355_v10 }
 0xf01   :  { %5356 = vpow2.f32 %v2382_v19 }
 0xf02   :  { %5358 = vpow2.f32 %v2384_v40 }
 0xf09   :  { %v5353_v26 = vpop.eup %5352 }
 0xf0a   :  { %v5355_v46 = vpop.eup %5354  ;;  %v2360_v47 = vmul.f32 1.0614054, %v5353_v26 }
 0xf0b   :  { %v2361_v57 = vmul.f32 1.0614054, %v5355_v46  ;;  %v5357_v60 = vpop.eup %5356 }
 0xf0c   :  { %v2362_v48 = vadd.f32 -1.4531521, %v2360_v47  ;;  %v5359_v8 = vpop.eup %5358 }
 0xf0d   :  { %v2363_v22 = vadd.f32 -1.4531521, %v2361_v57 }
 0xf0e   :  { %v2364_v31 = vmul.f32 %v5353_v26, %v2362_v48  ;;  %v6128_v48 = vld [vmem:[#allocation9 + $0x30] sm:$0xff] }
 0xf0f   :  { %v2365_v33 = vmul.f32 %v5355_v46, %v2363_v22  ;;  %4398 = vmatprep.mubr.msk.f32.mxu0 %vm671_vm11, %v6128_v48 }
 0xf10   :  { %v2366_v13 = vadd.f32 1.4214138, %v2364_v31 }
 0xf11   :  { %v2367_v58 = vadd.f32 1.4214138, %v2365_v33 }
 0xf12   :  { %v2368_v53 = vmul.f32 %v5353_v26, %v2366_v13 }
 0xf13   :  { %v2369_v61 = vmul.f32 %v5355_v46, %v2367_v58 }
 0xf14   :  { %v2370_v2 = vadd.f32 -0.28449672, %v2368_v53 }
 0xf15   :  { %v2371_v37 = vadd.f32 -0.28449672, %v2369_v61 }
 0xf16   :  { %v2372_v18 = vmul.f32 %v5353_v26, %v2370_v2 }
 0xf17   :  { %v2373_v5 = vmul.f32 %v5355_v46, %v2371_v37 }
 0xf18   :  { %v2374_v59 = vadd.f32 0.2548296, %v2372_v18 }
 0xf19   :  { %v2375_v54 = vadd.f32 0.2548296, %v2373_v5 }
 0xf1a   :  { %v2376_v3 = vmul.f32 %v5353_v26, %v2374_v59 }
 0xf1b   :  { %v2377_v41 = vmul.f32 %v5355_v46, %v2375_v54 }
 0xf1c   :  { %v2386_v6 = vmul.f32 %v5357_v60, %v2376_v3 }
 0xf1d   :  { %v2387_v7 = vmul.f32 %v5359_v8, %v2377_v41 }
 0xf1e   :  { %v2388_v9 = vsub.f32 1.0, %v2386_v6 }
 0xf1f   :  { %v2389_v14 = vsub.f32 1.0, %v2387_v7 }
 0xf20   :  { %v2392_v21 = vsub.f32 0.0, %v2388_v9 }
 0xf21   :  { %v2393_v0 = vsub.f32 0.0, %v2389_v14 }
 0xf22   :  { %v2394_v25 = vsel %vm2390_vm13, %v2388_v9, %v2392_v21 }
 0xf23   :  { %v2396_v43 = vadd.f32 1.0, %v2394_v25  ;;  %v2395_v62 = vsel %vm2391_vm14, %v2389_v14, %v2393_v0 }
 0xf24   :  { %v2397_v28 = vadd.f32 1.0, %v2395_v62 }
 0xf25   :  { %v2398_v27 = vmul.f32 %v2396_v43, %v2346_v12 }
 0xf26   :  { %v2399_v23 = vmul.f32 %v2397_v28, %v2347_v29 }
 0xf27   :  { %2402 = vrot.lane.b32.xlu1 %v2398_v27, %s5532_s3 }
 0xf2b   :  { %2404 = vrot.lane.b32.xlu1 %v2399_v23, %s5532_s3 }
 0xf2f   :  { %2773 = vrot.lane.b32.xlu1 %v6085_v20, %s5532_s3 }
 0xf54   :  { %v2776_v30 = vpop.permute.xlu0 %2775 }
 0xf99   :  { %v2403_v49 = vpop.permute.xlu1 %2402 }
 0xf9a   :  { %2408 = vst.msk [vmem:[#allocation2] sm:$0xff] %vm283_vm1, %v2403_v49 }
 0xf9b   :  { %2409 = vst.msk [vmem:[#allocation2 + $0x8] sm:$0xff] %vm285_vm2, %v2403_v49 }
 0xf9d   :  { %v2405_v38 = vpop.permute.xlu1 %2404 }
 0xf9e   :  { %2410 = vst.msk [vmem:[#allocation2 + $0x10] sm:$0xff] %vm283_vm1, %v2405_v38 }
 0xf9f   :  { %2411 = vst.msk [vmem:[#allocation2 + $0x18] sm:$0xff] %vm285_vm2, %v2405_v38 }
 0xfa1   :  { %v2774_v17 = vpop.permute.xlu1 %2773  ;;  %v2416_v39 = vld [vmem:[#allocation2] sm:$0xff] }
 0xfa2   :  { %v2417_v63 = vld [vmem:[#allocation2 + $0x8] sm:$0xff]  ;;  %2779 = vst.msk [vmem:[#allocation2] sm:$0xff] %vm283_vm1, %v2774_v17 }
 0xfa3   :  { %v5081_v20 = vpack.i.bf16 %v2417_v63, %v2416_v39  ;;  %2780 = vst.msk [vmem:[#allocation2 + $0x8] sm:$0xff] %vm285_vm2, %v2774_v17 }
 0xfa5   :  { %5082 = vrot.lane.b32.xlu1 %v5081_v20, %s5534_s16  ;;  %v2440_v11 = vld [vmem:[#allocation2 + $0x10] sm:$0xff] }
 0xfa6   :  { %v2441_v51 = vld [vmem:[#allocation2 + $0x18] sm:$0xff]  ;;  %v4625_v32 = vpack.c.bf16 %v2440_v11, %v2416_v39  ;;  %2781 = vst.msk [vmem:[#allocation2 + $0x10] sm:$0xff] %vm283_vm1, %v2776_v30 }
 0xfa7   :  { %v5096_v10 = vpack.i.bf16 %v2441_v51, %v2440_v11  ;;  %2782 = vst.msk [vmem:[#allocation2 + $0x18] sm:$0xff] %vm285_vm2, %v2776_v30 }
 0xfa8   :  { %4626 = vmatprep.subr.bf16.mxu1 %v4625_v32 }
 0xfa9   :  { %5097 = vrot.lane.b32.xlu0 %v5096_v10, %s5533_s15  ;;  %5087 = vrot.lane.b32.xlu1 %v5096_v10, %s5534_s16  ;;  %v2783_v45 = vld [vmem:[#allocation2] sm:$0xff] }
 0xfaa   :  { %4628 = vmatpush3.bf16.msra.mxu1 %v4625_v32  ;;  %v2788_v47 = vld [vmem:[#allocation2 + $0x8] sm:$0xff] }
 0xfab   :  { %v5121_v57 = vpack.i.bf16 %v2788_v47, %v2783_v45 }
 0xfad   :  { %5107 = vrot.lane.b32.xlu0 %v5096_v10, %s5536_s17  ;;  %5092 = vrot.lane.b32.xlu1 %v5081_v20, %s5533_s15  ;;  %v2784_v26 = vld [vmem:[#allocation2 + $0x10] sm:$0xff] }
 0xfae   :  { %v4648_v34 = vpack.c.bf16 %v2784_v26, %v2783_v45  ;;  %v2790_v46 = vld [vmem:[#allocation2 + $0x18] sm:$0xff] }
 0xfaf   :  { %v5126_v24 = vpack.i.bf16 %v2790_v46, %v2784_v26 }
 0xfb0   :  { %4649 = vmatprep.subr.bf16.mxu0 %v4648_v34 }
 0xfb1   :  { %5117 = vrot.lane.b32.xlu0 %v5096_v10, %s5537_s18  ;;  %5102 = vrot.lane.b32.xlu1 %v5081_v20, %s5536_s17 }
 0xfb2   :  { %4651 = vmatpush3.bf16.msra.mxu0 %v4648_v34 }
 0xfb5   :  { %5112 = vrot.lane.b32.xlu1 %v5081_v20, %s5537_s18  ;;  %5127 = vrot.lane.b32.xlu0 %v5126_v24, %s5534_s16 }
 0xfb9   :  { %5137 = vrot.lane.b32.xlu0 %v5126_v24, %s5533_s15  ;;  %5122 = vrot.lane.b32.xlu1 %v5121_v57, %s5534_s16 }
 0xfbd   :  { %5147 = vrot.lane.b32.xlu0 %v5126_v24, %s5536_s17  ;;  %5132 = vrot.lane.b32.xlu1 %v5121_v57, %s5533_s15 }
 0xfc1   :  { %5157 = vrot.lane.b32.xlu0 %v5126_v24, %s5537_s18  ;;  %5142 = vrot.lane.b32.xlu1 %v5121_v57, %s5536_s17 }
 0xfc5   :  { %5152 = vrot.lane.b32.xlu1 %v5121_v57, %s5537_s18 }
0x1017   :  { %v5083_v19 = vpop.permute.xlu1 %5082 }
0x1018   :  { %v5085_v22 = vunpack.i.h.bf16 %v5083_v19  ;;  %v5084_v40 = vunpack.i.l.bf16 %v5083_v19 }
0x101a   :  { %v2432_v2 = vsel %vm297_vm5, %v5084_v40, %v5085_v22 }
0x101b   :  { %v5098_v31 = vpop.permute.xlu0 %5097  ;;  %v5088_v33 = vpop.permute.xlu1 %5087 }
0x101c   :  { %v5090_v13 = vunpack.i.h.bf16 %v5088_v33  ;;  %v5089_v58 = vunpack.i.l.bf16 %v5088_v33  ;;  %v5100_v53 = vunpack.i.h.bf16 %v5098_v31  ;;  %v5099_v61 = vunpack.i.l.bf16 %v5098_v31 }
0x101e   :  { %v2433_v37 = vsel %vm297_vm5, %v5089_v58, %v5090_v13  ;;  %v2455_v6 = vsel %vm309_vm6, %v5099_v61, %v5100_v53 }
0x101f   :  { %v5108_v18 = vpop.permute.xlu0 %5107  ;;  %v5093_v5 = vpop.permute.xlu1 %5092  ;;  %v4629_v59 = vpack.c.bf16 %v2433_v37, %v2432_v2 }
0x1020   :  { %v5095_v54 = vunpack.i.h.bf16 %v5093_v5  ;;  %v5094_v3 = vunpack.i.l.bf16 %v5093_v5  ;;  %v5110_v60 = vunpack.i.h.bf16 %v5108_v18  ;;  %v5109_v41 = vunpack.i.l.bf16 %v5108_v18 }
0x1021   :  { %4630 = vmatprep.subr.bf16.mxu1 %v4629_v59 }
0x1022   :  { %4632 = vmatpush3.bf16.msra.mxu1 %v4629_v59  ;;  %v2454_v8 = vsel %vm309_vm6, %v5094_v3, %v5095_v54  ;;  %v2477_v62 = vsel %vm321_vm7, %v5109_v41, %v5110_v60 }
0x1023   :  { %v5118_v7 = vpop.permute.xlu0 %5117  ;;  %v5103_v9 = vpop.permute.xlu1 %5102  ;;  %v4633_v14 = vpack.c.bf16 %v2455_v6, %v2454_v8 }
0x1024   :  { %v5105_v21 = vunpack.i.h.bf16 %v5103_v9  ;;  %v5104_v0 = vunpack.i.l.bf16 %v5103_v9  ;;  %v5120_v25 = vunpack.i.h.bf16 %v5118_v7  ;;  %v5119_v12 = vunpack.i.l.bf16 %v5118_v7  ;;  %v6156_v7 = vld [vmem:[#allocation9 + $0x70] sm:$0xff] }
0x1025   :  { %4634 = vmatprep.subr.bf16.mxu1 %v4633_v14  ;;  %v5552_v9 = vmov 12  }
0x1026   :  { %4636 = vmatpush3.bf16.msra.mxu1 %v4633_v14  ;;  %v2476_v43 = vsel %vm321_vm7, %v5104_v0, %v5105_v21  ;;  %v2499_v63 = vsel %vm333_vm8, %v5119_v12, %v5120_v25  ;;  %5162 = vset.pattern.permute.xlu1 %v5552_v9  ;;  %v6163_v14 = vpop.f32.mrb[10].mxu0 }
0x1027   :  { %v5128_v27 = vpop.permute.xlu0 %5127  ;;  %v5113_v28 = vpop.permute.xlu1 %5112  ;;  %v4637_v29 = vpack.c.bf16 %v2477_v62, %v2476_v43  ;;  %5161 = vset.pattern.permute.xlu0 %v5552_v9 }
0x1028   :  { %v5115_v23 = vunpack.i.h.bf16 %v5113_v28  ;;  %v5114_v49 = vunpack.i.l.bf16 %v5113_v28  ;;  %v5130_v38 = vunpack.i.h.bf16 %v5128_v27  ;;  %v5129_v17 = vunpack.i.l.bf16 %v5128_v27  ;;  %v4377_v21 = vpop.f32.mrb[11].mxu0 }
0x1029   :  { %4638 = vmatprep.subr.bf16.mxu1 %v4637_v29 }
0x102a   :  { %4640 = vmatpush3.bf16.msra.mxu1 %v4637_v29  ;;  %v2498_v39 = vsel %vm333_vm8, %v5114_v49, %v5115_v23  ;;  %v2804_v34 = vsel %vm297_vm5, %v5129_v17, %v5130_v38  ;;  %v2694_v23 = vld [vmem:[#allocation10 + $0x8] sm:$0xff]  ;;  %v6172_v38 = vld [vmem:[#allocation10] sm:$0xff] }
0x102b   :  { %v5138_v20 = vpop.permute.xlu0 %5137  ;;  %v5123_v30 = vpop.permute.xlu1 %5122  ;;  %v4641_v11 = vpack.c.bf16 %v2499_v63, %v2498_v39 }
0x102c   :  { %v5125_v51 = vunpack.i.h.bf16 %v5123_v30  ;;  %v5124_v10 = vunpack.i.l.bf16 %v5123_v30  ;;  %v5140_v32 = vunpack.i.h.bf16 %v5138_v20  ;;  %v5139_v45 = vunpack.i.l.bf16 %v5138_v20 }
0x102d   :  { %4642 = vmatprep.subr.bf16.mxu1 %v4641_v11 }
0x102e   :  { %4644 = vmatpush3.bf16.msra.mxu1 %v4641_v11  ;;  %v2803_v26 = vsel %vm297_vm5, %v5124_v10, %v5125_v51  ;;  %v2826_v33 = vsel %vm309_vm6, %v5139_v45, %v5140_v32 }
0x102f   :  { %v5148_v46 = vpop.permute.xlu0 %5147  ;;  %v5133_v24 = vpop.permute.xlu1 %5132  ;;  %v4652_v47 = vpack.c.bf16 %v2804_v34, %v2803_v26  ;;  %4668 = vmatprep.subr.bf16.mxu1 %v5550_v44 }
0x1030   :  { %v5135_v57 = vunpack.i.h.bf16 %v5133_v24  ;;  %v5134_v19 = vunpack.i.l.bf16 %v5133_v24  ;;  %v5150_v22 = vunpack.i.h.bf16 %v5148_v46  ;;  %v5149_v40 = vunpack.i.l.bf16 %v5148_v46 }
0x1031   :  { %4369 = vmatmul.mubr.msk.f32.vlgmr.msra.gmra.mrb[12].mxu1 %vm671_vm11, %v6010_v16  ;;  %4653 = vmatprep.subr.bf16.mxu0 %v4652_v47 }
0x1032   :  { %4655 = vmatpush3.bf16.msra.mxu0 %v4652_v47  ;;  %v2825_v31 = vsel %vm309_vm6, %v5134_v19, %v5135_v57  ;;  %4421 = vmatprep.mubr.msk.f32.mxu1 %vm5551_vm15, %v5531_v50  ;;  %v2848_v5 = vsel %vm321_vm7, %v5149_v40, %v5150_v22 }
0x1033   :  { %v5158_v13 = vpop.permute.xlu0 %5157  ;;  %v5143_v58 = vpop.permute.xlu1 %5142  ;;  %v4656_v53 = vpack.c.bf16 %v2826_v33, %v2825_v31 }
0x1034   :  { %v5145_v61 = vunpack.i.h.bf16 %v5143_v58  ;;  %v5144_v2 = vunpack.i.l.bf16 %v5143_v58  ;;  %v5160_v37 = vunpack.i.h.bf16 %v5158_v13  ;;  %v5159_v18 = vunpack.i.l.bf16 %v5158_v13 }
0x1035   :  { %4657 = vmatprep.subr.bf16.mxu0 %v4656_v53  ;;  %v5553_v13 = vmov 13   ;;  %v5554_v58 = vmov 14  }
0x1036   :  { %4659 = vmatpush3.bf16.msra.mxu0 %v4656_v53  ;;  %v2847_v16 = vsel %vm321_vm7, %v5144_v2, %v5145_v61  ;;  %v2870_v8 = vsel %vm333_vm8, %v5159_v18, %v5160_v37 }
0x1037   :  { %v5153_v59 = vpop.permute.xlu1 %5152  ;;  %v4660_v54 = vpack.c.bf16 %v2848_v5, %v2847_v16 }
0x1038   :  { %v5155_v3 = vunpack.i.h.bf16 %v5153_v59  ;;  %v5154_v60 = vunpack.i.l.bf16 %v5153_v59 }
0x1039   :  { %4661 = vmatprep.subr.bf16.mxu0 %v4660_v54 }
0x103a   :  { %4663 = vmatpush3.bf16.msra.mxu0 %v4660_v54  ;;  %v2869_v41 = vsel %vm333_vm8, %v5154_v60, %v5155_v3 }
0x103b   :  { %v4664_v6 = vpack.c.bf16 %v2870_v8, %v2869_v41 }
0x103d   :  { %4665 = vmatprep.subr.bf16.mxu0 %v4664_v6 }
0x103e   :  { %4667 = vmatpush3.bf16.msra.mxu0 %v4664_v6 }
0x103f   :  { %4683 = vmatprep.subr.bf16.mxu0 %v5550_v44 }
0x1041   :  { %4399 = vmatmul.mubr.msk.f32.vlgmr.msra.gmra.mrb[12].mxu0 %vm671_vm11, %v6156_v7 }
0x1042   :  { %4428 = vmatprep.mubr.msk.f32.mxu0 %vm5551_vm15, %v5531_v50 }
0x1104   :  { %v4370_v0 = vpop.f32.mrb[12].mxu1 }
0x1105   :  { %v6166_v25 = vadd.f32 %v4370_v0, %v6026_v35  ;;  %v2580_v12 = vpop.f32.mrb[13].mxu1 }
0x1106   :  { %v2581_v43 = vadd.f32 %v2580_v12, %v6028_v36 }
0x1107   :  { %v2600_v62 = vmul.f32 %v6166_v25, %v6166_v25 }
0x1108   :  { %v2589_v27 = vadd.f32 %v6166_v25, %v2581_v43  ;;  %v2599_v28 = vmul.f32 %v2581_v43, %v2581_v43 }
0x110a   :  { %2590 = vadd.xlane.f32.xlu1 %v2589_v27  ;;  %v2601_v29 = vadd.f32 %v2600_v62, %v2599_v28 }
0x110c   :  { %2602 = vadd.xlane.f32.xlu0 %v2601_v29 }
0x1114   :  { %v4400_v49 = vpop.f32.mrb[12].mxu0 }
0x1115   :  { %v2967_v17 = vpop.f32.mrb[13].mxu0 }
0x111b   :  { %2892 = vperm.xlu1 %5162, %v2694_v23  }
0x111f   :  { %5163 = vset.pattern.permute.xlu1 %v5553_v13 }
0x1122   :  { %2887 = vperm.xlu0 %5161, %v6172_v38  }
0x1126   :  { %5164 = vset.pattern.permute.xlu0 %v5554_v58 }
0x1197   :  { %v2591_v35 = vpop.xlane.xlu1 %2590 }
0x1198   :  { %v2592_v39 = vrot.slane %v2591_v35, 4 }
0x1199   :  { %v2603_v36 = vpop.xlane.xlu0 %2602 }
0x119a   :  { %v2593_v63 = vadd.f32 %v2592_v39, %v2591_v35  ;;  %v2604_v20 = vrot.slane %v2603_v36, 4 }
0x119b   :  { %v6175_v30 = vpop.permute.xlu1 %2892 }
0x119c   :  { %v2594_v11 = vrot.slane %v2593_v63, 2  ;;  %v2605_v51 = vadd.f32 %v2604_v20, %v2603_v36  ;;  %v6178_v32 = vadd.f32 %v4400_v49, %v6175_v30 }
0x119e   :  { %v2606_v10 = vrot.slane %v2605_v51, 2  ;;  %v2595_v45 = vadd.f32 %v2594_v11, %v2593_v63  ;;  %v2987_v19 = vmul.f32 %v6178_v32, %v6178_v32 }
0x11a0   :  { %v2596_v26 = vrot.slane %v2595_v45, 1  ;;  %v2607_v34 = vadd.f32 %v2606_v10, %v2605_v51 }
0x11a1   :  { %v6180_v46 = vpop.permute.xlu0 %2887 }
0x11a2   :  { %v6183_v24 = vadd.f32 %v2967_v17, %v6180_v46  ;;  %v2597_v47 = vadd.f32 %v2596_v26, %v2595_v45  ;;  %v2608_v57 = vrot.slane %v2607_v34, 1 }
0x11a4   :  { %4763 = vpush %v2597_v47  ;;  %v2609_v22 = vadd.f32 %v2608_v57, %v2607_v34  ;;  %v2976_v40 = vadd.f32 %v6178_v32, %v6183_v24  ;;  %v2986_v31 = vmul.f32 %v6183_v24, %v6183_v24 }
0x11a6   :  { %4765 = vpush %v2609_v22  ;;  %2977 = vadd.xlane.f32.xlu1 %v2976_v40  ;;  %v2988_v33 = vadd.f32 %v2987_v19, %v2986_v31 }
0x11a8   :  { %2989 = vadd.xlane.f32.xlu0 %v2988_v33 }
0x11b7   :  { %3018 = vperm.xlu1 %5163, %v6172_v38  }
0x11bb   :  { %3022 = vperm.xlu1 %5163, %v2694_v23  }
0x11be   :  { %3028 = vperm.xlu0 %5164, %v6172_v38  }
0x11bf   :  { %5165 = vset.pattern.permute.xlu1 %v5554_v58 }
0x11c0   :  { %3032 = vperm.xlu1 %5165, %v2694_v23  }
0x11d5   :  { %s4764_s13 = spop %4763 }
0x11d6   :  { %s2613_s2 = smul.f32 0.00048828125, %s4764_s13 }
0x11d7   :  { %s4766_s14 = spop %4765 }
0x11d8   :  { %s2617_s19 = smul.f32 %s2613_s2, %s2613_s2  ;;  %v2620_v2 = vstv %s2613_s2 }
0x11d9   :  { %s2616_s20 = smul.f32 0.00048828125, %s4766_s14  ;;  %v2621_v37 = vsub.f32 %v2581_v43, %v2620_v2  ;;  %v2622_v18 = vsub.f32 %v6166_v25, %v2620_v2 }
0x11db   :  { %s2618_s21 = ssub.f32 %s2616_s20, %s2617_s19 }
0x11dd   :  { %s2619_s22 = smax.f32 %s5540_s27, %s2618_s21 }
0x11de   :  { %s2623_s23 = sadd.f32 1e-05, %s2619_s22 }
0x11e0   :  { %v2624_v53 = vstv %s2623_s23 }
0x11e1   :  { %5360 = vrsqrt.f32 %v2624_v53 }
0x11eb   :  { %v5361_v61 = vpop.eup %5360 }
0x11ec   :  { %4767 = vpush %v5361_v61 }
0x121d   :  { %s4768_s24 = spop %4767 }
0x121e   :  { %v2627_v16 = vstv %s4768_s24 }
0x121f   :  { %v2628_v5 = vmul.f32 %v2627_v16, %v2621_v37  ;;  %v2629_v59 = vmul.f32 %v2627_v16, %v2622_v18 }
0x1221   :  { %v2630_v54 = vmul.f32 %v2628_v5, %v6071_v4  ;;  %v2631_v3 = vmul.f32 %v2629_v59, %v6064_v15 }
0x1223   :  { %v6198_v60 = vadd.f32 %v2630_v54, %v6067_v52  ;;  %v6201_v41 = vadd.f32 %v2631_v3, %v6075_v1 }
0x1225   :  { %v6204_v8 = vmul.f32 0.70710677, %v6198_v60  ;;  %v6207_v6 = vmul.f32 0.70710677, %v6201_v41 }
0x1227   :  { %v2638_v9 = vand.u32 2147483647, %v6204_v8  ;;  %v2639_v21 = vand.u32 2147483647, %v6207_v6  ;;  %vm2678_vm3 = vcmp.ge.f32.partialorder %v6204_v8, 0.0  ;;  %vm2679_vm4 = vcmp.ge.f32.partialorder %v6207_v6, 0.0 }
0x1229   :  { %v2640_v0 = vmul.f32 0.3275911, %v2638_v9  ;;  %v2641_v4 = vmul.f32 0.3275911, %v2639_v21  ;;  %v2666_v52 = vsub.f32 0.0, %v2638_v9  ;;  %v2667_v1 = vsub.f32 0.0, %v2639_v21 }
0x122b   :  { %v2642_v25 = vadd.f32 1.0, %v2640_v0  ;;  %v2643_v15 = vadd.f32 1.0, %v2641_v4  ;;  %v2668_v23 = vmul.f32 %v2666_v52, %v2638_v9  ;;  %v2669_v35 = vmul.f32 %v2667_v1, %v2639_v21 }
0x122c   :  { %v2634_v1 = vmul.f32 0.5, %v6198_v60 }
0x122d   :  { %5362 = vrcp.f32 %v2642_v25  ;;  %v2670_v45 = vmul.f32 1.442695, %v2668_v23  ;;  %v2672_v34 = vmul.f32 1.442695, %v2669_v35 }
0x122e   :  { %5364 = vrcp.f32 %v2643_v15 }
0x122f   :  { %5366 = vpow2.f32 %v2670_v45 }
0x1230   :  { %5368 = vpow2.f32 %v2672_v34 }
0x1233   :  { %v2978_v12 = vpop.xlane.xlu1 %2977 }
0x1234   :  { %v2979_v43 = vrot.slane %v2978_v12, 4 }
0x1235   :  { %v2990_v62 = vpop.xlane.xlu0 %2989 }
0x1236   :  { %v2980_v27 = vadd.f32 %v2979_v43, %v2978_v12  ;;  %v2991_v28 = vrot.slane %v2990_v62, 4 }
0x1237   :  { %v5363_v29 = vpop.eup %5362  ;;  %v6228_v60 = vpop.permute.xlu1 %3018 }
0x1238   :  { %v5365_v49 = vpop.eup %5364  ;;  %v2648_v17 = vmul.f32 1.0614054, %v5363_v29  ;;  %v2981_v39 = vrot.slane %v2980_v27, 2  ;;  %v2992_v36 = vadd.f32 %v2991_v28, %v2990_v62 }
0x1239   :  { %v2649_v63 = vmul.f32 1.0614054, %v5365_v49  ;;  %v5367_v54 = vpop.eup %5366 }
0x123a   :  { %v2650_v20 = vadd.f32 -1.4531521, %v2648_v17  ;;  %v2993_v11 = vrot.slane %v2992_v36, 2  ;;  %v2982_v51 = vadd.f32 %v2981_v39, %v2980_v27  ;;  %v5369_v9 = vpop.eup %5368  ;;  %v2635_v27 = vmul.f32 0.5, %v6201_v41 }
0x123b   :  { %v2651_v10 = vadd.f32 -1.4531521, %v2649_v63 }
0x123c   :  { %v2652_v26 = vmul.f32 %v5363_v29, %v2650_v20  ;;  %v2983_v47 = vrot.slane %v2982_v51, 1  ;;  %v2994_v57 = vadd.f32 %v2993_v11, %v2992_v36 }
0x123d   :  { %v2653_v19 = vmul.f32 %v5365_v49, %v2651_v10  ;;  %v6234_v63 = vpop.permute.xlu0 %3028 }
0x123e   :  { %v2654_v22 = vadd.f32 1.4214138, %v2652_v26  ;;  %v2984_v40 = vadd.f32 %v2983_v47, %v2982_v51  ;;  %v2995_v31 = vrot.slane %v2994_v57, 1 }
0x123f   :  { %v2655_v33 = vadd.f32 1.4214138, %v2653_v19 }
0x1240   :  { %v2656_v13 = vmul.f32 %v5363_v29, %v2654_v22  ;;  %4769 = vpush %v2984_v40  ;;  %v2996_v58 = vadd.f32 %v2995_v31, %v2994_v57 }
0x1241   :  { %v2657_v53 = vmul.f32 %v5365_v49, %v2655_v33 }
0x1242   :  { %v2658_v61 = vadd.f32 -0.28449672, %v2656_v13  ;;  %4771 = vpush %v2996_v58 }
0x1243   :  { %v2659_v2 = vadd.f32 -0.28449672, %v2657_v53 }
0x1244   :  { %v2660_v37 = vmul.f32 %v5363_v29, %v2658_v61 }
0x1245   :  { %v2661_v18 = vmul.f32 %v5365_v49, %v2659_v2 }
0x1246   :  { %v2662_v16 = vadd.f32 0.2548296, %v2660_v37 }
0x1247   :  { %v2663_v5 = vadd.f32 0.2548296, %v2661_v18 }
0x1248   :  { %v2664_v59 = vmul.f32 %v5363_v29, %v2662_v16 }
0x1249   :  { %v2665_v3 = vmul.f32 %v5365_v49, %v2663_v5 }
0x124a   :  { %v2674_v21 = vmul.f32 %v5367_v54, %v2664_v59 }
0x124b   :  { %v2675_v0 = vmul.f32 %v5369_v9, %v2665_v3 }
0x124c   :  { %v2676_v4 = vsub.f32 1.0, %v2674_v21 }
0x124d   :  { %v2677_v25 = vsub.f32 1.0, %v2675_v0 }
0x124e   :  { %v2680_v15 = vsub.f32 0.0, %v2676_v4 }
0x124f   :  { %v2681_v52 = vsub.f32 0.0, %v2677_v25 }
0x1250   :  { %v2682_v12 = vsel %vm2678_vm3, %v2676_v4, %v2680_v15 }
0x1251   :  { %v2683_v43 = vsel %vm2679_vm4, %v2677_v25, %v2681_v52  ;;  %v2684_v62 = vadd.f32 1.0, %v2682_v12 }
0x1252   :  { %v2685_v28 = vadd.f32 1.0, %v2683_v43 }
0x1253   :  { %v2686_v29 = vmul.f32 %v2684_v62, %v2634_v1 }
0x1254   :  { %v2687_v23 = vmul.f32 %v2685_v28, %v2635_v27 }
0x1255   :  { %v6216_v49 = vadd.f32 %v2686_v29, %v5946_v42 }
0x1256   :  { %v6219_v17 = vadd.f32 %v2687_v23, %v5949_v55 }
0x1258   :  { %v4684_v8 = vpack.c.bf16 %v6219_v17, %v6216_v49 }
0x125a   :  { %4685 = vmatpush3.bf16.msra.mxu0 %v4684_v8 }
0x125d   :  { %4429 = vmatmul.mubr.msk.f32.vlgmr.msra.gmra.mrb[14].mxu0 %vm2697_vm0, %v6103_v56  ;;  %v6230_v56 = vpop.permute.xlu1 %3022 }
0x125e   :  { %4451 = vmatprep.mubr.msk.f32.mxu0 %vm671_vm11, %v6128_v48 }
0x1261   :  { %v6236_v20 = vpop.permute.xlu1 %3032 }
0x1271   :  { %s4770_s0 = spop %4769 }
0x1272   :  { %s3000_s28 = smul.f32 0.00048828125, %s4770_s0 }
0x1273   :  { %s4772_s29 = spop %4771 }
0x1274   :  { %s3004_s30 = smul.f32 %s3000_s28, %s3000_s28  ;;  %v3007_v41 = vstv %s3000_s28 }
0x1275   :  { %s3003_s5 = smul.f32 0.00048828125, %s4772_s29  ;;  %v3008_v48 = vsub.f32 %v6183_v24, %v3007_v41  ;;  %v3009_v6 = vsub.f32 %v6178_v32, %v3007_v41 }
0x1277   :  { %s3005_s6 = ssub.f32 %s3003_s5, %s3004_s30 }
0x1279   :  { %s3006_s7 = smax.f32 %s5540_s27, %s3005_s6 }
0x127a   :  { %s3010_s8 = sadd.f32 1e-05, %s3006_s7 }
0x127c   :  { %v3011_v42 = vstv %s3010_s8 }
0x127d   :  { %5370 = vrsqrt.f32 %v3011_v42 }
0x1287   :  { %v5371_v55 = vpop.eup %5370 }
0x1288   :  { %4773 = vpush %v5371_v55 }
0x12b9   :  { %s4774_s9 = spop %4773 }
0x12ba   :  { %v3014_v35 = vstv %s4774_s9 }
0x12bb   :  { %v3015_v39 = vmul.f32 %v3014_v35, %v3008_v48  ;;  %v3016_v36 = vmul.f32 %v3014_v35, %v3009_v6 }
0x12bd   :  { %v3025_v11 = vmul.f32 %v6228_v60, %v3015_v39  ;;  %v3026_v51 = vmul.f32 %v6230_v56, %v3016_v36 }
0x12bf   :  { %v3035_v10 = vadd.f32 %v6234_v63, %v3025_v11  ;;  %v3036_v45 = vadd.f32 %v6236_v20, %v3026_v51 }
0x12c1   :  { %v3039_v26 = vmul.f32 0.70710677, %v3035_v10  ;;  %v3040_v24 = vmul.f32 0.70710677, %v3036_v45  ;;  %v3037_v6 = vmul.f32 0.5, %v3035_v10  ;;  %v3038_v51 = vmul.f32 0.5, %v3036_v45 }
0x12c3   :  { %v3041_v34 = vand.u32 2147483647, %v3039_v26  ;;  %v3042_v32 = vand.u32 2147483647, %v3040_v24  ;;  %vm3081_vm9 = vcmp.ge.f32.partialorder %v3039_v26, 0.0  ;;  %vm3082_vm10 = vcmp.ge.f32.partialorder %v3040_v24, 0.0 }
0x12c5   :  { %v3043_v47 = vmul.f32 0.3275911, %v3041_v34  ;;  %v3044_v57 = vmul.f32 0.3275911, %v3042_v32  ;;  %v3069_v40 = vsub.f32 0.0, %v3041_v34  ;;  %v3070_v31 = vsub.f32 0.0, %v3042_v32 }
0x12c7   :  { %v3045_v19 = vadd.f32 1.0, %v3043_v47  ;;  %v3046_v22 = vadd.f32 1.0, %v3044_v57  ;;  %v3071_v13 = vmul.f32 %v3069_v40, %v3041_v34  ;;  %v3072_v61 = vmul.f32 %v3070_v31, %v3042_v32 }
0x12c9   :  { %5372 = vrcp.f32 %v3045_v19  ;;  %v3073_v18 = vmul.f32 1.442695, %v3071_v13  ;;  %v3075_v59 = vmul.f32 1.442695, %v3072_v61 }
0x12ca   :  { %5374 = vrcp.f32 %v3046_v22 }
0x12cb   :  { %5376 = vpow2.f32 %v3073_v18 }
0x12cc   :  { %5378 = vpow2.f32 %v3075_v59 }
0x12d3   :  { %v5373_v33 = vpop.eup %5372 }
0x12d4   :  { %v5375_v58 = vpop.eup %5374  ;;  %v3051_v53 = vmul.f32 1.0614054, %v5373_v33 }
0x12d5   :  { %v3052_v2 = vmul.f32 1.0614054, %v5375_v58  ;;  %v5377_v62 = vpop.eup %5376 }
0x12d6   :  { %v3053_v37 = vadd.f32 -1.4531521, %v3051_v53  ;;  %v5379_v28 = vpop.eup %5378 }
0x12d7   :  { %v3054_v16 = vadd.f32 -1.4531521, %v3052_v2  ;;  %v5555_v2 = vmov 15  }
0x12d8   :  { %v3055_v5 = vmul.f32 %v5373_v33, %v3053_v37  ;;  %5246 = vset.pattern.permute.xlu0 %v5555_v2 }
0x12d9   :  { %v3056_v54 = vmul.f32 %v5375_v58, %v3054_v16 }
0x12da   :  { %v3057_v3 = vadd.f32 1.4214138, %v3055_v5 }
0x12db   :  { %v3058_v9 = vadd.f32 1.4214138, %v3056_v54 }
0x12dc   :  { %v3059_v21 = vmul.f32 %v5373_v33, %v3057_v3 }
0x12dd   :  { %v3060_v0 = vmul.f32 %v5375_v58, %v3058_v9 }
0x12de   :  { %v3061_v4 = vadd.f32 -0.28449672, %v3059_v21 }
0x12df   :  { %v3062_v25 = vadd.f32 -0.28449672, %v3060_v0 }
0x12e0   :  { %v3063_v15 = vmul.f32 %v5373_v33, %v3061_v4 }
0x12e1   :  { %v3064_v52 = vmul.f32 %v5375_v58, %v3062_v25 }
0x12e2   :  { %v3065_v12 = vadd.f32 0.2548296, %v3063_v15 }
0x12e3   :  { %v3066_v1 = vadd.f32 0.2548296, %v3064_v52 }
0x12e4   :  { %v3067_v43 = vmul.f32 %v5373_v33, %v3065_v12 }
0x12e5   :  { %v3068_v27 = vmul.f32 %v5375_v58, %v3066_v1 }
0x12e6   :  { %v3077_v29 = vmul.f32 %v5377_v62, %v3067_v43 }
0x12e7   :  { %v3078_v23 = vmul.f32 %v5379_v28, %v3068_v27 }
0x12e8   :  { %v3079_v8 = vsub.f32 1.0, %v3077_v29 }
0x12e9   :  { %v3080_v42 = vsub.f32 1.0, %v3078_v23 }
0x12ea   :  { %v3083_v55 = vsub.f32 0.0, %v3079_v8 }
0x12eb   :  { %v3084_v41 = vsub.f32 0.0, %v3080_v42 }
0x12ec   :  { %v3085_v48 = vsel %vm3081_vm9, %v3079_v8, %v3083_v55 }
0x12ed   :  { %v3087_v35 = vadd.f32 1.0, %v3085_v48  ;;  %v3086_v39 = vsel %vm3082_vm10, %v3080_v42, %v3084_v41 }
0x12ee   :  { %v3088_v11 = vadd.f32 1.0, %v3086_v39 }
0x12ef   :  { %v3089_v36 = vmul.f32 %v3087_v35, %v3037_v6 }
0x12f0   :  { %v3090_v34 = vmul.f32 %v3088_v11, %v3038_v51 }
0x12f1   :  { %3093 = vrot.lane.b32.xlu1 %v3089_v36, %s5532_s3 }
0x12f5   :  { %3095 = vrot.lane.b32.xlu1 %v3090_v34, %s5532_s3 }
0x12f9   :  { %3429 = vrot.lane.b32.xlu1 %v6216_v49, %s5532_s3 }
0x12fd   :  { %3431 = vrot.lane.b32.xlu1 %v6219_v17, %s5532_s3 }
0x1363   :  { %v3094_v26 = vpop.permute.xlu1 %3093 }
0x1364   :  { %3099 = vst.msk [vmem:[#allocation2] sm:$0xff] %vm283_vm1, %v3094_v26 }
0x1365   :  { %3100 = vst.msk [vmem:[#allocation2 + $0x8] sm:$0xff] %vm285_vm2, %v3094_v26 }
0x1367   :  { %v3096_v10 = vpop.permute.xlu1 %3095 }
0x1368   :  { %3101 = vst.msk [vmem:[#allocation2 + $0x10] sm:$0xff] %vm283_vm1, %v3096_v10 }
0x1369   :  { %3102 = vst.msk [vmem:[#allocation2 + $0x18] sm:$0xff] %vm285_vm2, %v3096_v10 }
0x136b   :  { %v3430_v45 = vpop.permute.xlu1 %3429  ;;  %v3173_v24 = vld [vmem:[#allocation2] sm:$0xff] }
0x136c   :  { %v3174_v32 = vld [vmem:[#allocation2 + $0x8] sm:$0xff]  ;;  %3435 = vst.msk [vmem:[#allocation2] sm:$0xff] %vm283_vm1, %v3430_v45 }
0x136d   :  { %v5196_v47 = vpack.i.bf16 %v3174_v32, %v3173_v24  ;;  %3436 = vst.msk [vmem:[#allocation2 + $0x8] sm:$0xff] %vm285_vm2, %v3430_v45 }
0x136f   :  { %5197 = vrot.lane.b32.xlu0 %v5196_v47, %s5537_s18  ;;  %5167 = vrot.lane.b32.xlu1 %v5196_v47, %s5534_s16  ;;  %v3432_v49 = vpop.permute.xlu1 %3431  ;;  %v3109_v17 = vld [vmem:[#allocation2 + $0x10] sm:$0xff] }
0x1370   :  { %v3110_v57 = vld [vmem:[#allocation2 + $0x18] sm:$0xff]  ;;  %v4669_v22 = vpack.c.bf16 %v3109_v17, %v3173_v24  ;;  %3437 = vst.msk [vmem:[#allocation2 + $0x10] sm:$0xff] %vm283_vm1, %v3432_v49 }
0x1371   :  { %v5171_v19 = vpack.i.bf16 %v3110_v57, %v3109_v17  ;;  %3438 = vst.msk [vmem:[#allocation2 + $0x18] sm:$0xff] %vm285_vm2, %v3432_v49 }
0x1372   :  { %4670 = vmatpush3.bf16.msra.mxu1 %v4669_v22 }
0x1373   :  { %5172 = vrot.lane.b32.xlu1 %v5171_v19, %s5534_s16  ;;  %v3443_v40 = vld [vmem:[#allocation2] sm:$0xff]  ;;  %4671 = vmatprep.subr.bf16.mxu1 %v5550_v44 }
0x1374   :  { %v3444_v31 = vld [vmem:[#allocation2 + $0x8] sm:$0xff] }
0x1375   :  { %v5206_v33 = vpack.i.bf16 %v3444_v31, %v3443_v40 }
0x1377   :  { %5177 = vrot.lane.b32.xlu1 %v5196_v47, %s5533_s15  ;;  %5207 = vrot.lane.b32.xlu0 %v5206_v33, %s5534_s16  ;;  %v3440_v13 = vld [vmem:[#allocation2 + $0x10] sm:$0xff] }
0x1378   :  { %v4686_v58 = vpack.c.bf16 %v3440_v13, %v3443_v40  ;;  %v3446_v53 = vld [vmem:[#allocation2 + $0x18] sm:$0xff] }
0x1379   :  { %v5211_v61 = vpack.i.bf16 %v3446_v53, %v3440_v13 }
0x137a   :  { %4687 = vmatprep.subr.bf16.mxu0 %v4686_v58 }
0x137b   :  { %5182 = vrot.lane.b32.xlu1 %v5171_v19, %s5533_s15  ;;  %5217 = vrot.lane.b32.xlu0 %v5206_v33, %s5533_s15 }
0x137c   :  { %4689 = vmatpush3.bf16.msra.mxu0 %v4686_v58 }
0x137f   :  { %5187 = vrot.lane.b32.xlu1 %v5196_v47, %s5536_s17  ;;  %5227 = vrot.lane.b32.xlu0 %v5206_v33, %s5536_s17 }
0x1383   :  { %5192 = vrot.lane.b32.xlu1 %v5171_v19, %s5536_s17  ;;  %5237 = vrot.lane.b32.xlu0 %v5206_v33, %s5537_s18 }
0x1387   :  { %5202 = vrot.lane.b32.xlu1 %v5171_v19, %s5537_s18  ;;  %3207 = vperm.xlu0 %5246, %v6172_v38   ;;  %v6285_v19 = vld [vmem:[#allocation9 + $0x38] sm:$0xff] }
0x138b   :  { %5212 = vrot.lane.b32.xlu1 %v5211_v61, %s5534_s16 }
0x138f   :  { %5222 = vrot.lane.b32.xlu1 %v5211_v61, %s5533_s15 }
0x1393   :  { %5232 = vrot.lane.b32.xlu1 %v5211_v61, %s5536_s17 }
0x1397   :  { %5242 = vrot.lane.b32.xlu1 %v5211_v61, %s5537_s18 }
0x13e1   :  { %v5168_v37 = vpop.permute.xlu1 %5167  ;;  %v5198_v12 = vpop.permute.xlu0 %5197 }
0x13e2   :  { %v5170_v18 = vunpack.i.h.bf16 %v5168_v37  ;;  %v5169_v16 = vunpack.i.l.bf16 %v5168_v37  ;;  %v5200_v41 = vunpack.i.h.bf16 %v5198_v12  ;;  %v5199_v48 = vunpack.i.l.bf16 %v5198_v12 }
0x13e4   :  { %v3123_v3 = vsel %vm297_vm5, %v5169_v16, %v5170_v18  ;;  %v3189_v26 = vsel %vm333_vm8, %v5199_v48, %v5200_v41 }
0x13e5   :  { %v5173_v5 = vpop.permute.xlu1 %5172 }
0x13e6   :  { %v5175_v59 = vunpack.i.h.bf16 %v5173_v5  ;;  %v5174_v54 = vunpack.i.l.bf16 %v5173_v5 }
0x13e8   :  { %v3124_v9 = vsel %vm297_vm5, %v5174_v54, %v5175_v59 }
0x13e9   :  { %v4672_v21 = vpack.c.bf16 %v3124_v9, %v3123_v3  ;;  %v5178_v0 = vpop.permute.xlu1 %5177  ;;  %v5208_v28 = vpop.permute.xlu0 %5207 }
0x13ea   :  { %v5180_v4 = vunpack.i.h.bf16 %v5178_v0  ;;  %v5179_v25 = vunpack.i.l.bf16 %v5178_v0  ;;  %v5210_v10 = vunpack.i.h.bf16 %v5208_v28  ;;  %v5209_v45 = vunpack.i.l.bf16 %v5208_v28 }
0x13eb   :  { %4673 = vmatpush3.bf16.msra.mxu1 %v4672_v21 }
0x13ec   :  { %4674 = vmatprep.subr.bf16.mxu1 %v5550_v44  ;;  %v3145_v1 = vsel %vm309_vm6, %v5179_v25, %v5180_v4  ;;  %v3459_v31 = vsel %vm297_vm5, %v5209_v45, %v5210_v10 }
0x13ed   :  { %v5183_v38 = vpop.permute.xlu1 %5182  ;;  %v5218_v39 = vpop.permute.xlu0 %5217 }
0x13ee   :  { %v5185_v15 = vunpack.i.h.bf16 %v5183_v38  ;;  %v5184_v52 = vunpack.i.l.bf16 %v5183_v38  ;;  %v5220_v22 = vunpack.i.h.bf16 %v5218_v39  ;;  %v5219_v40 = vunpack.i.l.bf16 %v5218_v39 }
0x13f0   :  { %v3146_v43 = vsel %vm309_vm6, %v5184_v52, %v5185_v15  ;;  %v3481_v18 = vsel %vm309_vm6, %v5219_v40, %v5220_v22 }
0x13f1   :  { %v4675_v62 = vpack.c.bf16 %v3146_v43, %v3145_v1  ;;  %v5188_v27 = vpop.permute.xlu1 %5187  ;;  %v5228_v57 = vpop.permute.xlu0 %5227 }
0x13f2   :  { %v5190_v29 = vunpack.i.h.bf16 %v5188_v27  ;;  %v5189_v23 = vunpack.i.l.bf16 %v5188_v27  ;;  %v5230_v2 = vunpack.i.h.bf16 %v5228_v57  ;;  %v5229_v37 = vunpack.i.l.bf16 %v5228_v57 }
0x13f3   :  { %4676 = vmatpush3.bf16.msra.mxu1 %v4675_v62  ;;  %v6302_v62 = vpop.f32.mrb[14].mxu0 }
0x13f4   :  { %4677 = vmatprep.subr.bf16.mxu1 %v5550_v44  ;;  %v3167_v6 = vsel %vm321_vm7, %v5189_v23, %v5190_v29  ;;  %v3503_v4 = vsel %vm321_vm7, %v5229_v37, %v5230_v2  ;;  %v4430_v27 = vpop.f32.mrb[15].mxu0 }
0x13f5   :  { %v5193_v8 = vpop.permute.xlu1 %5192  ;;  %v5238_v5 = vpop.permute.xlu0 %5237 }
0x13f6   :  { %v5195_v42 = vunpack.i.h.bf16 %v5193_v8  ;;  %v5194_v55 = vunpack.i.l.bf16 %v5193_v8  ;;  %v5240_v21 = vunpack.i.h.bf16 %v5238_v5  ;;  %v5239_v0 = vunpack.i.l.bf16 %v5238_v5 }
0x13f8   :  { %v3168_v35 = vsel %vm321_vm7, %v5194_v55, %v5195_v42  ;;  %v3525_v12 = vsel %vm333_vm8, %v5239_v0, %v5240_v21 }
0x13f9   :  { %v4678_v36 = vpack.c.bf16 %v3168_v35, %v3167_v6  ;;  %v5203_v11 = vpop.permute.xlu1 %5202 }
0x13fa   :  { %v5205_v51 = vunpack.i.h.bf16 %v5203_v11  ;;  %v5204_v34 = vunpack.i.l.bf16 %v5203_v11 }
0x13fb   :  { %4679 = vmatpush3.bf16.msra.mxu1 %v4678_v36 }
0x13fc   :  { %v3190_v24 = vsel %vm333_vm8, %v5204_v34, %v5205_v51  ;;  %4680 = vmatprep.subr.bf16.mxu1 %v5550_v44 }
0x13fd   :  { %v4681_v32 = vpack.c.bf16 %v3190_v24, %v3189_v26  ;;  %v5213_v47 = vpop.permute.xlu1 %5212 }
0x13fe   :  { %v5215_v49 = vunpack.i.h.bf16 %v5213_v47  ;;  %v5214_v17 = vunpack.i.l.bf16 %v5213_v47 }
0x13ff   :  { %4682 = vmatpush3.bf16.msra.mxu1 %v4681_v32 }
0x1400   :  { %v3460_v33 = vsel %vm297_vm5, %v5214_v17, %v5215_v49  ;;  %4706 = vmatprep.subr.bf16.mxu1 %v5550_v44 }
0x1401   :  { %v5223_v13 = vpop.permute.xlu1 %5222  ;;  %v4690_v58 = vpack.c.bf16 %v3460_v33, %v3459_v31 }
0x1402   :  { %v5225_v53 = vunpack.i.h.bf16 %v5223_v13  ;;  %v5224_v61 = vunpack.i.l.bf16 %v5223_v13  ;;  %4422 = vmatmul.mubr.msk.f32.vlgmr.msra.gmra.mrb[14].mxu1 %vm671_vm11, %v6285_v19 }
0x1403   :  { %4691 = vmatprep.subr.bf16.mxu0 %v4690_v58  ;;  %4474 = vmatprep.mubr.msk.f32.mxu1 %vm5551_vm15, %v5531_v50 }
0x1404   :  { %4693 = vmatpush3.bf16.msra.mxu0 %v4690_v58  ;;  %v3482_v16 = vsel %vm309_vm6, %v5224_v61, %v5225_v53 }
0x1405   :  { %v5233_v59 = vpop.permute.xlu1 %5232  ;;  %v4694_v54 = vpack.c.bf16 %v3482_v16, %v3481_v18 }
0x1406   :  { %v5235_v3 = vunpack.i.h.bf16 %v5233_v59  ;;  %v5234_v9 = vunpack.i.l.bf16 %v5233_v59  ;;  %v6304_v28 = vpop.permute.xlu0 %3207 }
0x1407   :  { %4695 = vmatprep.subr.bf16.mxu0 %v4694_v54 }
0x1408   :  { %4697 = vmatpush3.bf16.msra.mxu0 %v4694_v54  ;;  %v3504_v50 = vsel %vm321_vm7, %v5234_v9, %v5235_v3 }
0x1409   :  { %v5243_v25 = vpop.permute.xlu1 %5242  ;;  %v4698_v38 = vpack.c.bf16 %v3504_v50, %v3503_v4 }
0x140a   :  { %v5245_v15 = vunpack.i.h.bf16 %v5243_v25  ;;  %v5244_v52 = vunpack.i.l.bf16 %v5243_v25 }
0x140b   :  { %4699 = vmatprep.subr.bf16.mxu0 %v4698_v38 }
0x140c   :  { %4701 = vmatpush3.bf16.msra.mxu0 %v4698_v38  ;;  %v3526_v1 = vsel %vm333_vm8, %v5244_v52, %v5245_v15 }
0x140d   :  { %v4702_v43 = vpack.c.bf16 %v3526_v1, %v3525_v12 }
0x140f   :  { %4703 = vmatprep.subr.bf16.mxu0 %v4702_v43 }
0x1410   :  { %4705 = vmatpush3.bf16.msra.mxu0 %v4702_v43 }
0x1413   :  { %4452 = vmatmul.mubr.msk.f32.vlgmr.msra.gmra.mrb[16].mxu0 %vm671_vm11, %v6156_v7 }
0x14d5   :  { %v3279_v29 = vpop.f32.mrb[14].mxu1 }
0x14d6   :  { %v3280_v23 = vadd.f32 %v3279_v29, %v6304_v28  ;;  %v4423_v8 = vpop.f32.mrb[15].mxu1 }
0x14d8   :  { %3283 = vadd.xlane.f32.xlu1 %v3280_v23  ;;  %v3292_v42 = vmul.f32 %v3280_v23, %v3280_v23 }
0x14da   :  { %3293 = vadd.xlane.f32.xlu0 %v3292_v42 }
0x14e6   :  { %v4453_v55 = vpop.f32.mrb[16].mxu0 }
0x14e7   :  { %v6308_v41 = vadd.f32 %v4453_v55, %v6175_v30  ;;  %v3607_v48 = vpop.f32.mrb[17].mxu0 }
0x14e8   :  { %v6311_v6 = vadd.f32 %v3607_v48, %v6180_v46 }
0x14e9   :  { %v3627_v7 = vmul.f32 %v6308_v41, %v6308_v41 }
0x14ea   :  { %v3626_v35 = vmul.f32 %v6311_v6, %v6311_v6  ;;  %v3616_v39 = vadd.f32 %v6308_v41, %v6311_v6 }
0x14ec   :  { %3617 = vadd.xlane.f32.xlu1 %v3616_v39  ;;  %v3628_v36 = vadd.f32 %v3627_v7, %v3626_v35 }
0x14ee   :  { %3629 = vadd.xlane.f32.xlu0 %v3628_v36 }
0x1565   :  { %v3284_v11 = vpop.xlane.xlu1 %3283 }
0x1566   :  { %v3285_v51 = vrot.slane %v3284_v11, 4 }
0x1567   :  { %v3294_v30 = vpop.xlane.xlu0 %3293 }
0x1568   :  { %v3286_v34 = vadd.f32 %v3285_v51, %v3284_v11  ;;  %v3295_v26 = vrot.slane %v3294_v30, 4 }
0x156a   :  { %v3287_v10 = vrot.slane %v3286_v34, 2  ;;  %v3296_v46 = vadd.f32 %v3295_v26, %v3294_v30 }
0x156c   :  { %v3297_v45 = vrot.slane %v3296_v46, 2  ;;  %v3288_v24 = vadd.f32 %v3287_v10, %v3286_v34 }
0x156e   :  { %v3289_v32 = vrot.slane %v3288_v24, 1  ;;  %v3298_v47 = vadd.f32 %v3297_v45, %v3296_v46 }
0x1570   :  { %v3290_v49 = vadd.f32 %v3289_v32, %v3288_v24  ;;  %v3299_v17 = vrot.slane %v3298_v47, 1 }
0x1572   :  { %4775 = vpush %v3290_v49  ;;  %v3300_v57 = vadd.f32 %v3299_v17, %v3298_v47 }
0x1574   :  { %4777 = vpush %v3300_v57 }
0x1579   :  { %v3618_v22 = vpop.xlane.xlu1 %3617 }
0x157a   :  { %v3619_v31 = vrot.slane %v3618_v22, 4 }
0x157b   :  { %v3630_v40 = vpop.xlane.xlu0 %3629 }
0x157c   :  { %v3631_v33 = vrot.slane %v3630_v40, 4  ;;  %v3620_v13 = vadd.f32 %v3619_v31, %v3618_v22 }
0x157e   :  { %v3632_v58 = vadd.f32 %v3631_v33, %v3630_v40  ;;  %v3621_v53 = vrot.slane %v3620_v13, 2 }
0x1580   :  { %v3633_v61 = vrot.slane %v3632_v58, 2  ;;  %v3622_v37 = vadd.f32 %v3621_v53, %v3620_v13 }
0x1582   :  { %v3634_v18 = vadd.f32 %v3633_v61, %v3632_v58  ;;  %v3623_v16 = vrot.slane %v3622_v37, 1 }
0x1584   :  { %v3635_v5 = vrot.slane %v3634_v18, 1  ;;  %v3624_v54 = vadd.f32 %v3623_v16, %v3622_v37 }
0x1586   :  { %v3636_v3 = vadd.f32 %v3635_v5, %v3634_v18 }
0x15a3   :  { %s4776_s10 = spop %4775 }
0x15a4   :  { %s3304_s11 = smul.f32 0.0009765625, %s4776_s10 }
0x15a5   :  { %s4778_s12 = spop %4777 }
0x15a6   :  { %s3308_s1 = smul.f32 %s3304_s11, %s3304_s11  ;;  %v3311_v9 = vstv %s3304_s11 }
0x15a7   :  { %s3307_s13 = smul.f32 0.0009765625, %s4778_s12  ;;  %v3312_v21 = vsub.f32 %v3280_v23, %v3311_v9 }
0x15a9   :  { %s3309_s2 = ssub.f32 %s3307_s13, %s3308_s1 }
0x15ab   :  { %s3310_s14 = smax.f32 %s5540_s27, %s3309_s2 }
0x15ac   :  { %s3313_s19 = sadd.f32 1e-05, %s3310_s14 }
0x15ae   :  { %v3314_v2 = vstv %s3313_s19 }
0x15af   :  { %5380 = vrsqrt.f32 %v3314_v2 }
0x15b9   :  { %v5381_v59 = vpop.eup %5380 }
0x15ba   :  { %4779 = vpush %v5381_v59 }
0x15bb   :  { %4781 = vpush %v3624_v54 }
0x15bc   :  { %4783 = vpush %v3636_v3 }
0x15eb   :  { %s4780_s20 = spop %4779 }
0x15ec   :  { %v3317_v0 = vstv %s4780_s20  ;;  %s4782_s21 = spop %4781 }
0x15ed   :  { %v6320_v4 = vmul.f32 %v3317_v0, %v3312_v21  ;;  %s3640_s22 = smul.f32 0.00048828125, %s4782_s21  ;;  %s4784_s23 = spop %4783 }
0x15ee   :  { %s3643_s24 = smul.f32 0.00048828125, %s4784_s23 }
0x15ef   :  { %s3644_s0 = smul.f32 %s3640_s22, %s3640_s22  ;;  %v3647_v38 = vstv %s3640_s22 }
0x15f0   :  { %v3648_v15 = vsub.f32 %v6311_v6, %v3647_v38  ;;  %v3649_v52 = vsub.f32 %v6308_v41, %v3647_v38 }
0x15f1   :  { %s3645_s28 = ssub.f32 %s3643_s24, %s3644_s0 }
0x15f3   :  { %s3646_s29 = smax.f32 %s5540_s27, %s3645_s28 }
0x15f4   :  { %s3650_s30 = sadd.f32 1e-05, %s3646_s29 }
0x15f6   :  { %v3651_v50 = vstv %s3650_s30 }
0x15f7   :  { %5382 = vrsqrt.f32 %v3651_v50 }
0x1601   :  { %v5383_v25 = vpop.eup %5382 }
0x1602   :  { %4785 = vpush %v5383_v25 }
0x1633   :  { %s4786_s5 = spop %4785 }
0x1634   :  { %v3654_v12 = vstv %s4786_s5 }
0x1635   :  { %v3655_v1 = vmul.f32 %v3654_v12, %v3648_v15  ;;  %v3656_v43 = vmul.f32 %v3654_v12, %v3649_v52 }
0x1637   :  { %v3657_v27 = vmul.f32 %v3655_v1, %v6228_v60  ;;  %v3658_v29 = vmul.f32 %v3656_v43, %v6230_v56 }
0x1639   :  { %v3659_v23 = vadd.f32 %v3657_v27, %v6234_v63  ;;  %v3660_v8 = vadd.f32 %v3658_v29, %v6236_v20 }
0x163b   :  { %v3663_v42 = vmul.f32 0.70710677, %v3659_v23  ;;  %v3664_v55 = vmul.f32 0.70710677, %v3660_v8  ;;  %v3661_v9 = vmul.f32 0.5, %v3659_v23  ;;  %v3662_v50 = vmul.f32 0.5, %v3660_v8 }
0x163d   :  { %v3665_v48 = vand.u32 2147483647, %v3663_v42  ;;  %v3666_v7 = vand.u32 2147483647, %v3664_v55  ;;  %vm3705_vm12 = vcmp.ge.f32.partialorder %v3663_v42, 0.0  ;;  %vm3706_vm13 = vcmp.ge.f32.partialorder %v3664_v55, 0.0 }
0x163f   :  { %v3667_v35 = vmul.f32 0.3275911, %v3665_v48  ;;  %v3668_v6 = vmul.f32 0.3275911, %v3666_v7  ;;  %v3693_v36 = vsub.f32 0.0, %v3665_v48  ;;  %v3694_v11 = vsub.f32 0.0, %v3666_v7 }
0x1641   :  { %v3669_v39 = vadd.f32 1.0, %v3667_v35  ;;  %v3670_v41 = vadd.f32 1.0, %v3668_v6  ;;  %v3695_v60 = vmul.f32 %v3693_v36, %v3665_v48  ;;  %v3696_v56 = vmul.f32 %v3694_v11, %v3666_v7 }
0x1643   :  { %5384 = vrcp.f32 %v3669_v39  ;;  %v3697_v20 = vmul.f32 1.442695, %v3695_v60  ;;  %v3699_v46 = vmul.f32 1.442695, %v3696_v56 }
0x1644   :  { %5386 = vrcp.f32 %v3670_v41 }
0x1645   :  { %5388 = vpow2.f32 %v3697_v20 }
0x1646   :  { %5390 = vpow2.f32 %v3699_v46 }
0x164d   :  { %v5385_v51 = vpop.eup %5384 }
0x164e   :  { %v5387_v30 = vpop.eup %5386  ;;  %v3675_v34 = vmul.f32 1.0614054, %v5385_v51 }
0x164f   :  { %v3676_v63 = vmul.f32 1.0614054, %v5387_v30  ;;  %v5389_v53 = vpop.eup %5388 }
0x1650   :  { %v3677_v26 = vadd.f32 -1.4531521, %v3675_v34  ;;  %v5391_v2 = vpop.eup %5390 }
0x1651   :  { %v3678_v10 = vadd.f32 -1.4531521, %v3676_v63 }
0x1652   :  { %v3679_v45 = vmul.f32 %v5385_v51, %v3677_v26 }
0x1653   :  { %v3680_v24 = vmul.f32 %v5387_v30, %v3678_v10 }
0x1654   :  { %v3681_v32 = vadd.f32 1.4214138, %v3679_v45 }
0x1655   :  { %v3682_v47 = vadd.f32 1.4214138, %v3680_v24 }
0x1656   :  { %v3683_v49 = vmul.f32 %v5385_v51, %v3681_v32 }
0x1657   :  { %v3684_v17 = vmul.f32 %v5387_v30, %v3682_v47 }
0x1658   :  { %v3685_v57 = vadd.f32 -0.28449672, %v3683_v49 }
0x1659   :  { %v3686_v22 = vadd.f32 -0.28449672, %v3684_v17 }
0x165a   :  { %v3687_v40 = vmul.f32 %v5385_v51, %v3685_v57 }
0x165b   :  { %v3688_v31 = vmul.f32 %v5387_v30, %v3686_v22 }
0x165c   :  { %v3689_v33 = vadd.f32 0.2548296, %v3687_v40 }
0x165d   :  { %v3690_v13 = vadd.f32 0.2548296, %v3688_v31 }
0x165e   :  { %v3691_v58 = vmul.f32 %v5385_v51, %v3689_v33 }
0x165f   :  { %v3692_v61 = vmul.f32 %v5387_v30, %v3690_v13 }
0x1660   :  { %v3701_v37 = vmul.f32 %v5389_v53, %v3691_v58 }
0x1661   :  { %v3702_v18 = vmul.f32 %v5391_v2, %v3692_v61 }
0x1662   :  { %v3703_v16 = vsub.f32 1.0, %v3701_v37 }
0x1663   :  { %v3704_v5 = vsub.f32 1.0, %v3702_v18  ;;  %v5556_v18 = vmov 16  }
0x1664   :  { %v3707_v59 = vsub.f32 0.0, %v3703_v16  ;;  %5287 = vset.pattern.permute.xlu0 %v5556_v18 }
0x1665   :  { %v3708_v54 = vsub.f32 0.0, %v3704_v5 }
0x1666   :  { %v3709_v3 = vsel %vm3705_vm12, %v3703_v16, %v3707_v59  ;;  %v5557_v16 = vmov 17  }
0x1667   :  { %v3710_v21 = vsel %vm3706_vm13, %v3704_v5, %v3708_v54  ;;  %v3711_v0 = vadd.f32 1.0, %v3709_v3  ;;  %5288 = vset.pattern.permute.xlu1 %v5557_v16 }
0x1668   :  { %v3712_v25 = vadd.f32 1.0, %v3710_v21 }
0x1669   :  { %v3713_v38 = vmul.f32 %v3711_v0, %v3661_v9 }
0x166a   :  { %v3714_v15 = vmul.f32 %v3712_v25, %v3662_v50 }
0x166b   :  { %3717 = vrot.lane.b32.xlu1 %v3713_v38, %s5532_s3 }
0x166c   :  { %3719 = vrot.lane.b32.xlu0 %v3714_v15, %s5532_s3 }
0x16dd   :  { %v3718_v52 = vpop.permute.xlu1 %3717 }
0x16de   :  { %v3720_v12 = vpop.permute.xlu0 %3719  ;;  %3723 = vst.msk [vmem:[#allocation2] sm:$0xff] %vm283_vm1, %v3718_v52 }
0x16df   :  { %3724 = vst.msk [vmem:[#allocation2 + $0x8] sm:$0xff] %vm285_vm2, %v3718_v52  ;;  %3726 = vst.msk [vmem:[#allocation2 + $0x18] sm:$0xff] %vm285_vm2, %v3720_v12 }
0x16e0   :  { %3725 = vst.msk [vmem:[#allocation2 + $0x10] sm:$0xff] %vm283_vm1, %v3720_v12 }
0x16e5   :  { %v3753_v1 = vld [vmem:[#allocation2] sm:$0xff] }
0x16e6   :  { %v3754_v43 = vld [vmem:[#allocation2 + $0x8] sm:$0xff]  ;;  %v3734_v8 = vld [vmem:[#allocation2 + $0x18] sm:$0xff] }
0x16e7   :  { %v5257_v27 = vpack.i.bf16 %v3754_v43, %v3753_v1  ;;  %v3728_v29 = vld [vmem:[#allocation2 + $0x10] sm:$0xff] }
0x16e8   :  { %v4707_v23 = vpack.c.bf16 %v3728_v29, %v3753_v1  ;;  %v5252_v42 = vpack.i.bf16 %v3734_v8, %v3728_v29 }
0x16e9   :  { %5258 = vrot.lane.b32.xlu0 %v5257_v27, %s5533_s15  ;;  %5248 = vrot.lane.b32.xlu1 %v5257_v27, %s5534_s16 }
0x16ea   :  { %4708 = vmatpush3.bf16.msra.mxu1 %v4707_v23 }
0x16eb   :  { %4709 = vmatprep.subr.bf16.mxu1 %v5550_v44 }
0x16ed   :  { %5268 = vrot.lane.b32.xlu0 %v5257_v27, %s5536_s17  ;;  %5253 = vrot.lane.b32.xlu1 %v5252_v42, %s5534_s16 }
0x16f1   :  { %5278 = vrot.lane.b32.xlu0 %v5257_v27, %s5537_s18  ;;  %5263 = vrot.lane.b32.xlu1 %v5252_v42, %s5533_s15 }
0x16f5   :  { %5273 = vrot.lane.b32.xlu1 %v5252_v42, %s5536_s17 }
0x16f9   :  { %5283 = vrot.lane.b32.xlu1 %v5252_v42, %s5537_s18 }
0x175b   :  { %v5259_v55 = vpop.permute.xlu0 %5258  ;;  %v5249_v48 = vpop.permute.xlu1 %5248 }
0x175c   :  { %v5251_v7 = vunpack.i.h.bf16 %v5249_v48  ;;  %v5250_v35 = vunpack.i.l.bf16 %v5249_v48  ;;  %v5261_v11 = vunpack.i.h.bf16 %v5259_v55  ;;  %v5260_v51 = vunpack.i.l.bf16 %v5259_v55 }
0x175e   :  { %v3747_v60 = vsel %vm297_vm5, %v5250_v35, %v5251_v7  ;;  %v3769_v20 = vsel %vm309_vm6, %v5260_v51, %v5261_v11 }
0x175f   :  { %v5254_v6 = vpop.permute.xlu1 %5253  ;;  %v5269_v36 = vpop.permute.xlu0 %5268 }
0x1760   :  { %v5256_v39 = vunpack.i.h.bf16 %v5254_v6  ;;  %v5255_v41 = vunpack.i.l.bf16 %v5254_v6  ;;  %v5271_v10 = vunpack.i.h.bf16 %v5269_v36  ;;  %v5270_v46 = vunpack.i.l.bf16 %v5269_v36 }
0x1762   :  { %v3748_v30 = vsel %vm297_vm5, %v5255_v41, %v5256_v39  ;;  %v3791_v57 = vsel %vm321_vm7, %v5270_v46, %v5271_v10 }
0x1763   :  { %v4710_v56 = vpack.c.bf16 %v3748_v30, %v3747_v60  ;;  %v5264_v34 = vpop.permute.xlu1 %5263  ;;  %v5279_v24 = vpop.permute.xlu0 %5278 }
0x1764   :  { %v5266_v63 = vunpack.i.h.bf16 %v5264_v34  ;;  %v5265_v26 = vunpack.i.l.bf16 %v5264_v34  ;;  %v5281_v22 = vunpack.i.h.bf16 %v5279_v24  ;;  %v5280_v40 = vunpack.i.l.bf16 %v5279_v24 }
0x1765   :  { %4711 = vmatpush3.bf16.msra.mxu1 %v4710_v56 }
0x1766   :  { %v3770_v45 = vsel %vm309_vm6, %v5265_v26, %v5266_v63  ;;  %4712 = vmatprep.subr.bf16.mxu1 %v5550_v44  ;;  %v3813_v61 = vsel %vm333_vm8, %v5280_v40, %v5281_v22 }
0x1767   :  { %v4713_v32 = vpack.c.bf16 %v3770_v45, %v3769_v20  ;;  %v5274_v47 = vpop.permute.xlu1 %5273 }
0x1768   :  { %v5276_v49 = vunpack.i.h.bf16 %v5274_v47  ;;  %v5275_v17 = vunpack.i.l.bf16 %v5274_v47 }
0x1769   :  { %4714 = vmatpush3.bf16.msra.mxu1 %v4713_v32 }
0x176a   :  { %v3792_v31 = vsel %vm321_vm7, %v5275_v17, %v5276_v49  ;;  %4715 = vmatprep.subr.bf16.mxu1 %v5550_v44 }
0x176b   :  { %v4716_v33 = vpack.c.bf16 %v3792_v31, %v3791_v57  ;;  %v5284_v13 = vpop.permute.xlu1 %5283 }
0x176c   :  { %v5286_v58 = vunpack.i.h.bf16 %v5284_v13  ;;  %v5285_v53 = vunpack.i.l.bf16 %v5284_v13 }
0x176d   :  { %4717 = vmatpush3.bf16.msra.mxu1 %v4716_v33 }
0x176e   :  { %v3814_v2 = vsel %vm333_vm8, %v5285_v53, %v5286_v58  ;;  %4718 = vmatprep.subr.bf16.mxu1 %v5550_v44  ;;  %v5402_v44 = vld [vmem:[#allocation10] sm:$0xff] }
0x176f   :  { %v4719_v37 = vpack.c.bf16 %v3814_v2, %v3813_v61 }
0x1771   :  { %4720 = vmatpush3.bf16.msra.mxu1 %v4719_v37 }
0x1774   :  { %4475 = vmatmul.mubr.msk.f32.vlgmr.msra.gmra.mrb[16].mxu1 %vm671_vm11, %v6285_v19 }
0x1847   :  { %v3895_v5 = vpop.f32.mrb[16].mxu1 }
0x1848   :  { %v6358_v59 = vadd.f32 %v3895_v5, %v6304_v28  ;;  %v4476_v54 = vpop.f32.mrb[17].mxu1 }
0x184a   :  { %3899 = vadd.xlane.f32.xlu0 %v6358_v59  ;;  %v3908_v3 = vmul.f32 %v6358_v59, %v6358_v59 }
0x184c   :  { %3909 = vadd.xlane.f32.xlu1 %v3908_v3 }
0x185d   :  { %3325 = vperm.xlu1 %5288, %v5402_v44  }
0x1860   :  { %3320 = vperm.xlu0 %5287, %v5402_v44  }
0x1864   :  { %5289 = vset.pattern.permute.xlu0 %v5557_v16 }
0x18d7   :  { %v3900_v19 = vpop.xlane.xlu0 %3899 }
0x18d8   :  { %v3901_v9 = vrot.slane %v3900_v19, 4 }
0x18d9   :  { %v3910_v21 = vpop.xlane.xlu1 %3909 }
0x18da   :  { %v3902_v0 = vadd.f32 %v3901_v9, %v3900_v19  ;;  %v3911_v50 = vrot.slane %v3910_v21, 4 }
0x18dc   :  { %v3903_v25 = vrot.slane %v3902_v0, 2  ;;  %v3912_v38 = vadd.f32 %v3911_v50, %v3910_v21 }
0x18dd   :  { %v3326_v12 = vpop.permute.xlu1 %3325 }
0x18de   :  { %v3913_v28 = vrot.slane %v3912_v38, 2  ;;  %v3904_v15 = vadd.f32 %v3903_v25, %v3902_v0 }
0x18df   :  { %v3321_v52 = vpop.permute.xlu0 %3320 }
0x18e0   :  { %v3323_v1 = vmul.f32 %v3321_v52, %v6320_v4  ;;  %v3905_v43 = vrot.slane %v3904_v15, 1  ;;  %v3914_v27 = vadd.f32 %v3913_v28, %v3912_v38 }
0x18e2   :  { %v3328_v29 = vadd.f32 %v3326_v12, %v3323_v1  ;;  %v3906_v23 = vadd.f32 %v3905_v43, %v3904_v15  ;;  %v3915_v8 = vrot.slane %v3914_v27, 1 }
0x18e4   :  { %v3330_v42 = vmul.f32 0.70710677, %v3328_v29  ;;  %4787 = vpush %v3906_v23  ;;  %v3916_v55 = vadd.f32 %v3915_v8, %v3914_v27  ;;  %v3329_v32 = vmul.f32 0.5, %v3328_v29 }
0x18e6   :  { %v3331_v48 = vand.u32 2147483647, %v3330_v42  ;;  %4789 = vpush %v3916_v55  ;;  %vm3351_vm1 = vcmp.ge.f32.partialorder %v3330_v42, 0.0 }
0x18e8   :  { %v3332_v7 = vmul.f32 0.3275911, %v3331_v48  ;;  %v3345_v6 = vsub.f32 0.0, %v3331_v48 }
0x18ea   :  { %v3333_v35 = vadd.f32 1.0, %v3332_v7  ;;  %v3346_v41 = vmul.f32 %v3345_v6, %v3331_v48 }
0x18ec   :  { %5392 = vrcp.f32 %v3333_v35  ;;  %v3347_v51 = vmul.f32 1.442695, %v3346_v41 }
0x18ee   :  { %5394 = vpow2.f32 %v3347_v51 }
0x18f6   :  { %v5393_v39 = vpop.eup %5392 }
0x18f7   :  { %v3336_v36 = vmul.f32 1.0614054, %v5393_v39 }
0x18f8   :  { %v5395_v20 = vpop.eup %5394 }
0x18f9   :  { %v3337_v11 = vadd.f32 -1.4531521, %v3336_v36 }
0x18fb   :  { %v3338_v4 = vmul.f32 %v5393_v39, %v3337_v11 }
0x18fd   :  { %v3339_v60 = vadd.f32 1.4214138, %v3338_v4 }
0x18ff   :  { %v3340_v30 = vmul.f32 %v5393_v39, %v3339_v60 }
0x1901   :  { %v3341_v56 = vadd.f32 -0.28449672, %v3340_v30 }
0x1903   :  { %v3342_v34 = vmul.f32 %v5393_v39, %v3341_v56 }
0x1905   :  { %v3343_v63 = vadd.f32 0.2548296, %v3342_v34 }
0x1907   :  { %v3344_v26 = vmul.f32 %v5393_v39, %v3343_v63 }
0x1909   :  { %v3349_v10 = vmul.f32 %v5395_v20, %v3344_v26 }
0x190b   :  { %v3350_v46 = vsub.f32 1.0, %v3349_v10 }
0x190d   :  { %v3352_v45 = vsub.f32 0.0, %v3350_v46 }
0x190f   :  { %v3353_v24 = vsel %vm3351_vm1, %v3350_v46, %v3352_v45 }
0x1910   :  { %v3354_v47 = vadd.f32 1.0, %v3353_v24 }
0x1912   :  { %v3355_v49 = vmul.f32 %v3354_v47, %v3329_v32 }
0x1914   :  { %v3356_v17 = vadd.f32 %v3355_v49, %v6163_v14 }
0x1915   :  { %s4788_s3 = spop %4787 }
0x1916   :  { %s3920_s15 = smul.f32 0.0009765625, %s4788_s3  ;;  %3965 = vst [vmem:[#allocation12] sm:$0xff] %v3356_v17 }
0x1917   :  { %s4790_s16 = spop %4789 }
0x1918   :  { %s3924_s17 = smul.f32 %s3920_s15, %s3920_s15  ;;  %v3927_v40 = vstv %s3920_s15 }
0x1919   :  { %s3923_s18 = smul.f32 0.0009765625, %s4790_s16  ;;  %v3928_v31 = vsub.f32 %v6358_v59, %v3927_v40 }
0x191b   :  { %s3925_s6 = ssub.f32 %s3923_s18, %s3924_s17 }
0x191d   :  { %s3926_s7 = smax.f32 %s5540_s27, %s3925_s6  ;;  %s5558_s27 = smov [#allocation12]  }
0x191e   :  { %s3929_s8 = sadd.f32 1e-05, %s3926_s7  ;;  %s3973_s10 = sshll.u32 %s5558_s27, 4  ;;  %s3974_s10 = int_to_ptr.vmem [resolvable:$true] %s3973_s10 }
0x191f   :  { %s5491_s11 = scalar_lea.vmem %s3974_s10, 256  ;;  %p5496_p5 = scmp.lt.s32.totalorder %s3974_s10, %s3974_s10 }
0x1920   :  { %v3930_v57 = vstv %s3929_s8  ;;  %p5492_p4 = scmp.ne.s32.totalorder %s3974_s10, %s5491_s11  ;;  %p5497_p6 = scmp.lt.s32.totalorder %s5491_s11, %s5491_s11 }
0x1921   :  { %5396 = vrsqrt.f32 %v3930_v57 }
0x1922   :  { %p5498_p7 = por %p5497_p6, %p5496_p5 }
0x1924   :  { %p5499_p8 = pnand %p5498_p7, %p5492_p4 }
0x192b   :  { %v5397_v22 = vpop.eup %5396 }
0x192c   :  { %4791 = vpush %v5397_v22 }
0x195d   :  { %s4792_s9 = spop %4791 }
0x195e   :  { %v3933_v33 = vstv %s4792_s9 }
0x195f   :  { %v3934_v14 = vmul.f32 %v3933_v33, %v3928_v31 }
0x1961   :  { %v3935_v13 = vmul.f32 %v3934_v14, %v3321_v52 }
0x1963   :  { %v3936_v58 = vadd.f32 %v3935_v13, %v3326_v12 }
0x1965   :  { %v3938_v53 = vmul.f32 0.70710677, %v3936_v58  ;;  %v3937_v1 = vmul.f32 0.5, %v3936_v58 }
0x1967   :  { %v3939_v61 = vand.u32 2147483647, %v3938_v53  ;;  %vm3959_vm2 = vcmp.ge.f32.partialorder %v3938_v53, 0.0 }
0x1969   :  { %v3940_v2 = vmul.f32 0.3275911, %v3939_v61  ;;  %v3953_v18 = vsub.f32 0.0, %v3939_v61 }
0x196b   :  { %v3941_v37 = vadd.f32 1.0, %v3940_v2  ;;  %v3954_v5 = vmul.f32 %v3953_v18, %v3939_v61 }
0x196d   :  { %5398 = vrcp.f32 %v3941_v37  ;;  %v3955_v44 = vmul.f32 1.442695, %v3954_v5 }
0x196f   :  { %5400 = vpow2.f32 %v3955_v44 }
0x1977   :  { %v5399_v16 = vpop.eup %5398 }
0x1978   :  { %v3944_v54 = vmul.f32 1.0614054, %v5399_v16 }
0x1979   :  { %v5401_v38 = vpop.eup %5400 }
0x197a   :  { %v3945_v3 = vadd.f32 -1.4531521, %v3944_v54 }
0x197c   :  { %v3946_v19 = vmul.f32 %v5399_v16, %v3945_v3 }
0x197e   :  { %v3947_v9 = vadd.f32 1.4214138, %v3946_v19 }
0x1980   :  { %v3948_v59 = vmul.f32 %v5399_v16, %v3947_v9 }
0x1982   :  { %v3949_v21 = vadd.f32 -0.28449672, %v3948_v59 }
0x1984   :  { %v3950_v0 = vmul.f32 %v5399_v16, %v3949_v21 }
0x1986   :  { %v3951_v50 = vadd.f32 0.2548296, %v3950_v0 }
0x1988   :  { %v3952_v25 = vmul.f32 %v5399_v16, %v3951_v50 }
0x198a   :  { %v3957_v28 = vmul.f32 %v5401_v38, %v3952_v25 }
0x198c   :  { %v3958_v15 = vsub.f32 1.0, %v3957_v28 }
0x198e   :  { %v3960_v52 = vsub.f32 0.0, %v3958_v15 }
0x1990   :  { %v3961_v12 = vsel %vm3959_vm2, %v3958_v15, %v3960_v52 }
0x1991   :  { %v3962_v43 = vadd.f32 1.0, %v3961_v12 }
0x1993   :  { %v3963_v27 = vmul.f32 %v3962_v43, %v3937_v1 }
0x1995   :  { %v3964_v29 = vadd.f32 %v3963_v27, %v6302_v62 }
0x1997   :  { %3967 = vst [vmem:[#allocation12 + $0x8] sm:$0xff] %v3964_v29 }
0x1998   :  { %5502 = shalt.err (!%p5499_p8)
}
0x1999   :  { %s5503_s13 = scalar_lea.hbm %s6387_s4, 256 }
0x199a   :  { %p5504_p9 = scmp.ne.s32.totalorder %s6387_s4, %s5503_s13  ;;  %p5507_p10 = scmp.lt.u32.totalorder %s5503_s13, %s6387_s4 }
0x199c   :  { %p5509_p11 = pnand %p5507_p10, %p5504_p9 }
0x199e   :  { %5512 = shalt.err (!%p5509_p11)
}
0x199f   :  { %3979 = dma.vmem_to_hbm [thread:$0]  %s3974_s10, 256, %s6387_s4, [#allocation6], %s5522_s25, %s5522_s25, %s5523_s26  }
0x19a0   :  { %5519 = dma.done.wait [#allocation6], 256  }
0x19a1   :  { %5520 = vsyncadd [#allocation6], 4294967040 }
0x19a2   :  { %3983 = vsyncpa [#allocation5], 1 }
0x19a3   :  { %3984 = vsyncpa [#allocation8], 1 }
0x19a4   :  { %3985 = vsyncpa [#allocation11], 1 }
0x19a5   :  { %3986 = vsyncpa [#allocation6], 1 }

</bundles_post_ra>
